<compile_context>
chip_gen: v6e
topology: v6e:2x2x1
jax: 0.10.0
libtpu: 0.0.40
codegen_flags: <defaults>
</compile_context>

<pallas_src>
import jax
import jax.numpy as jnp
from jax.experimental import pallas as pl
from jax.experimental.pallas import tpu as pltpu

# (in_features, out_features) per Linear layer, in forward order.
_LAYERS = ((20, 5), (5, 3), (3, 5), (5, 20))
_RELU_AFTER = (True, False, True, False)

# Flat packing: [W1, b1, W2, b2, W3, b3, W4, b4], each W row-major (out, in).
_OFFSETS = []
_off = 0
for _fi, _fo in _LAYERS:
    _OFFSETS.append((_off, _off + _fi * _fo))   # (weight_offset, bias_offset)
    _off += _fi * _fo + _fo
_N_PARAMS = _off                                 # 263 floats total

_LANE = 128
_SUB = 8


def _round_up(n, m):
    return ((n + m - 1) // m) * m


def _mlp_kernel(p_ref, x_ref, o_ref):
    """p_ref: (263,) f32 in SMEM (packed weights+biases).
    x_ref / o_ref: (20, SB, 128) f32 VMEM tiles (features x batch-dense)."""
    n_in = _LAYERS[0][0]
    n_out = _LAYERS[-1][1]
    sb = x_ref.shape[1]

    # One (8, 128) batch chunk (= one f32 vreg per feature) at a time.
    for c in range(sb // _SUB):
        lo, hi = c * _SUB, (c + 1) * _SUB
        h = [x_ref[f, lo:hi, :] for f in range(n_in)]          # 20 x (8,128)

        for li, (fi, fo) in enumerate(_LAYERS):
            w_off, b_off = _OFFSETS[li]
            nxt = []
            for o in range(fo):
                # y[o] = sum_i W[o,i] * x[i] + b[o]  (scalar * vreg FMAs on the VPU)
                acc = h[0] * p_ref[w_off + o * fi]
                for i in range(1, fi):
                    acc = acc + h[i] * p_ref[w_off + o * fi + i]
                acc = acc + p_ref[b_off + o]
                if _RELU_AFTER[li]:
                    acc = jnp.maximum(acc, 0.0)
                nxt.append(acc)
            h = nxt

        for o in range(n_out):
            o_ref[o, lo:hi, :] = h[o]


def anomaly_autoencoder_forward(x, packed_params, max_tile_cols=2048):
    """x: (B, 10, 2) float32 -> (B, 10, 2) float32."""
    assert max_tile_cols % (_SUB * _LANE) == 0
    B = x.shape[0]
    x2 = x.reshape(B, 20).astype(jnp.float32)

    # Batch tile: multiple of 1024 columns, capped at max_tile_cols.
    tb = min(max_tile_cols, _round_up(B, _SUB * _LANE))
    bp = _round_up(B, tb)                    # padded batch
    sb = tb // _LANE                         # sublane rows per tile (multiple of 8)
    n_rows = bp // _LANE

    if bp != B:
        x2 = jnp.pad(x2, ((0, bp - B), (0, 0)))
    # Batch-on-lanes layout: (B, 20) -> (20, B) -> (20, B/128, 128).
    xt = x2.T.reshape(20, n_rows, _LANE)

    grid = (bp // tb,)
    out = pl.pallas_call(
        _mlp_kernel,
        out_shape=jax.ShapeDtypeStruct((20, n_rows, _LANE), jnp.float32),
        grid=grid,
        in_specs=[
            pl.BlockSpec(memory_space=pltpu.MemorySpace.SMEM),       # packed params
            pl.BlockSpec((20, sb, _LANE), lambda i: (0, i, 0)),      # x tile
        ],
        out_specs=pl.BlockSpec((20, sb, _LANE), lambda i: (0, i, 0)),
        compiler_params=pltpu.CompilerParams(
            dimension_semantics=("parallel",)),
    )(packed_params, xt)

    y = out.reshape(20, bp).T[:B]
    return y.reshape(B, 10, 2)


def init_params(key):
    """PyTorch nn.Linear-style init: W (out,in), b (out,), U(-1/sqrt(fan_in), +)."""
    params = []
    for fan_in, fan_out in _LAYERS:
        key, kw, kb = jax.random.split(key, 3)
        bound = 1.0 / (fan_in ** 0.5)
        w = jax.random.uniform(kw, (fan_out, fan_in), jnp.float32, -bound, bound)
        b = jax.random.uniform(kb, (fan_out,), jnp.float32, -bound, bound)
        params.append((w, b))
    return params


def pack_params(params):
    """Pack [W1,b1,...,W4,b4] into one flat f32 vector for the SMEM operand."""
    flat = []
    for w, b in params:
        flat.append(jnp.asarray(w, jnp.float32).reshape(-1))
        flat.append(jnp.asarray(b, jnp.float32).reshape(-1))
    packed = jnp.concatenate(flat)
    assert packed.shape == (_N_PARAMS,)
    return packed


def reference_forward(x, params):
    """Pure-JAX reference (PyTorch Linear math: y = x @ W.T + b)."""
    B = x.shape[0]
    hp = jax.lax.Precision.HIGHEST
    h = x.reshape(B, 20)
    (w1, b1), (w2, b2), (w3, b3), (w4, b4) = params
    h = jnp.maximum(jnp.dot(h, w1.T, precision=hp) + b1, 0.0)
    h = jnp.dot(h, w2.T, precision=hp) + b2
    h = jnp.maximum(jnp.dot(h, w3.T, precision=hp) + b3, 0.0)
    h = jnp.dot(h, w4.T, precision=hp) + b4
    return h.reshape(B, 10, 2)


if __name__ == "__main__":
    key = jax.random.PRNGKey(0)
    key, kx = jax.random.split(key)

    params = init_params(key)
    packed = pack_params(params)

    # Small case (single tile; batch padded 2 -> 1024 lane-dense columns).
    B = 2
    x = jax.random.normal(kx, (B, 10, 2), jnp.float32)
    out = jax.block_until_ready(anomaly_autoencoder_forward(x, packed))
    ref = reference_forward(x, params)
    assert out.shape == (B, 10, 2)
    assert jnp.allclose(out, ref, atol=1e-5, rtol=1e-5), "mismatch vs reference (small)"

    # Larger case exercising the pipelined batch grid + tail padding (grid=3).
    key, kx2 = jax.random.split(key)
    B2 = 4100
    x2 = jax.random.normal(kx2, (B2, 10, 2), jnp.float32)
    out2 = jax.block_until_ready(anomaly_autoencoder_forward(x2, packed))
    ref2 = reference_forward(x2, params)
    assert out2.shape == (B2, 10, 2)
    assert jnp.allclose(out2, ref2, atol=1e-4, rtol=1e-4), "mismatch vs reference (large)"

    print("KERNEL_OK")
</pallas_src>

<mosaic_0001>
module attributes {stable_mosaic.version = 11 : i64} {
  func.func @_mlp_kernel(%arg0: i32, %arg1: memref<263xf32, #tpu.memory_space<smem>>, %arg2: memref<20x8x128xf32, #tpu.memory_space<vmem>>, %arg3: memref<20x8x128xf32, #tpu.memory_space<vmem>>) attributes {dimension_semantics = [#tpu.dimension_semantics<parallel>], iteration_bounds = array<i64: 1>, scalar_prefetch = 0 : i64, scratch_operands = 0 : i64, tpu.core_type = #tpu.core_type<tc>, window_params = [{transform_indices = @transform_0, window_bounds = array<i64: 263>}, {transform_indices = @transform_1, window_bounds = array<i64: 20, 8, 128>}, {transform_indices = @transform_2, window_bounds = array<i64: 20, 8, 128>}]} {
    %c0 = arith.constant 0 : index
    %c0_0 = arith.constant 0 : index
    %c0_1 = arith.constant 0 : index
    %0 = vector.load %arg2[%c0, %c0_0, %c0_1] : memref<20x8x128xf32, #tpu.memory_space<vmem>>, vector<1x8x128xf32>
    %1 = vector.shape_cast %0 : vector<1x8x128xf32> to vector<8x128xf32>
    %c1 = arith.constant 1 : index
    %c0_2 = arith.constant 0 : index
    %c0_3 = arith.constant 0 : index
    %2 = vector.load %arg2[%c1, %c0_2, %c0_3] : memref<20x8x128xf32, #tpu.memory_space<vmem>>, vector<1x8x128xf32>
    %3 = vector.shape_cast %2 : vector<1x8x128xf32> to vector<8x128xf32>
    %c2 = arith.constant 2 : index
    %c0_4 = arith.constant 0 : index
    %c0_5 = arith.constant 0 : index
    %4 = vector.load %arg2[%c2, %c0_4, %c0_5] : memref<20x8x128xf32, #tpu.memory_space<vmem>>, vector<1x8x128xf32>
    %5 = vector.shape_cast %4 : vector<1x8x128xf32> to vector<8x128xf32>
    %c3 = arith.constant 3 : index
    %c0_6 = arith.constant 0 : index
    %c0_7 = arith.constant 0 : index
    %6 = vector.load %arg2[%c3, %c0_6, %c0_7] : memref<20x8x128xf32, #tpu.memory_space<vmem>>, vector<1x8x128xf32>
    %7 = vector.shape_cast %6 : vector<1x8x128xf32> to vector<8x128xf32>
    %c4 = arith.constant 4 : index
    %c0_8 = arith.constant 0 : index
    %c0_9 = arith.constant 0 : index
    %8 = vector.load %arg2[%c4, %c0_8, %c0_9] : memref<20x8x128xf32, #tpu.memory_space<vmem>>, vector<1x8x128xf32>
    %9 = vector.shape_cast %8 : vector<1x8x128xf32> to vector<8x128xf32>
    %c5 = arith.constant 5 : index
    %c0_10 = arith.constant 0 : index
    %c0_11 = arith.constant 0 : index
    %10 = vector.load %arg2[%c5, %c0_10, %c0_11] : memref<20x8x128xf32, #tpu.memory_space<vmem>>, vector<1x8x128xf32>
    %11 = vector.shape_cast %10 : vector<1x8x128xf32> to vector<8x128xf32>
    %c6 = arith.constant 6 : index
    %c0_12 = arith.constant 0 : index
    %c0_13 = arith.constant 0 : index
    %12 = vector.load %arg2[%c6, %c0_12, %c0_13] : memref<20x8x128xf32, #tpu.memory_space<vmem>>, vector<1x8x128xf32>
    %13 = vector.shape_cast %12 : vector<1x8x128xf32> to vector<8x128xf32>
    %c7 = arith.constant 7 : index
    %c0_14 = arith.constant 0 : index
    %c0_15 = arith.constant 0 : index
    %14 = vector.load %arg2[%c7, %c0_14, %c0_15] : memref<20x8x128xf32, #tpu.memory_space<vmem>>, vector<1x8x128xf32>
    %15 = vector.shape_cast %14 : vector<1x8x128xf32> to vector<8x128xf32>
    %c8 = arith.constant 8 : index
    %c0_16 = arith.constant 0 : index
    %c0_17 = arith.constant 0 : index
    %16 = vector.load %arg2[%c8, %c0_16, %c0_17] : memref<20x8x128xf32, #tpu.memory_space<vmem>>, vector<1x8x128xf32>
    %17 = vector.shape_cast %16 : vector<1x8x128xf32> to vector<8x128xf32>
    %c9 = arith.constant 9 : index
    %c0_18 = arith.constant 0 : index
    %c0_19 = arith.constant 0 : index
    %18 = vector.load %arg2[%c9, %c0_18, %c0_19] : memref<20x8x128xf32, #tpu.memory_space<vmem>>, vector<1x8x128xf32>
    %19 = vector.shape_cast %18 : vector<1x8x128xf32> to vector<8x128xf32>
    %c10 = arith.constant 10 : index
    %c0_20 = arith.constant 0 : index
    %c0_21 = arith.constant 0 : index
    %20 = vector.load %arg2[%c10, %c0_20, %c0_21] : memref<20x8x128xf32, #tpu.memory_space<vmem>>, vector<1x8x128xf32>
    %21 = vector.shape_cast %20 : vector<1x8x128xf32> to vector<8x128xf32>
    %c11 = arith.constant 11 : index
    %c0_22 = arith.constant 0 : index
    %c0_23 = arith.constant 0 : index
    %22 = vector.load %arg2[%c11, %c0_22, %c0_23] : memref<20x8x128xf32, #tpu.memory_space<vmem>>, vector<1x8x128xf32>
    %23 = vector.shape_cast %22 : vector<1x8x128xf32> to vector<8x128xf32>
    %c12 = arith.constant 12 : index
    %c0_24 = arith.constant 0 : index
    %c0_25 = arith.constant 0 : index
    %24 = vector.load %arg2[%c12, %c0_24, %c0_25] : memref<20x8x128xf32, #tpu.memory_space<vmem>>, vector<1x8x128xf32>
    %25 = vector.shape_cast %24 : vector<1x8x128xf32> to vector<8x128xf32>
    %c13 = arith.constant 13 : index
    %c0_26 = arith.constant 0 : index
    %c0_27 = arith.constant 0 : index
    %26 = vector.load %arg2[%c13, %c0_26, %c0_27] : memref<20x8x128xf32, #tpu.memory_space<vmem>>, vector<1x8x128xf32>
    %27 = vector.shape_cast %26 : vector<1x8x128xf32> to vector<8x128xf32>
    %c14 = arith.constant 14 : index
    %c0_28 = arith.constant 0 : index
    %c0_29 = arith.constant 0 : index
    %28 = vector.load %arg2[%c14, %c0_28, %c0_29] : memref<20x8x128xf32, #tpu.memory_space<vmem>>, vector<1x8x128xf32>
    %29 = vector.shape_cast %28 : vector<1x8x128xf32> to vector<8x128xf32>
    %c15 = arith.constant 15 : index
    %c0_30 = arith.constant 0 : index
    %c0_31 = arith.constant 0 : index
    %30 = vector.load %arg2[%c15, %c0_30, %c0_31] : memref<20x8x128xf32, #tpu.memory_space<vmem>>, vector<1x8x128xf32>
    %31 = vector.shape_cast %30 : vector<1x8x128xf32> to vector<8x128xf32>
    %c16 = arith.constant 16 : index
    %c0_32 = arith.constant 0 : index
    %c0_33 = arith.constant 0 : index
    %32 = vector.load %arg2[%c16, %c0_32, %c0_33] : memref<20x8x128xf32, #tpu.memory_space<vmem>>, vector<1x8x128xf32>
    %33 = vector.shape_cast %32 : vector<1x8x128xf32> to vector<8x128xf32>
    %c17 = arith.constant 17 : index
    %c0_34 = arith.constant 0 : index
    %c0_35 = arith.constant 0 : index
    %34 = vector.load %arg2[%c17, %c0_34, %c0_35] : memref<20x8x128xf32, #tpu.memory_space<vmem>>, vector<1x8x128xf32>
    %35 = vector.shape_cast %34 : vector<1x8x128xf32> to vector<8x128xf32>
    %c18 = arith.constant 18 : index
    %c0_36 = arith.constant 0 : index
    %c0_37 = arith.constant 0 : index
    %36 = vector.load %arg2[%c18, %c0_36, %c0_37] : memref<20x8x128xf32, #tpu.memory_space<vmem>>, vector<1x8x128xf32>
    %37 = vector.shape_cast %36 : vector<1x8x128xf32> to vector<8x128xf32>
    %c19 = arith.constant 19 : index
    %c0_38 = arith.constant 0 : index
    %c0_39 = arith.constant 0 : index
    %38 = vector.load %arg2[%c19, %c0_38, %c0_39] : memref<20x8x128xf32, #tpu.memory_space<vmem>>, vector<1x8x128xf32>
    %39 = vector.shape_cast %38 : vector<1x8x128xf32> to vector<8x128xf32>
    %c0_40 = arith.constant 0 : index
    %40 = memref.load %arg1[%c0_40] : memref<263xf32, #tpu.memory_space<smem>>
    %41 = vector.broadcast %40 : f32 to vector<8x128xf32>
    %42 = arith.mulf %1, %41 : vector<8x128xf32>
    %c1_41 = arith.constant 1 : index
    %43 = memref.load %arg1[%c1_41] : memref<263xf32, #tpu.memory_space<smem>>
    %44 = vector.broadcast %43 : f32 to vector<8x128xf32>
    %45 = arith.mulf %3, %44 : vector<8x128xf32>
    %46 = arith.addf %42, %45 : vector<8x128xf32>
    %c2_42 = arith.constant 2 : index
    %47 = memref.load %arg1[%c2_42] : memref<263xf32, #tpu.memory_space<smem>>
    %48 = vector.broadcast %47 : f32 to vector<8x128xf32>
    %49 = arith.mulf %5, %48 : vector<8x128xf32>
    %50 = arith.addf %46, %49 : vector<8x128xf32>
    %c3_43 = arith.constant 3 : index
    %51 = memref.load %arg1[%c3_43] : memref<263xf32, #tpu.memory_space<smem>>
    %52 = vector.broadcast %51 : f32 to vector<8x128xf32>
    %53 = arith.mulf %7, %52 : vector<8x128xf32>
    %54 = arith.addf %50, %53 : vector<8x128xf32>
    %c4_44 = arith.constant 4 : index
    %55 = memref.load %arg1[%c4_44] : memref<263xf32, #tpu.memory_space<smem>>
    %56 = vector.broadcast %55 : f32 to vector<8x128xf32>
    %57 = arith.mulf %9, %56 : vector<8x128xf32>
    %58 = arith.addf %54, %57 : vector<8x128xf32>
    %c5_45 = arith.constant 5 : index
    %59 = memref.load %arg1[%c5_45] : memref<263xf32, #tpu.memory_space<smem>>
    %60 = vector.broadcast %59 : f32 to vector<8x128xf32>
    %61 = arith.mulf %11, %60 : vector<8x128xf32>
    %62 = arith.addf %58, %61 : vector<8x128xf32>
    %c6_46 = arith.constant 6 : index
    %63 = memref.load %arg1[%c6_46] : memref<263xf32, #tpu.memory_space<smem>>
    %64 = vector.broadcast %63 : f32 to vector<8x128xf32>
    %65 = arith.mulf %13, %64 : vector<8x128xf32>
    %66 = arith.addf %62, %65 : vector<8x128xf32>
    %c7_47 = arith.constant 7 : index
    %67 = memref.load %arg1[%c7_47] : memref<263xf32, #tpu.memory_space<smem>>
    %68 = vector.broadcast %67 : f32 to vector<8x128xf32>
    %69 = arith.mulf %15, %68 : vector<8x128xf32>
    %70 = arith.addf %66, %69 : vector<8x128xf32>
    %c8_48 = arith.constant 8 : index
    %71 = memref.load %arg1[%c8_48] : memref<263xf32, #tpu.memory_space<smem>>
    %72 = vector.broadcast %71 : f32 to vector<8x128xf32>
    %73 = arith.mulf %17, %72 : vector<8x128xf32>
    %74 = arith.addf %70, %73 : vector<8x128xf32>
    %c9_49 = arith.constant 9 : index
    %75 = memref.load %arg1[%c9_49] : memref<263xf32, #tpu.memory_space<smem>>
    %76 = vector.broadcast %75 : f32 to vector<8x128xf32>
    %77 = arith.mulf %19, %76 : vector<8x128xf32>
    %78 = arith.addf %74, %77 : vector<8x128xf32>
    %c10_50 = arith.constant 10 : index
    %79 = memref.load %arg1[%c10_50] : memref<263xf32, #tpu.memory_space<smem>>
    %80 = vector.broadcast %79 : f32 to vector<8x128xf32>
    %81 = arith.mulf %21, %80 : vector<8x128xf32>
    %82 = arith.addf %78, %81 : vector<8x128xf32>
    %c11_51 = arith.constant 11 : index
    %83 = memref.load %arg1[%c11_51] : memref<263xf32, #tpu.memory_space<smem>>
    %84 = vector.broadcast %83 : f32 to vector<8x128xf32>
    %85 = arith.mulf %23, %84 : vector<8x128xf32>
    %86 = arith.addf %82, %85 : vector<8x128xf32>
    %c12_52 = arith.constant 12 : index
    %87 = memref.load %arg1[%c12_52] : memref<263xf32, #tpu.memory_space<smem>>
    %88 = vector.broadcast %87 : f32 to vector<8x128xf32>
    %89 = arith.mulf %25, %88 : vector<8x128xf32>
    %90 = arith.addf %86, %89 : vector<8x128xf32>
    %c13_53 = arith.constant 13 : index
    %91 = memref.load %arg1[%c13_53] : memref<263xf32, #tpu.memory_space<smem>>
    %92 = vector.broadcast %91 : f32 to vector<8x128xf32>
    %93 = arith.mulf %27, %92 : vector<8x128xf32>
    %94 = arith.addf %90, %93 : vector<8x128xf32>
    %c14_54 = arith.constant 14 : index
    %95 = memref.load %arg1[%c14_54] : memref<263xf32, #tpu.memory_space<smem>>
    %96 = vector.broadcast %95 : f32 to vector<8x128xf32>
    %97 = arith.mulf %29, %96 : vector<8x128xf32>
    %98 = arith.addf %94, %97 : vector<8x128xf32>
    %c15_55 = arith.constant 15 : index
    %99 = memref.load %arg1[%c15_55] : memref<263xf32, #tpu.memory_space<smem>>
    %100 = vector.broadcast %99 : f32 to vector<8x128xf32>
    %101 = arith.mulf %31, %100 : vector<8x128xf32>
    %102 = arith.addf %98, %101 : vector<8x128xf32>
    %c16_56 = arith.constant 16 : index
    %103 = memref.load %arg1[%c16_56] : memref<263xf32, #tpu.memory_space<smem>>
    %104 = vector.broadcast %103 : f32 to vector<8x128xf32>
    %105 = arith.mulf %33, %104 : vector<8x128xf32>
    %106 = arith.addf %102, %105 : vector<8x128xf32>
    %c17_57 = arith.constant 17 : index
    %107 = memref.load %arg1[%c17_57] : memref<263xf32, #tpu.memory_space<smem>>
    %108 = vector.broadcast %107 : f32 to vector<8x128xf32>
    %109 = arith.mulf %35, %108 : vector<8x128xf32>
    %110 = arith.addf %106, %109 : vector<8x128xf32>
    %c18_58 = arith.constant 18 : index
    %111 = memref.load %arg1[%c18_58] : memref<263xf32, #tpu.memory_space<smem>>
    %112 = vector.broadcast %111 : f32 to vector<8x128xf32>
    %113 = arith.mulf %37, %112 : vector<8x128xf32>
    %114 = arith.addf %110, %113 : vector<8x128xf32>
    %c19_59 = arith.constant 19 : index
    %115 = memref.load %arg1[%c19_59] : memref<263xf32, #tpu.memory_space<smem>>
    %116 = vector.broadcast %115 : f32 to vector<8x128xf32>
    %117 = arith.mulf %39, %116 : vector<8x128xf32>
    %118 = arith.addf %114, %117 : vector<8x128xf32>
    %c100 = arith.constant 100 : index
    %119 = memref.load %arg1[%c100] : memref<263xf32, #tpu.memory_space<smem>>
    %120 = vector.broadcast %119 : f32 to vector<8x128xf32>
    %121 = arith.addf %118, %120 : vector<8x128xf32>
    %cst = arith.constant 0.000000e+00 : f32
    %122 = vector.broadcast %cst : f32 to vector<8x128xf32>
    %123 = arith.maximumf %121, %122 : vector<8x128xf32>
    %c20 = arith.constant 20 : index
    %124 = memref.load %arg1[%c20] : memref<263xf32, #tpu.memory_space<smem>>
    %125 = vector.broadcast %124 : f32 to vector<8x128xf32>
    %126 = arith.mulf %1, %125 : vector<8x128xf32>
    %c21 = arith.constant 21 : index
    %127 = memref.load %arg1[%c21] : memref<263xf32, #tpu.memory_space<smem>>
    %128 = vector.broadcast %127 : f32 to vector<8x128xf32>
    %129 = arith.mulf %3, %128 : vector<8x128xf32>
    %130 = arith.addf %126, %129 : vector<8x128xf32>
    %c22 = arith.constant 22 : index
    %131 = memref.load %arg1[%c22] : memref<263xf32, #tpu.memory_space<smem>>
    %132 = vector.broadcast %131 : f32 to vector<8x128xf32>
    %133 = arith.mulf %5, %132 : vector<8x128xf32>
    %134 = arith.addf %130, %133 : vector<8x128xf32>
    %c23 = arith.constant 23 : index
    %135 = memref.load %arg1[%c23] : memref<263xf32, #tpu.memory_space<smem>>
    %136 = vector.broadcast %135 : f32 to vector<8x128xf32>
    %137 = arith.mulf %7, %136 : vector<8x128xf32>
    %138 = arith.addf %134, %137 : vector<8x128xf32>
    %c24 = arith.constant 24 : index
    %139 = memref.load %arg1[%c24] : memref<263xf32, #tpu.memory_space<smem>>
    %140 = vector.broadcast %139 : f32 to vector<8x128xf32>
    %141 = arith.mulf %9, %140 : vector<8x128xf32>
    %142 = arith.addf %138, %141 : vector<8x128xf32>
    %c25 = arith.constant 25 : index
    %143 = memref.load %arg1[%c25] : memref<263xf32, #tpu.memory_space<smem>>
    %144 = vector.broadcast %143 : f32 to vector<8x128xf32>
    %145 = arith.mulf %11, %144 : vector<8x128xf32>
    %146 = arith.addf %142, %145 : vector<8x128xf32>
    %c26 = arith.constant 26 : index
    %147 = memref.load %arg1[%c26] : memref<263xf32, #tpu.memory_space<smem>>
    %148 = vector.broadcast %147 : f32 to vector<8x128xf32>
    %149 = arith.mulf %13, %148 : vector<8x128xf32>
    %150 = arith.addf %146, %149 : vector<8x128xf32>
    %c27 = arith.constant 27 : index
    %151 = memref.load %arg1[%c27] : memref<263xf32, #tpu.memory_space<smem>>
    %152 = vector.broadcast %151 : f32 to vector<8x128xf32>
    %153 = arith.mulf %15, %152 : vector<8x128xf32>
    %154 = arith.addf %150, %153 : vector<8x128xf32>
    %c28 = arith.constant 28 : index
    %155 = memref.load %arg1[%c28] : memref<263xf32, #tpu.memory_space<smem>>
    %156 = vector.broadcast %155 : f32 to vector<8x128xf32>
    %157 = arith.mulf %17, %156 : vector<8x128xf32>
    %158 = arith.addf %154, %157 : vector<8x128xf32>
    %c29 = arith.constant 29 : index
    %159 = memref.load %arg1[%c29] : memref<263xf32, #tpu.memory_space<smem>>
    %160 = vector.broadcast %159 : f32 to vector<8x128xf32>
    %161 = arith.mulf %19, %160 : vector<8x128xf32>
    %162 = arith.addf %158, %161 : vector<8x128xf32>
    %c30 = arith.constant 30 : index
    %163 = memref.load %arg1[%c30] : memref<263xf32, #tpu.memory_space<smem>>
    %164 = vector.broadcast %163 : f32 to vector<8x128xf32>
    %165 = arith.mulf %21, %164 : vector<8x128xf32>
    %166 = arith.addf %162, %165 : vector<8x128xf32>
    %c31 = arith.constant 31 : index
    %167 = memref.load %arg1[%c31] : memref<263xf32, #tpu.memory_space<smem>>
    %168 = vector.broadcast %167 : f32 to vector<8x128xf32>
    %169 = arith.mulf %23, %168 : vector<8x128xf32>
    %170 = arith.addf %166, %169 : vector<8x128xf32>
    %c32 = arith.constant 32 : index
    %171 = memref.load %arg1[%c32] : memref<263xf32, #tpu.memory_space<smem>>
    %172 = vector.broadcast %171 : f32 to vector<8x128xf32>
    %173 = arith.mulf %25, %172 : vector<8x128xf32>
    %174 = arith.addf %170, %173 : vector<8x128xf32>
    %c33 = arith.constant 33 : index
    %175 = memref.load %arg1[%c33] : memref<263xf32, #tpu.memory_space<smem>>
    %176 = vector.broadcast %175 : f32 to vector<8x128xf32>
    %177 = arith.mulf %27, %176 : vector<8x128xf32>
    %178 = arith.addf %174, %177 : vector<8x128xf32>
    %c34 = arith.constant 34 : index
    %179 = memref.load %arg1[%c34] : memref<263xf32, #tpu.memory_space<smem>>
    %180 = vector.broadcast %179 : f32 to vector<8x128xf32>
    %181 = arith.mulf %29, %180 : vector<8x128xf32>
    %182 = arith.addf %178, %181 : vector<8x128xf32>
    %c35 = arith.constant 35 : index
    %183 = memref.load %arg1[%c35] : memref<263xf32, #tpu.memory_space<smem>>
    %184 = vector.broadcast %183 : f32 to vector<8x128xf32>
    %185 = arith.mulf %31, %184 : vector<8x128xf32>
    %186 = arith.addf %182, %185 : vector<8x128xf32>
    %c36 = arith.constant 36 : index
    %187 = memref.load %arg1[%c36] : memref<263xf32, #tpu.memory_space<smem>>
    %188 = vector.broadcast %187 : f32 to vector<8x128xf32>
    %189 = arith.mulf %33, %188 : vector<8x128xf32>
    %190 = arith.addf %186, %189 : vector<8x128xf32>
    %c37 = arith.constant 37 : index
    %191 = memref.load %arg1[%c37] : memref<263xf32, #tpu.memory_space<smem>>
    %192 = vector.broadcast %191 : f32 to vector<8x128xf32>
    %193 = arith.mulf %35, %192 : vector<8x128xf32>
    %194 = arith.addf %190, %193 : vector<8x128xf32>
    %c38 = arith.constant 38 : index
    %195 = memref.load %arg1[%c38] : memref<263xf32, #tpu.memory_space<smem>>
    %196 = vector.broadcast %195 : f32 to vector<8x128xf32>
    %197 = arith.mulf %37, %196 : vector<8x128xf32>
    %198 = arith.addf %194, %197 : vector<8x128xf32>
    %c39 = arith.constant 39 : index
    %199 = memref.load %arg1[%c39] : memref<263xf32, #tpu.memory_space<smem>>
    %200 = vector.broadcast %199 : f32 to vector<8x128xf32>
    %201 = arith.mulf %39, %200 : vector<8x128xf32>
    %202 = arith.addf %198, %201 : vector<8x128xf32>
    %c101 = arith.constant 101 : index
    %203 = memref.load %arg1[%c101] : memref<263xf32, #tpu.memory_space<smem>>
    %204 = vector.broadcast %203 : f32 to vector<8x128xf32>
    %205 = arith.addf %202, %204 : vector<8x128xf32>
    %cst_60 = arith.constant 0.000000e+00 : f32
    %206 = vector.broadcast %cst_60 : f32 to vector<8x128xf32>
    %207 = arith.maximumf %205, %206 : vector<8x128xf32>
    %c40 = arith.constant 40 : index
    %208 = memref.load %arg1[%c40] : memref<263xf32, #tpu.memory_space<smem>>
    %209 = vector.broadcast %208 : f32 to vector<8x128xf32>
    %210 = arith.mulf %1, %209 : vector<8x128xf32>
    %c41 = arith.constant 41 : index
    %211 = memref.load %arg1[%c41] : memref<263xf32, #tpu.memory_space<smem>>
    %212 = vector.broadcast %211 : f32 to vector<8x128xf32>
    %213 = arith.mulf %3, %212 : vector<8x128xf32>
    %214 = arith.addf %210, %213 : vector<8x128xf32>
    %c42 = arith.constant 42 : index
    %215 = memref.load %arg1[%c42] : memref<263xf32, #tpu.memory_space<smem>>
    %216 = vector.broadcast %215 : f32 to vector<8x128xf32>
    %217 = arith.mulf %5, %216 : vector<8x128xf32>
    %218 = arith.addf %214, %217 : vector<8x128xf32>
    %c43 = arith.constant 43 : index
    %219 = memref.load %arg1[%c43] : memref<263xf32, #tpu.memory_space<smem>>
    %220 = vector.broadcast %219 : f32 to vector<8x128xf32>
    %221 = arith.mulf %7, %220 : vector<8x128xf32>
    %222 = arith.addf %218, %221 : vector<8x128xf32>
    %c44 = arith.constant 44 : index
    %223 = memref.load %arg1[%c44] : memref<263xf32, #tpu.memory_space<smem>>
    %224 = vector.broadcast %223 : f32 to vector<8x128xf32>
    %225 = arith.mulf %9, %224 : vector<8x128xf32>
    %226 = arith.addf %222, %225 : vector<8x128xf32>
    %c45 = arith.constant 45 : index
    %227 = memref.load %arg1[%c45] : memref<263xf32, #tpu.memory_space<smem>>
    %228 = vector.broadcast %227 : f32 to vector<8x128xf32>
    %229 = arith.mulf %11, %228 : vector<8x128xf32>
    %230 = arith.addf %226, %229 : vector<8x128xf32>
    %c46 = arith.constant 46 : index
    %231 = memref.load %arg1[%c46] : memref<263xf32, #tpu.memory_space<smem>>
    %232 = vector.broadcast %231 : f32 to vector<8x128xf32>
    %233 = arith.mulf %13, %232 : vector<8x128xf32>
    %234 = arith.addf %230, %233 : vector<8x128xf32>
    %c47 = arith.constant 47 : index
    %235 = memref.load %arg1[%c47] : memref<263xf32, #tpu.memory_space<smem>>
    %236 = vector.broadcast %235 : f32 to vector<8x128xf32>
    %237 = arith.mulf %15, %236 : vector<8x128xf32>
    %238 = arith.addf %234, %237 : vector<8x128xf32>
    %c48 = arith.constant 48 : index
    %239 = memref.load %arg1[%c48] : memref<263xf32, #tpu.memory_space<smem>>
    %240 = vector.broadcast %239 : f32 to vector<8x128xf32>
    %241 = arith.mulf %17, %240 : vector<8x128xf32>
    %242 = arith.addf %238, %241 : vector<8x128xf32>
    %c49 = arith.constant 49 : index
    %243 = memref.load %arg1[%c49] : memref<263xf32, #tpu.memory_space<smem>>
    %244 = vector.broadcast %243 : f32 to vector<8x128xf32>
    %245 = arith.mulf %19, %244 : vector<8x128xf32>
    %246 = arith.addf %242, %245 : vector<8x128xf32>
    %c50 = arith.constant 50 : index
    %247 = memref.load %arg1[%c50] : memref<263xf32, #tpu.memory_space<smem>>
    %248 = vector.broadcast %247 : f32 to vector<8x128xf32>
    %249 = arith.mulf %21, %248 : vector<8x128xf32>
    %250 = arith.addf %246, %249 : vector<8x128xf32>
    %c51 = arith.constant 51 : index
    %251 = memref.load %arg1[%c51] : memref<263xf32, #tpu.memory_space<smem>>
    %252 = vector.broadcast %251 : f32 to vector<8x128xf32>
    %253 = arith.mulf %23, %252 : vector<8x128xf32>
    %254 = arith.addf %250, %253 : vector<8x128xf32>
    %c52 = arith.constant 52 : index
    %255 = memref.load %arg1[%c52] : memref<263xf32, #tpu.memory_space<smem>>
    %256 = vector.broadcast %255 : f32 to vector<8x128xf32>
    %257 = arith.mulf %25, %256 : vector<8x128xf32>
    %258 = arith.addf %254, %257 : vector<8x128xf32>
    %c53 = arith.constant 53 : index
    %259 = memref.load %arg1[%c53] : memref<263xf32, #tpu.memory_space<smem>>
    %260 = vector.broadcast %259 : f32 to vector<8x128xf32>
    %261 = arith.mulf %27, %260 : vector<8x128xf32>
    %262 = arith.addf %258, %261 : vector<8x128xf32>
    %c54 = arith.constant 54 : index
    %263 = memref.load %arg1[%c54] : memref<263xf32, #tpu.memory_space<smem>>
    %264 = vector.broadcast %263 : f32 to vector<8x128xf32>
    %265 = arith.mulf %29, %264 : vector<8x128xf32>
    %266 = arith.addf %262, %265 : vector<8x128xf32>
    %c55 = arith.constant 55 : index
    %267 = memref.load %arg1[%c55] : memref<263xf32, #tpu.memory_space<smem>>
    %268 = vector.broadcast %267 : f32 to vector<8x128xf32>
    %269 = arith.mulf %31, %268 : vector<8x128xf32>
    %270 = arith.addf %266, %269 : vector<8x128xf32>
    %c56 = arith.constant 56 : index
    %271 = memref.load %arg1[%c56] : memref<263xf32, #tpu.memory_space<smem>>
    %272 = vector.broadcast %271 : f32 to vector<8x128xf32>
    %273 = arith.mulf %33, %272 : vector<8x128xf32>
    %274 = arith.addf %270, %273 : vector<8x128xf32>
    %c57 = arith.constant 57 : index
    %275 = memref.load %arg1[%c57] : memref<263xf32, #tpu.memory_space<smem>>
    %276 = vector.broadcast %275 : f32 to vector<8x128xf32>
    %277 = arith.mulf %35, %276 : vector<8x128xf32>
    %278 = arith.addf %274, %277 : vector<8x128xf32>
    %c58 = arith.constant 58 : index
    %279 = memref.load %arg1[%c58] : memref<263xf32, #tpu.memory_space<smem>>
    %280 = vector.broadcast %279 : f32 to vector<8x128xf32>
    %281 = arith.mulf %37, %280 : vector<8x128xf32>
    %282 = arith.addf %278, %281 : vector<8x128xf32>
    %c59 = arith.constant 59 : index
    %283 = memref.load %arg1[%c59] : memref<263xf32, #tpu.memory_space<smem>>
    %284 = vector.broadcast %283 : f32 to vector<8x128xf32>
    %285 = arith.mulf %39, %284 : vector<8x128xf32>
    %286 = arith.addf %282, %285 : vector<8x128xf32>
    %c102 = arith.constant 102 : index
    %287 = memref.load %arg1[%c102] : memref<263xf32, #tpu.memory_space<smem>>
    %288 = vector.broadcast %287 : f32 to vector<8x128xf32>
    %289 = arith.addf %286, %288 : vector<8x128xf32>
    %cst_61 = arith.constant 0.000000e+00 : f32
    %290 = vector.broadcast %cst_61 : f32 to vector<8x128xf32>
    %291 = arith.maximumf %289, %290 : vector<8x128xf32>
    %c60 = arith.constant 60 : index
    %292 = memref.load %arg1[%c60] : memref<263xf32, #tpu.memory_space<smem>>
    %293 = vector.broadcast %292 : f32 to vector<8x128xf32>
    %294 = arith.mulf %1, %293 : vector<8x128xf32>
    %c61 = arith.constant 61 : index
    %295 = memref.load %arg1[%c61] : memref<263xf32, #tpu.memory_space<smem>>
    %296 = vector.broadcast %295 : f32 to vector<8x128xf32>
    %297 = arith.mulf %3, %296 : vector<8x128xf32>
    %298 = arith.addf %294, %297 : vector<8x128xf32>
    %c62 = arith.constant 62 : index
    %299 = memref.load %arg1[%c62] : memref<263xf32, #tpu.memory_space<smem>>
    %300 = vector.broadcast %299 : f32 to vector<8x128xf32>
    %301 = arith.mulf %5, %300 : vector<8x128xf32>
    %302 = arith.addf %298, %301 : vector<8x128xf32>
    %c63 = arith.constant 63 : index
    %303 = memref.load %arg1[%c63] : memref<263xf32, #tpu.memory_space<smem>>
    %304 = vector.broadcast %303 : f32 to vector<8x128xf32>
    %305 = arith.mulf %7, %304 : vector<8x128xf32>
    %306 = arith.addf %302, %305 : vector<8x128xf32>
    %c64 = arith.constant 64 : index
    %307 = memref.load %arg1[%c64] : memref<263xf32, #tpu.memory_space<smem>>
    %308 = vector.broadcast %307 : f32 to vector<8x128xf32>
    %309 = arith.mulf %9, %308 : vector<8x128xf32>
    %310 = arith.addf %306, %309 : vector<8x128xf32>
    %c65 = arith.constant 65 : index
    %311 = memref.load %arg1[%c65] : memref<263xf32, #tpu.memory_space<smem>>
    %312 = vector.broadcast %311 : f32 to vector<8x128xf32>
    %313 = arith.mulf %11, %312 : vector<8x128xf32>
    %314 = arith.addf %310, %313 : vector<8x128xf32>
    %c66 = arith.constant 66 : index
    %315 = memref.load %arg1[%c66] : memref<263xf32, #tpu.memory_space<smem>>
    %316 = vector.broadcast %315 : f32 to vector<8x128xf32>
    %317 = arith.mulf %13, %316 : vector<8x128xf32>
    %318 = arith.addf %314, %317 : vector<8x128xf32>
    %c67 = arith.constant 67 : index
    %319 = memref.load %arg1[%c67] : memref<263xf32, #tpu.memory_space<smem>>
    %320 = vector.broadcast %319 : f32 to vector<8x128xf32>
    %321 = arith.mulf %15, %320 : vector<8x128xf32>
    %322 = arith.addf %318, %321 : vector<8x128xf32>
    %c68 = arith.constant 68 : index
    %323 = memref.load %arg1[%c68] : memref<263xf32, #tpu.memory_space<smem>>
    %324 = vector.broadcast %323 : f32 to vector<8x128xf32>
    %325 = arith.mulf %17, %324 : vector<8x128xf32>
    %326 = arith.addf %322, %325 : vector<8x128xf32>
    %c69 = arith.constant 69 : index
    %327 = memref.load %arg1[%c69] : memref<263xf32, #tpu.memory_space<smem>>
    %328 = vector.broadcast %327 : f32 to vector<8x128xf32>
    %329 = arith.mulf %19, %328 : vector<8x128xf32>
    %330 = arith.addf %326, %329 : vector<8x128xf32>
    %c70 = arith.constant 70 : index
    %331 = memref.load %arg1[%c70] : memref<263xf32, #tpu.memory_space<smem>>
    %332 = vector.broadcast %331 : f32 to vector<8x128xf32>
    %333 = arith.mulf %21, %332 : vector<8x128xf32>
    %334 = arith.addf %330, %333 : vector<8x128xf32>
    %c71 = arith.constant 71 : index
    %335 = memref.load %arg1[%c71] : memref<263xf32, #tpu.memory_space<smem>>
    %336 = vector.broadcast %335 : f32 to vector<8x128xf32>
    %337 = arith.mulf %23, %336 : vector<8x128xf32>
    %338 = arith.addf %334, %337 : vector<8x128xf32>
    %c72 = arith.constant 72 : index
    %339 = memref.load %arg1[%c72] : memref<263xf32, #tpu.memory_space<smem>>
    %340 = vector.broadcast %339 : f32 to vector<8x128xf32>
    %341 = arith.mulf %25, %340 : vector<8x128xf32>
    %342 = arith.addf %338, %341 : vector<8x128xf32>
    %c73 = arith.constant 73 : index
    %343 = memref.load %arg1[%c73] : memref<263xf32, #tpu.memory_space<smem>>
    %344 = vector.broadcast %343 : f32 to vector<8x128xf32>
    %345 = arith.mulf %27, %344 : vector<8x128xf32>
    %346 = arith.addf %342, %345 : vector<8x128xf32>
    %c74 = arith.constant 74 : index
    %347 = memref.load %arg1[%c74] : memref<263xf32, #tpu.memory_space<smem>>
    %348 = vector.broadcast %347 : f32 to vector<8x128xf32>
    %349 = arith.mulf %29, %348 : vector<8x128xf32>
    %350 = arith.addf %346, %349 : vector<8x128xf32>
    %c75 = arith.constant 75 : index
    %351 = memref.load %arg1[%c75] : memref<263xf32, #tpu.memory_space<smem>>
    %352 = vector.broadcast %351 : f32 to vector<8x128xf32>
    %353 = arith.mulf %31, %352 : vector<8x128xf32>
    %354 = arith.addf %350, %353 : vector<8x128xf32>
    %c76 = arith.constant 76 : index
    %355 = memref.load %arg1[%c76] : memref<263xf32, #tpu.memory_space<smem>>
    %356 = vector.broadcast %355 : f32 to vector<8x128xf32>
    %357 = arith.mulf %33, %356 : vector<8x128xf32>
    %358 = arith.addf %354, %357 : vector<8x128xf32>
    %c77 = arith.constant 77 : index
    %359 = memref.load %arg1[%c77] : memref<263xf32, #tpu.memory_space<smem>>
    %360 = vector.broadcast %359 : f32 to vector<8x128xf32>
    %361 = arith.mulf %35, %360 : vector<8x128xf32>
    %362 = arith.addf %358, %361 : vector<8x128xf32>
    %c78 = arith.constant 78 : index
    %363 = memref.load %arg1[%c78] : memref<263xf32, #tpu.memory_space<smem>>
    %364 = vector.broadcast %363 : f32 to vector<8x128xf32>
    %365 = arith.mulf %37, %364 : vector<8x128xf32>
    %366 = arith.addf %362, %365 : vector<8x128xf32>
    %c79 = arith.constant 79 : index
    %367 = memref.load %arg1[%c79] : memref<263xf32, #tpu.memory_space<smem>>
    %368 = vector.broadcast %367 : f32 to vector<8x128xf32>
    %369 = arith.mulf %39, %368 : vector<8x128xf32>
    %370 = arith.addf %366, %369 : vector<8x128xf32>
    %c103 = arith.constant 103 : index
    %371 = memref.load %arg1[%c103] : memref<263xf32, #tpu.memory_space<smem>>
    %372 = vector.broadcast %371 : f32 to vector<8x128xf32>
    %373 = arith.addf %370, %372 : vector<8x128xf32>
    %cst_62 = arith.constant 0.000000e+00 : f32
    %374 = vector.broadcast %cst_62 : f32 to vector<8x128xf32>
    %375 = arith.maximumf %373, %374 : vector<8x128xf32>
    %c80 = arith.constant 80 : index
    %376 = memref.load %arg1[%c80] : memref<263xf32, #tpu.memory_space<smem>>
    %377 = vector.broadcast %376 : f32 to vector<8x128xf32>
    %378 = arith.mulf %1, %377 : vector<8x128xf32>
    %c81 = arith.constant 81 : index
    %379 = memref.load %arg1[%c81] : memref<263xf32, #tpu.memory_space<smem>>
    %380 = vector.broadcast %379 : f32 to vector<8x128xf32>
    %381 = arith.mulf %3, %380 : vector<8x128xf32>
    %382 = arith.addf %378, %381 : vector<8x128xf32>
    %c82 = arith.constant 82 : index
    %383 = memref.load %arg1[%c82] : memref<263xf32, #tpu.memory_space<smem>>
    %384 = vector.broadcast %383 : f32 to vector<8x128xf32>
    %385 = arith.mulf %5, %384 : vector<8x128xf32>
    %386 = arith.addf %382, %385 : vector<8x128xf32>
    %c83 = arith.constant 83 : index
    %387 = memref.load %arg1[%c83] : memref<263xf32, #tpu.memory_space<smem>>
    %388 = vector.broadcast %387 : f32 to vector<8x128xf32>
    %389 = arith.mulf %7, %388 : vector<8x128xf32>
    %390 = arith.addf %386, %389 : vector<8x128xf32>
    %c84 = arith.constant 84 : index
    %391 = memref.load %arg1[%c84] : memref<263xf32, #tpu.memory_space<smem>>
    %392 = vector.broadcast %391 : f32 to vector<8x128xf32>
    %393 = arith.mulf %9, %392 : vector<8x128xf32>
    %394 = arith.addf %390, %393 : vector<8x128xf32>
    %c85 = arith.constant 85 : index
    %395 = memref.load %arg1[%c85] : memref<263xf32, #tpu.memory_space<smem>>
    %396 = vector.broadcast %395 : f32 to vector<8x128xf32>
    %397 = arith.mulf %11, %396 : vector<8x128xf32>
    %398 = arith.addf %394, %397 : vector<8x128xf32>
    %c86 = arith.constant 86 : index
    %399 = memref.load %arg1[%c86] : memref<263xf32, #tpu.memory_space<smem>>
    %400 = vector.broadcast %399 : f32 to vector<8x128xf32>
    %401 = arith.mulf %13, %400 : vector<8x128xf32>
    %402 = arith.addf %398, %401 : vector<8x128xf32>
    %c87 = arith.constant 87 : index
    %403 = memref.load %arg1[%c87] : memref<263xf32, #tpu.memory_space<smem>>
    %404 = vector.broadcast %403 : f32 to vector<8x128xf32>
    %405 = arith.mulf %15, %404 : vector<8x128xf32>
    %406 = arith.addf %402, %405 : vector<8x128xf32>
    %c88 = arith.constant 88 : index
    %407 = memref.load %arg1[%c88] : memref<263xf32, #tpu.memory_space<smem>>
    %408 = vector.broadcast %407 : f32 to vector<8x128xf32>
    %409 = arith.mulf %17, %408 : vector<8x128xf32>
    %410 = arith.addf %406, %409 : vector<8x128xf32>
    %c89 = arith.constant 89 : index
    %411 = memref.load %arg1[%c89] : memref<263xf32, #tpu.memory_space<smem>>
    %412 = vector.broadcast %411 : f32 to vector<8x128xf32>
    %413 = arith.mulf %19, %412 : vector<8x128xf32>
    %414 = arith.addf %410, %413 : vector<8x128xf32>
    %c90 = arith.constant 90 : index
    %415 = memref.load %arg1[%c90] : memref<263xf32, #tpu.memory_space<smem>>
    %416 = vector.broadcast %415 : f32 to vector<8x128xf32>
    %417 = arith.mulf %21, %416 : vector<8x128xf32>
    %418 = arith.addf %414, %417 : vector<8x128xf32>
    %c91 = arith.constant 91 : index
    %419 = memref.load %arg1[%c91] : memref<263xf32, #tpu.memory_space<smem>>
    %420 = vector.broadcast %419 : f32 to vector<8x128xf32>
    %421 = arith.mulf %23, %420 : vector<8x128xf32>
    %422 = arith.addf %418, %421 : vector<8x128xf32>
    %c92 = arith.constant 92 : index
    %423 = memref.load %arg1[%c92] : memref<263xf32, #tpu.memory_space<smem>>
    %424 = vector.broadcast %423 : f32 to vector<8x128xf32>
    %425 = arith.mulf %25, %424 : vector<8x128xf32>
    %426 = arith.addf %422, %425 : vector<8x128xf32>
    %c93 = arith.constant 93 : index
    %427 = memref.load %arg1[%c93] : memref<263xf32, #tpu.memory_space<smem>>
    %428 = vector.broadcast %427 : f32 to vector<8x128xf32>
    %429 = arith.mulf %27, %428 : vector<8x128xf32>
    %430 = arith.addf %426, %429 : vector<8x128xf32>
    %c94 = arith.constant 94 : index
    %431 = memref.load %arg1[%c94] : memref<263xf32, #tpu.memory_space<smem>>
    %432 = vector.broadcast %431 : f32 to vector<8x128xf32>
    %433 = arith.mulf %29, %432 : vector<8x128xf32>
    %434 = arith.addf %430, %433 : vector<8x128xf32>
    %c95 = arith.constant 95 : index
    %435 = memref.load %arg1[%c95] : memref<263xf32, #tpu.memory_space<smem>>
    %436 = vector.broadcast %435 : f32 to vector<8x128xf32>
    %437 = arith.mulf %31, %436 : vector<8x128xf32>
    %438 = arith.addf %434, %437 : vector<8x128xf32>
    %c96 = arith.constant 96 : index
    %439 = memref.load %arg1[%c96] : memref<263xf32, #tpu.memory_space<smem>>
    %440 = vector.broadcast %439 : f32 to vector<8x128xf32>
    %441 = arith.mulf %33, %440 : vector<8x128xf32>
    %442 = arith.addf %438, %441 : vector<8x128xf32>
    %c97 = arith.constant 97 : index
    %443 = memref.load %arg1[%c97] : memref<263xf32, #tpu.memory_space<smem>>
    %444 = vector.broadcast %443 : f32 to vector<8x128xf32>
    %445 = arith.mulf %35, %444 : vector<8x128xf32>
    %446 = arith.addf %442, %445 : vector<8x128xf32>
    %c98 = arith.constant 98 : index
    %447 = memref.load %arg1[%c98] : memref<263xf32, #tpu.memory_space<smem>>
    %448 = vector.broadcast %447 : f32 to vector<8x128xf32>
    %449 = arith.mulf %37, %448 : vector<8x128xf32>
    %450 = arith.addf %446, %449 : vector<8x128xf32>
    %c99 = arith.constant 99 : index
    %451 = memref.load %arg1[%c99] : memref<263xf32, #tpu.memory_space<smem>>
    %452 = vector.broadcast %451 : f32 to vector<8x128xf32>
    %453 = arith.mulf %39, %452 : vector<8x128xf32>
    %454 = arith.addf %450, %453 : vector<8x128xf32>
    %c104 = arith.constant 104 : index
    %455 = memref.load %arg1[%c104] : memref<263xf32, #tpu.memory_space<smem>>
    %456 = vector.broadcast %455 : f32 to vector<8x128xf32>
    %457 = arith.addf %454, %456 : vector<8x128xf32>
    %cst_63 = arith.constant 0.000000e+00 : f32
    %458 = vector.broadcast %cst_63 : f32 to vector<8x128xf32>
    %459 = arith.maximumf %457, %458 : vector<8x128xf32>
    %c105 = arith.constant 105 : index
    %460 = memref.load %arg1[%c105] : memref<263xf32, #tpu.memory_space<smem>>
    %461 = vector.broadcast %460 : f32 to vector<8x128xf32>
    %462 = arith.mulf %123, %461 : vector<8x128xf32>
    %c106 = arith.constant 106 : index
    %463 = memref.load %arg1[%c106] : memref<263xf32, #tpu.memory_space<smem>>
    %464 = vector.broadcast %463 : f32 to vector<8x128xf32>
    %465 = arith.mulf %207, %464 : vector<8x128xf32>
    %466 = arith.addf %462, %465 : vector<8x128xf32>
    %c107 = arith.constant 107 : index
    %467 = memref.load %arg1[%c107] : memref<263xf32, #tpu.memory_space<smem>>
    %468 = vector.broadcast %467 : f32 to vector<8x128xf32>
    %469 = arith.mulf %291, %468 : vector<8x128xf32>
    %470 = arith.addf %466, %469 : vector<8x128xf32>
    %c108 = arith.constant 108 : index
    %471 = memref.load %arg1[%c108] : memref<263xf32, #tpu.memory_space<smem>>
    %472 = vector.broadcast %471 : f32 to vector<8x128xf32>
    %473 = arith.mulf %375, %472 : vector<8x128xf32>
    %474 = arith.addf %470, %473 : vector<8x128xf32>
    %c109 = arith.constant 109 : index
    %475 = memref.load %arg1[%c109] : memref<263xf32, #tpu.memory_space<smem>>
    %476 = vector.broadcast %475 : f32 to vector<8x128xf32>
    %477 = arith.mulf %459, %476 : vector<8x128xf32>
    %478 = arith.addf %474, %477 : vector<8x128xf32>
    %c120 = arith.constant 120 : index
    %479 = memref.load %arg1[%c120] : memref<263xf32, #tpu.memory_space<smem>>
    %480 = vector.broadcast %479 : f32 to vector<8x128xf32>
    %481 = arith.addf %478, %480 : vector<8x128xf32>
    %c110 = arith.constant 110 : index
    %482 = memref.load %arg1[%c110] : memref<263xf32, #tpu.memory_space<smem>>
    %483 = vector.broadcast %482 : f32 to vector<8x128xf32>
    %484 = arith.mulf %123, %483 : vector<8x128xf32>
    %c111 = arith.constant 111 : index
    %485 = memref.load %arg1[%c111] : memref<263xf32, #tpu.memory_space<smem>>
    %486 = vector.broadcast %485 : f32 to vector<8x128xf32>
    %487 = arith.mulf %207, %486 : vector<8x128xf32>
    %488 = arith.addf %484, %487 : vector<8x128xf32>
    %c112 = arith.constant 112 : index
    %489 = memref.load %arg1[%c112] : memref<263xf32, #tpu.memory_space<smem>>
    %490 = vector.broadcast %489 : f32 to vector<8x128xf32>
    %491 = arith.mulf %291, %490 : vector<8x128xf32>
    %492 = arith.addf %488, %491 : vector<8x128xf32>
    %c113 = arith.constant 113 : index
    %493 = memref.load %arg1[%c113] : memref<263xf32, #tpu.memory_space<smem>>
    %494 = vector.broadcast %493 : f32 to vector<8x128xf32>
    %495 = arith.mulf %375, %494 : vector<8x128xf32>
    %496 = arith.addf %492, %495 : vector<8x128xf32>
    %c114 = arith.constant 114 : index
    %497 = memref.load %arg1[%c114] : memref<263xf32, #tpu.memory_space<smem>>
    %498 = vector.broadcast %497 : f32 to vector<8x128xf32>
    %499 = arith.mulf %459, %498 : vector<8x128xf32>
    %500 = arith.addf %496, %499 : vector<8x128xf32>
    %c121 = arith.constant 121 : index
    %501 = memref.load %arg1[%c121] : memref<263xf32, #tpu.memory_space<smem>>
    %502 = vector.broadcast %501 : f32 to vector<8x128xf32>
    %503 = arith.addf %500, %502 : vector<8x128xf32>
    %c115 = arith.constant 115 : index
    %504 = memref.load %arg1[%c115] : memref<263xf32, #tpu.memory_space<smem>>
    %505 = vector.broadcast %504 : f32 to vector<8x128xf32>
    %506 = arith.mulf %123, %505 : vector<8x128xf32>
    %c116 = arith.constant 116 : index
    %507 = memref.load %arg1[%c116] : memref<263xf32, #tpu.memory_space<smem>>
    %508 = vector.broadcast %507 : f32 to vector<8x128xf32>
    %509 = arith.mulf %207, %508 : vector<8x128xf32>
    %510 = arith.addf %506, %509 : vector<8x128xf32>
    %c117 = arith.constant 117 : index
    %511 = memref.load %arg1[%c117] : memref<263xf32, #tpu.memory_space<smem>>
    %512 = vector.broadcast %511 : f32 to vector<8x128xf32>
    %513 = arith.mulf %291, %512 : vector<8x128xf32>
    %514 = arith.addf %510, %513 : vector<8x128xf32>
    %c118 = arith.constant 118 : index
    %515 = memref.load %arg1[%c118] : memref<263xf32, #tpu.memory_space<smem>>
    %516 = vector.broadcast %515 : f32 to vector<8x128xf32>
    %517 = arith.mulf %375, %516 : vector<8x128xf32>
    %518 = arith.addf %514, %517 : vector<8x128xf32>
    %c119 = arith.constant 119 : index
    %519 = memref.load %arg1[%c119] : memref<263xf32, #tpu.memory_space<smem>>
    %520 = vector.broadcast %519 : f32 to vector<8x128xf32>
    %521 = arith.mulf %459, %520 : vector<8x128xf32>
    %522 = arith.addf %518, %521 : vector<8x128xf32>
    %c122 = arith.constant 122 : index
    %523 = memref.load %arg1[%c122] : memref<263xf32, #tpu.memory_space<smem>>
    %524 = vector.broadcast %523 : f32 to vector<8x128xf32>
    %525 = arith.addf %522, %524 : vector<8x128xf32>
    %c123 = arith.constant 123 : index
    %526 = memref.load %arg1[%c123] : memref<263xf32, #tpu.memory_space<smem>>
    %527 = vector.broadcast %526 : f32 to vector<8x128xf32>
    %528 = arith.mulf %481, %527 : vector<8x128xf32>
    %c124 = arith.constant 124 : index
    %529 = memref.load %arg1[%c124] : memref<263xf32, #tpu.memory_space<smem>>
    %530 = vector.broadcast %529 : f32 to vector<8x128xf32>
    %531 = arith.mulf %503, %530 : vector<8x128xf32>
    %532 = arith.addf %528, %531 : vector<8x128xf32>
    %c125 = arith.constant 125 : index
    %533 = memref.load %arg1[%c125] : memref<263xf32, #tpu.memory_space<smem>>
    %534 = vector.broadcast %533 : f32 to vector<8x128xf32>
    %535 = arith.mulf %525, %534 : vector<8x128xf32>
    %536 = arith.addf %532, %535 : vector<8x128xf32>
    %c138 = arith.constant 138 : index
    %537 = memref.load %arg1[%c138] : memref<263xf32, #tpu.memory_space<smem>>
    %538 = vector.broadcast %537 : f32 to vector<8x128xf32>
    %539 = arith.addf %536, %538 : vector<8x128xf32>
    %cst_64 = arith.constant 0.000000e+00 : f32
    %540 = vector.broadcast %cst_64 : f32 to vector<8x128xf32>
    %541 = arith.maximumf %539, %540 : vector<8x128xf32>
    %c126 = arith.constant 126 : index
    %542 = memref.load %arg1[%c126] : memref<263xf32, #tpu.memory_space<smem>>
    %543 = vector.broadcast %542 : f32 to vector<8x128xf32>
    %544 = arith.mulf %481, %543 : vector<8x128xf32>
    %c127 = arith.constant 127 : index
    %545 = memref.load %arg1[%c127] : memref<263xf32, #tpu.memory_space<smem>>
    %546 = vector.broadcast %545 : f32 to vector<8x128xf32>
    %547 = arith.mulf %503, %546 : vector<8x128xf32>
    %548 = arith.addf %544, %547 : vector<8x128xf32>
    %c128 = arith.constant 128 : index
    %549 = memref.load %arg1[%c128] : memref<263xf32, #tpu.memory_space<smem>>
    %550 = vector.broadcast %549 : f32 to vector<8x128xf32>
    %551 = arith.mulf %525, %550 : vector<8x128xf32>
    %552 = arith.addf %548, %551 : vector<8x128xf32>
    %c139 = arith.constant 139 : index
    %553 = memref.load %arg1[%c139] : memref<263xf32, #tpu.memory_space<smem>>
    %554 = vector.broadcast %553 : f32 to vector<8x128xf32>
    %555 = arith.addf %552, %554 : vector<8x128xf32>
    %cst_65 = arith.constant 0.000000e+00 : f32
    %556 = vector.broadcast %cst_65 : f32 to vector<8x128xf32>
    %557 = arith.maximumf %555, %556 : vector<8x128xf32>
    %c129 = arith.constant 129 : index
    %558 = memref.load %arg1[%c129] : memref<263xf32, #tpu.memory_space<smem>>
    %559 = vector.broadcast %558 : f32 to vector<8x128xf32>
    %560 = arith.mulf %481, %559 : vector<8x128xf32>
    %c130 = arith.constant 130 : index
    %561 = memref.load %arg1[%c130] : memref<263xf32, #tpu.memory_space<smem>>
    %562 = vector.broadcast %561 : f32 to vector<8x128xf32>
    %563 = arith.mulf %503, %562 : vector<8x128xf32>
    %564 = arith.addf %560, %563 : vector<8x128xf32>
    %c131 = arith.constant 131 : index
    %565 = memref.load %arg1[%c131] : memref<263xf32, #tpu.memory_space<smem>>
    %566 = vector.broadcast %565 : f32 to vector<8x128xf32>
    %567 = arith.mulf %525, %566 : vector<8x128xf32>
    %568 = arith.addf %564, %567 : vector<8x128xf32>
    %c140 = arith.constant 140 : index
    %569 = memref.load %arg1[%c140] : memref<263xf32, #tpu.memory_space<smem>>
    %570 = vector.broadcast %569 : f32 to vector<8x128xf32>
    %571 = arith.addf %568, %570 : vector<8x128xf32>
    %cst_66 = arith.constant 0.000000e+00 : f32
    %572 = vector.broadcast %cst_66 : f32 to vector<8x128xf32>
    %573 = arith.maximumf %571, %572 : vector<8x128xf32>
    %c132 = arith.constant 132 : index
    %574 = memref.load %arg1[%c132] : memref<263xf32, #tpu.memory_space<smem>>
    %575 = vector.broadcast %574 : f32 to vector<8x128xf32>
    %576 = arith.mulf %481, %575 : vector<8x128xf32>
    %c133 = arith.constant 133 : index
    %577 = memref.load %arg1[%c133] : memref<263xf32, #tpu.memory_space<smem>>
    %578 = vector.broadcast %577 : f32 to vector<8x128xf32>
    %579 = arith.mulf %503, %578 : vector<8x128xf32>
    %580 = arith.addf %576, %579 : vector<8x128xf32>
    %c134 = arith.constant 134 : index
    %581 = memref.load %arg1[%c134] : memref<263xf32, #tpu.memory_space<smem>>
    %582 = vector.broadcast %581 : f32 to vector<8x128xf32>
    %583 = arith.mulf %525, %582 : vector<8x128xf32>
    %584 = arith.addf %580, %583 : vector<8x128xf32>
    %c141 = arith.constant 141 : index
    %585 = memref.load %arg1[%c141] : memref<263xf32, #tpu.memory_space<smem>>
    %586 = vector.broadcast %585 : f32 to vector<8x128xf32>
    %587 = arith.addf %584, %586 : vector<8x128xf32>
    %cst_67 = arith.constant 0.000000e+00 : f32
    %588 = vector.broadcast %cst_67 : f32 to vector<8x128xf32>
    %589 = arith.maximumf %587, %588 : vector<8x128xf32>
    %c135 = arith.constant 135 : index
    %590 = memref.load %arg1[%c135] : memref<263xf32, #tpu.memory_space<smem>>
    %591 = vector.broadcast %590 : f32 to vector<8x128xf32>
    %592 = arith.mulf %481, %591 : vector<8x128xf32>
    %c136 = arith.constant 136 : index
    %593 = memref.load %arg1[%c136] : memref<263xf32, #tpu.memory_space<smem>>
    %594 = vector.broadcast %593 : f32 to vector<8x128xf32>
    %595 = arith.mulf %503, %594 : vector<8x128xf32>
    %596 = arith.addf %592, %595 : vector<8x128xf32>
    %c137 = arith.constant 137 : index
    %597 = memref.load %arg1[%c137] : memref<263xf32, #tpu.memory_space<smem>>
    %598 = vector.broadcast %597 : f32 to vector<8x128xf32>
    %599 = arith.mulf %525, %598 : vector<8x128xf32>
    %600 = arith.addf %596, %599 : vector<8x128xf32>
    %c142 = arith.constant 142 : index
    %601 = memref.load %arg1[%c142] : memref<263xf32, #tpu.memory_space<smem>>
    %602 = vector.broadcast %601 : f32 to vector<8x128xf32>
    %603 = arith.addf %600, %602 : vector<8x128xf32>
    %cst_68 = arith.constant 0.000000e+00 : f32
    %604 = vector.broadcast %cst_68 : f32 to vector<8x128xf32>
    %605 = arith.maximumf %603, %604 : vector<8x128xf32>
    %c143 = arith.constant 143 : index
    %606 = memref.load %arg1[%c143] : memref<263xf32, #tpu.memory_space<smem>>
    %607 = vector.broadcast %606 : f32 to vector<8x128xf32>
    %608 = arith.mulf %541, %607 : vector<8x128xf32>
    %c144 = arith.constant 144 : index
    %609 = memref.load %arg1[%c144] : memref<263xf32, #tpu.memory_space<smem>>
    %610 = vector.broadcast %609 : f32 to vector<8x128xf32>
    %611 = arith.mulf %557, %610 : vector<8x128xf32>
    %612 = arith.addf %608, %611 : vector<8x128xf32>
    %c145 = arith.constant 145 : index
    %613 = memref.load %arg1[%c145] : memref<263xf32, #tpu.memory_space<smem>>
    %614 = vector.broadcast %613 : f32 to vector<8x128xf32>
    %615 = arith.mulf %573, %614 : vector<8x128xf32>
    %616 = arith.addf %612, %615 : vector<8x128xf32>
    %c146 = arith.constant 146 : index
    %617 = memref.load %arg1[%c146] : memref<263xf32, #tpu.memory_space<smem>>
    %618 = vector.broadcast %617 : f32 to vector<8x128xf32>
    %619 = arith.mulf %589, %618 : vector<8x128xf32>
    %620 = arith.addf %616, %619 : vector<8x128xf32>
    %c147 = arith.constant 147 : index
    %621 = memref.load %arg1[%c147] : memref<263xf32, #tpu.memory_space<smem>>
    %622 = vector.broadcast %621 : f32 to vector<8x128xf32>
    %623 = arith.mulf %605, %622 : vector<8x128xf32>
    %624 = arith.addf %620, %623 : vector<8x128xf32>
    %c243 = arith.constant 243 : index
    %625 = memref.load %arg1[%c243] : memref<263xf32, #tpu.memory_space<smem>>
    %626 = vector.broadcast %625 : f32 to vector<8x128xf32>
    %627 = arith.addf %624, %626 : vector<8x128xf32>
    %c148 = arith.constant 148 : index
    %628 = memref.load %arg1[%c148] : memref<263xf32, #tpu.memory_space<smem>>
    %629 = vector.broadcast %628 : f32 to vector<8x128xf32>
    %630 = arith.mulf %541, %629 : vector<8x128xf32>
    %c149 = arith.constant 149 : index
    %631 = memref.load %arg1[%c149] : memref<263xf32, #tpu.memory_space<smem>>
    %632 = vector.broadcast %631 : f32 to vector<8x128xf32>
    %633 = arith.mulf %557, %632 : vector<8x128xf32>
    %634 = arith.addf %630, %633 : vector<8x128xf32>
    %c150 = arith.constant 150 : index
    %635 = memref.load %arg1[%c150] : memref<263xf32, #tpu.memory_space<smem>>
    %636 = vector.broadcast %635 : f32 to vector<8x128xf32>
    %637 = arith.mulf %573, %636 : vector<8x128xf32>
    %638 = arith.addf %634, %637 : vector<8x128xf32>
    %c151 = arith.constant 151 : index
    %639 = memref.load %arg1[%c151] : memref<263xf32, #tpu.memory_space<smem>>
    %640 = vector.broadcast %639 : f32 to vector<8x128xf32>
    %641 = arith.mulf %589, %640 : vector<8x128xf32>
    %642 = arith.addf %638, %641 : vector<8x128xf32>
    %c152 = arith.constant 152 : index
    %643 = memref.load %arg1[%c152] : memref<263xf32, #tpu.memory_space<smem>>
    %644 = vector.broadcast %643 : f32 to vector<8x128xf32>
    %645 = arith.mulf %605, %644 : vector<8x128xf32>
    %646 = arith.addf %642, %645 : vector<8x128xf32>
    %c244 = arith.constant 244 : index
    %647 = memref.load %arg1[%c244] : memref<263xf32, #tpu.memory_space<smem>>
    %648 = vector.broadcast %647 : f32 to vector<8x128xf32>
    %649 = arith.addf %646, %648 : vector<8x128xf32>
    %c153 = arith.constant 153 : index
    %650 = memref.load %arg1[%c153] : memref<263xf32, #tpu.memory_space<smem>>
    %651 = vector.broadcast %650 : f32 to vector<8x128xf32>
    %652 = arith.mulf %541, %651 : vector<8x128xf32>
    %c154 = arith.constant 154 : index
    %653 = memref.load %arg1[%c154] : memref<263xf32, #tpu.memory_space<smem>>
    %654 = vector.broadcast %653 : f32 to vector<8x128xf32>
    %655 = arith.mulf %557, %654 : vector<8x128xf32>
    %656 = arith.addf %652, %655 : vector<8x128xf32>
    %c155 = arith.constant 155 : index
    %657 = memref.load %arg1[%c155] : memref<263xf32, #tpu.memory_space<smem>>
    %658 = vector.broadcast %657 : f32 to vector<8x128xf32>
    %659 = arith.mulf %573, %658 : vector<8x128xf32>
    %660 = arith.addf %656, %659 : vector<8x128xf32>
    %c156 = arith.constant 156 : index
    %661 = memref.load %arg1[%c156] : memref<263xf32, #tpu.memory_space<smem>>
    %662 = vector.broadcast %661 : f32 to vector<8x128xf32>
    %663 = arith.mulf %589, %662 : vector<8x128xf32>
    %664 = arith.addf %660, %663 : vector<8x128xf32>
    %c157 = arith.constant 157 : index
    %665 = memref.load %arg1[%c157] : memref<263xf32, #tpu.memory_space<smem>>
    %666 = vector.broadcast %665 : f32 to vector<8x128xf32>
    %667 = arith.mulf %605, %666 : vector<8x128xf32>
    %668 = arith.addf %664, %667 : vector<8x128xf32>
    %c245 = arith.constant 245 : index
    %669 = memref.load %arg1[%c245] : memref<263xf32, #tpu.memory_space<smem>>
    %670 = vector.broadcast %669 : f32 to vector<8x128xf32>
    %671 = arith.addf %668, %670 : vector<8x128xf32>
    %c158 = arith.constant 158 : index
    %672 = memref.load %arg1[%c158] : memref<263xf32, #tpu.memory_space<smem>>
    %673 = vector.broadcast %672 : f32 to vector<8x128xf32>
    %674 = arith.mulf %541, %673 : vector<8x128xf32>
    %c159 = arith.constant 159 : index
    %675 = memref.load %arg1[%c159] : memref<263xf32, #tpu.memory_space<smem>>
    %676 = vector.broadcast %675 : f32 to vector<8x128xf32>
    %677 = arith.mulf %557, %676 : vector<8x128xf32>
    %678 = arith.addf %674, %677 : vector<8x128xf32>
    %c160 = arith.constant 160 : index
    %679 = memref.load %arg1[%c160] : memref<263xf32, #tpu.memory_space<smem>>
    %680 = vector.broadcast %679 : f32 to vector<8x128xf32>
    %681 = arith.mulf %573, %680 : vector<8x128xf32>
    %682 = arith.addf %678, %681 : vector<8x128xf32>
    %c161 = arith.constant 161 : index
    %683 = memref.load %arg1[%c161] : memref<263xf32, #tpu.memory_space<smem>>
    %684 = vector.broadcast %683 : f32 to vector<8x128xf32>
    %685 = arith.mulf %589, %684 : vector<8x128xf32>
    %686 = arith.addf %682, %685 : vector<8x128xf32>
    %c162 = arith.constant 162 : index
    %687 = memref.load %arg1[%c162] : memref<263xf32, #tpu.memory_space<smem>>
    %688 = vector.broadcast %687 : f32 to vector<8x128xf32>
    %689 = arith.mulf %605, %688 : vector<8x128xf32>
    %690 = arith.addf %686, %689 : vector<8x128xf32>
    %c246 = arith.constant 246 : index
    %691 = memref.load %arg1[%c246] : memref<263xf32, #tpu.memory_space<smem>>
    %692 = vector.broadcast %691 : f32 to vector<8x128xf32>
    %693 = arith.addf %690, %692 : vector<8x128xf32>
    %c163 = arith.constant 163 : index
    %694 = memref.load %arg1[%c163] : memref<263xf32, #tpu.memory_space<smem>>
    %695 = vector.broadcast %694 : f32 to vector<8x128xf32>
    %696 = arith.mulf %541, %695 : vector<8x128xf32>
    %c164 = arith.constant 164 : index
    %697 = memref.load %arg1[%c164] : memref<263xf32, #tpu.memory_space<smem>>
    %698 = vector.broadcast %697 : f32 to vector<8x128xf32>
    %699 = arith.mulf %557, %698 : vector<8x128xf32>
    %700 = arith.addf %696, %699 : vector<8x128xf32>
    %c165 = arith.constant 165 : index
    %701 = memref.load %arg1[%c165] : memref<263xf32, #tpu.memory_space<smem>>
    %702 = vector.broadcast %701 : f32 to vector<8x128xf32>
    %703 = arith.mulf %573, %702 : vector<8x128xf32>
    %704 = arith.addf %700, %703 : vector<8x128xf32>
    %c166 = arith.constant 166 : index
    %705 = memref.load %arg1[%c166] : memref<263xf32, #tpu.memory_space<smem>>
    %706 = vector.broadcast %705 : f32 to vector<8x128xf32>
    %707 = arith.mulf %589, %706 : vector<8x128xf32>
    %708 = arith.addf %704, %707 : vector<8x128xf32>
    %c167 = arith.constant 167 : index
    %709 = memref.load %arg1[%c167] : memref<263xf32, #tpu.memory_space<smem>>
    %710 = vector.broadcast %709 : f32 to vector<8x128xf32>
    %711 = arith.mulf %605, %710 : vector<8x128xf32>
    %712 = arith.addf %708, %711 : vector<8x128xf32>
    %c247 = arith.constant 247 : index
    %713 = memref.load %arg1[%c247] : memref<263xf32, #tpu.memory_space<smem>>
    %714 = vector.broadcast %713 : f32 to vector<8x128xf32>
    %715 = arith.addf %712, %714 : vector<8x128xf32>
    %c168 = arith.constant 168 : index
    %716 = memref.load %arg1[%c168] : memref<263xf32, #tpu.memory_space<smem>>
    %717 = vector.broadcast %716 : f32 to vector<8x128xf32>
    %718 = arith.mulf %541, %717 : vector<8x128xf32>
    %c169 = arith.constant 169 : index
    %719 = memref.load %arg1[%c169] : memref<263xf32, #tpu.memory_space<smem>>
    %720 = vector.broadcast %719 : f32 to vector<8x128xf32>
    %721 = arith.mulf %557, %720 : vector<8x128xf32>
    %722 = arith.addf %718, %721 : vector<8x128xf32>
    %c170 = arith.constant 170 : index
    %723 = memref.load %arg1[%c170] : memref<263xf32, #tpu.memory_space<smem>>
    %724 = vector.broadcast %723 : f32 to vector<8x128xf32>
    %725 = arith.mulf %573, %724 : vector<8x128xf32>
    %726 = arith.addf %722, %725 : vector<8x128xf32>
    %c171 = arith.constant 171 : index
    %727 = memref.load %arg1[%c171] : memref<263xf32, #tpu.memory_space<smem>>
    %728 = vector.broadcast %727 : f32 to vector<8x128xf32>
    %729 = arith.mulf %589, %728 : vector<8x128xf32>
    %730 = arith.addf %726, %729 : vector<8x128xf32>
    %c172 = arith.constant 172 : index
    %731 = memref.load %arg1[%c172] : memref<263xf32, #tpu.memory_space<smem>>
    %732 = vector.broadcast %731 : f32 to vector<8x128xf32>
    %733 = arith.mulf %605, %732 : vector<8x128xf32>
    %734 = arith.addf %730, %733 : vector<8x128xf32>
    %c248 = arith.constant 248 : index
    %735 = memref.load %arg1[%c248] : memref<263xf32, #tpu.memory_space<smem>>
    %736 = vector.broadcast %735 : f32 to vector<8x128xf32>
    %737 = arith.addf %734, %736 : vector<8x128xf32>
    %c173 = arith.constant 173 : index
    %738 = memref.load %arg1[%c173] : memref<263xf32, #tpu.memory_space<smem>>
    %739 = vector.broadcast %738 : f32 to vector<8x128xf32>
    %740 = arith.mulf %541, %739 : vector<8x128xf32>
    %c174 = arith.constant 174 : index
    %741 = memref.load %arg1[%c174] : memref<263xf32, #tpu.memory_space<smem>>
    %742 = vector.broadcast %741 : f32 to vector<8x128xf32>
    %743 = arith.mulf %557, %742 : vector<8x128xf32>
    %744 = arith.addf %740, %743 : vector<8x128xf32>
    %c175 = arith.constant 175 : index
    %745 = memref.load %arg1[%c175] : memref<263xf32, #tpu.memory_space<smem>>
    %746 = vector.broadcast %745 : f32 to vector<8x128xf32>
    %747 = arith.mulf %573, %746 : vector<8x128xf32>
    %748 = arith.addf %744, %747 : vector<8x128xf32>
    %c176 = arith.constant 176 : index
    %749 = memref.load %arg1[%c176] : memref<263xf32, #tpu.memory_space<smem>>
    %750 = vector.broadcast %749 : f32 to vector<8x128xf32>
    %751 = arith.mulf %589, %750 : vector<8x128xf32>
    %752 = arith.addf %748, %751 : vector<8x128xf32>
    %c177 = arith.constant 177 : index
    %753 = memref.load %arg1[%c177] : memref<263xf32, #tpu.memory_space<smem>>
    %754 = vector.broadcast %753 : f32 to vector<8x128xf32>
    %755 = arith.mulf %605, %754 : vector<8x128xf32>
    %756 = arith.addf %752, %755 : vector<8x128xf32>
    %c249 = arith.constant 249 : index
    %757 = memref.load %arg1[%c249] : memref<263xf32, #tpu.memory_space<smem>>
    %758 = vector.broadcast %757 : f32 to vector<8x128xf32>
    %759 = arith.addf %756, %758 : vector<8x128xf32>
    %c178 = arith.constant 178 : index
    %760 = memref.load %arg1[%c178] : memref<263xf32, #tpu.memory_space<smem>>
    %761 = vector.broadcast %760 : f32 to vector<8x128xf32>
    %762 = arith.mulf %541, %761 : vector<8x128xf32>
    %c179 = arith.constant 179 : index
    %763 = memref.load %arg1[%c179] : memref<263xf32, #tpu.memory_space<smem>>
    %764 = vector.broadcast %763 : f32 to vector<8x128xf32>
    %765 = arith.mulf %557, %764 : vector<8x128xf32>
    %766 = arith.addf %762, %765 : vector<8x128xf32>
    %c180 = arith.constant 180 : index
    %767 = memref.load %arg1[%c180] : memref<263xf32, #tpu.memory_space<smem>>
    %768 = vector.broadcast %767 : f32 to vector<8x128xf32>
    %769 = arith.mulf %573, %768 : vector<8x128xf32>
    %770 = arith.addf %766, %769 : vector<8x128xf32>
    %c181 = arith.constant 181 : index
    %771 = memref.load %arg1[%c181] : memref<263xf32, #tpu.memory_space<smem>>
    %772 = vector.broadcast %771 : f32 to vector<8x128xf32>
    %773 = arith.mulf %589, %772 : vector<8x128xf32>
    %774 = arith.addf %770, %773 : vector<8x128xf32>
    %c182 = arith.constant 182 : index
    %775 = memref.load %arg1[%c182] : memref<263xf32, #tpu.memory_space<smem>>
    %776 = vector.broadcast %775 : f32 to vector<8x128xf32>
    %777 = arith.mulf %605, %776 : vector<8x128xf32>
    %778 = arith.addf %774, %777 : vector<8x128xf32>
    %c250 = arith.constant 250 : index
    %779 = memref.load %arg1[%c250] : memref<263xf32, #tpu.memory_space<smem>>
    %780 = vector.broadcast %779 : f32 to vector<8x128xf32>
    %781 = arith.addf %778, %780 : vector<8x128xf32>
    %c183 = arith.constant 183 : index
    %782 = memref.load %arg1[%c183] : memref<263xf32, #tpu.memory_space<smem>>
    %783 = vector.broadcast %782 : f32 to vector<8x128xf32>
    %784 = arith.mulf %541, %783 : vector<8x128xf32>
    %c184 = arith.constant 184 : index
    %785 = memref.load %arg1[%c184] : memref<263xf32, #tpu.memory_space<smem>>
    %786 = vector.broadcast %785 : f32 to vector<8x128xf32>
    %787 = arith.mulf %557, %786 : vector<8x128xf32>
    %788 = arith.addf %784, %787 : vector<8x128xf32>
    %c185 = arith.constant 185 : index
    %789 = memref.load %arg1[%c185] : memref<263xf32, #tpu.memory_space<smem>>
    %790 = vector.broadcast %789 : f32 to vector<8x128xf32>
    %791 = arith.mulf %573, %790 : vector<8x128xf32>
    %792 = arith.addf %788, %791 : vector<8x128xf32>
    %c186 = arith.constant 186 : index
    %793 = memref.load %arg1[%c186] : memref<263xf32, #tpu.memory_space<smem>>
    %794 = vector.broadcast %793 : f32 to vector<8x128xf32>
    %795 = arith.mulf %589, %794 : vector<8x128xf32>
    %796 = arith.addf %792, %795 : vector<8x128xf32>
    %c187 = arith.constant 187 : index
    %797 = memref.load %arg1[%c187] : memref<263xf32, #tpu.memory_space<smem>>
    %798 = vector.broadcast %797 : f32 to vector<8x128xf32>
    %799 = arith.mulf %605, %798 : vector<8x128xf32>
    %800 = arith.addf %796, %799 : vector<8x128xf32>
    %c251 = arith.constant 251 : index
    %801 = memref.load %arg1[%c251] : memref<263xf32, #tpu.memory_space<smem>>
    %802 = vector.broadcast %801 : f32 to vector<8x128xf32>
    %803 = arith.addf %800, %802 : vector<8x128xf32>
    %c188 = arith.constant 188 : index
    %804 = memref.load %arg1[%c188] : memref<263xf32, #tpu.memory_space<smem>>
    %805 = vector.broadcast %804 : f32 to vector<8x128xf32>
    %806 = arith.mulf %541, %805 : vector<8x128xf32>
    %c189 = arith.constant 189 : index
    %807 = memref.load %arg1[%c189] : memref<263xf32, #tpu.memory_space<smem>>
    %808 = vector.broadcast %807 : f32 to vector<8x128xf32>
    %809 = arith.mulf %557, %808 : vector<8x128xf32>
    %810 = arith.addf %806, %809 : vector<8x128xf32>
    %c190 = arith.constant 190 : index
    %811 = memref.load %arg1[%c190] : memref<263xf32, #tpu.memory_space<smem>>
    %812 = vector.broadcast %811 : f32 to vector<8x128xf32>
    %813 = arith.mulf %573, %812 : vector<8x128xf32>
    %814 = arith.addf %810, %813 : vector<8x128xf32>
    %c191 = arith.constant 191 : index
    %815 = memref.load %arg1[%c191] : memref<263xf32, #tpu.memory_space<smem>>
    %816 = vector.broadcast %815 : f32 to vector<8x128xf32>
    %817 = arith.mulf %589, %816 : vector<8x128xf32>
    %818 = arith.addf %814, %817 : vector<8x128xf32>
    %c192 = arith.constant 192 : index
    %819 = memref.load %arg1[%c192] : memref<263xf32, #tpu.memory_space<smem>>
    %820 = vector.broadcast %819 : f32 to vector<8x128xf32>
    %821 = arith.mulf %605, %820 : vector<8x128xf32>
    %822 = arith.addf %818, %821 : vector<8x128xf32>
    %c252 = arith.constant 252 : index
    %823 = memref.load %arg1[%c252] : memref<263xf32, #tpu.memory_space<smem>>
    %824 = vector.broadcast %823 : f32 to vector<8x128xf32>
    %825 = arith.addf %822, %824 : vector<8x128xf32>
    %c193 = arith.constant 193 : index
    %826 = memref.load %arg1[%c193] : memref<263xf32, #tpu.memory_space<smem>>
    %827 = vector.broadcast %826 : f32 to vector<8x128xf32>
    %828 = arith.mulf %541, %827 : vector<8x128xf32>
    %c194 = arith.constant 194 : index
    %829 = memref.load %arg1[%c194] : memref<263xf32, #tpu.memory_space<smem>>
    %830 = vector.broadcast %829 : f32 to vector<8x128xf32>
    %831 = arith.mulf %557, %830 : vector<8x128xf32>
    %832 = arith.addf %828, %831 : vector<8x128xf32>
    %c195 = arith.constant 195 : index
    %833 = memref.load %arg1[%c195] : memref<263xf32, #tpu.memory_space<smem>>
    %834 = vector.broadcast %833 : f32 to vector<8x128xf32>
    %835 = arith.mulf %573, %834 : vector<8x128xf32>
    %836 = arith.addf %832, %835 : vector<8x128xf32>
    %c196 = arith.constant 196 : index
    %837 = memref.load %arg1[%c196] : memref<263xf32, #tpu.memory_space<smem>>
    %838 = vector.broadcast %837 : f32 to vector<8x128xf32>
    %839 = arith.mulf %589, %838 : vector<8x128xf32>
    %840 = arith.addf %836, %839 : vector<8x128xf32>
    %c197 = arith.constant 197 : index
    %841 = memref.load %arg1[%c197] : memref<263xf32, #tpu.memory_space<smem>>
    %842 = vector.broadcast %841 : f32 to vector<8x128xf32>
    %843 = arith.mulf %605, %842 : vector<8x128xf32>
    %844 = arith.addf %840, %843 : vector<8x128xf32>
    %c253 = arith.constant 253 : index
    %845 = memref.load %arg1[%c253] : memref<263xf32, #tpu.memory_space<smem>>
    %846 = vector.broadcast %845 : f32 to vector<8x128xf32>
    %847 = arith.addf %844, %846 : vector<8x128xf32>
    %c198 = arith.constant 198 : index
    %848 = memref.load %arg1[%c198] : memref<263xf32, #tpu.memory_space<smem>>
    %849 = vector.broadcast %848 : f32 to vector<8x128xf32>
    %850 = arith.mulf %541, %849 : vector<8x128xf32>
    %c199 = arith.constant 199 : index
    %851 = memref.load %arg1[%c199] : memref<263xf32, #tpu.memory_space<smem>>
    %852 = vector.broadcast %851 : f32 to vector<8x128xf32>
    %853 = arith.mulf %557, %852 : vector<8x128xf32>
    %854 = arith.addf %850, %853 : vector<8x128xf32>
    %c200 = arith.constant 200 : index
    %855 = memref.load %arg1[%c200] : memref<263xf32, #tpu.memory_space<smem>>
    %856 = vector.broadcast %855 : f32 to vector<8x128xf32>
    %857 = arith.mulf %573, %856 : vector<8x128xf32>
    %858 = arith.addf %854, %857 : vector<8x128xf32>
    %c201 = arith.constant 201 : index
    %859 = memref.load %arg1[%c201] : memref<263xf32, #tpu.memory_space<smem>>
    %860 = vector.broadcast %859 : f32 to vector<8x128xf32>
    %861 = arith.mulf %589, %860 : vector<8x128xf32>
    %862 = arith.addf %858, %861 : vector<8x128xf32>
    %c202 = arith.constant 202 : index
    %863 = memref.load %arg1[%c202] : memref<263xf32, #tpu.memory_space<smem>>
    %864 = vector.broadcast %863 : f32 to vector<8x128xf32>
    %865 = arith.mulf %605, %864 : vector<8x128xf32>
    %866 = arith.addf %862, %865 : vector<8x128xf32>
    %c254 = arith.constant 254 : index
    %867 = memref.load %arg1[%c254] : memref<263xf32, #tpu.memory_space<smem>>
    %868 = vector.broadcast %867 : f32 to vector<8x128xf32>
    %869 = arith.addf %866, %868 : vector<8x128xf32>
    %c203 = arith.constant 203 : index
    %870 = memref.load %arg1[%c203] : memref<263xf32, #tpu.memory_space<smem>>
    %871 = vector.broadcast %870 : f32 to vector<8x128xf32>
    %872 = arith.mulf %541, %871 : vector<8x128xf32>
    %c204 = arith.constant 204 : index
    %873 = memref.load %arg1[%c204] : memref<263xf32, #tpu.memory_space<smem>>
    %874 = vector.broadcast %873 : f32 to vector<8x128xf32>
    %875 = arith.mulf %557, %874 : vector<8x128xf32>
    %876 = arith.addf %872, %875 : vector<8x128xf32>
    %c205 = arith.constant 205 : index
    %877 = memref.load %arg1[%c205] : memref<263xf32, #tpu.memory_space<smem>>
    %878 = vector.broadcast %877 : f32 to vector<8x128xf32>
    %879 = arith.mulf %573, %878 : vector<8x128xf32>
    %880 = arith.addf %876, %879 : vector<8x128xf32>
    %c206 = arith.constant 206 : index
    %881 = memref.load %arg1[%c206] : memref<263xf32, #tpu.memory_space<smem>>
    %882 = vector.broadcast %881 : f32 to vector<8x128xf32>
    %883 = arith.mulf %589, %882 : vector<8x128xf32>
    %884 = arith.addf %880, %883 : vector<8x128xf32>
    %c207 = arith.constant 207 : index
    %885 = memref.load %arg1[%c207] : memref<263xf32, #tpu.memory_space<smem>>
    %886 = vector.broadcast %885 : f32 to vector<8x128xf32>
    %887 = arith.mulf %605, %886 : vector<8x128xf32>
    %888 = arith.addf %884, %887 : vector<8x128xf32>
    %c255 = arith.constant 255 : index
    %889 = memref.load %arg1[%c255] : memref<263xf32, #tpu.memory_space<smem>>
    %890 = vector.broadcast %889 : f32 to vector<8x128xf32>
    %891 = arith.addf %888, %890 : vector<8x128xf32>
    %c208 = arith.constant 208 : index
    %892 = memref.load %arg1[%c208] : memref<263xf32, #tpu.memory_space<smem>>
    %893 = vector.broadcast %892 : f32 to vector<8x128xf32>
    %894 = arith.mulf %541, %893 : vector<8x128xf32>
    %c209 = arith.constant 209 : index
    %895 = memref.load %arg1[%c209] : memref<263xf32, #tpu.memory_space<smem>>
    %896 = vector.broadcast %895 : f32 to vector<8x128xf32>
    %897 = arith.mulf %557, %896 : vector<8x128xf32>
    %898 = arith.addf %894, %897 : vector<8x128xf32>
    %c210 = arith.constant 210 : index
    %899 = memref.load %arg1[%c210] : memref<263xf32, #tpu.memory_space<smem>>
    %900 = vector.broadcast %899 : f32 to vector<8x128xf32>
    %901 = arith.mulf %573, %900 : vector<8x128xf32>
    %902 = arith.addf %898, %901 : vector<8x128xf32>
    %c211 = arith.constant 211 : index
    %903 = memref.load %arg1[%c211] : memref<263xf32, #tpu.memory_space<smem>>
    %904 = vector.broadcast %903 : f32 to vector<8x128xf32>
    %905 = arith.mulf %589, %904 : vector<8x128xf32>
    %906 = arith.addf %902, %905 : vector<8x128xf32>
    %c212 = arith.constant 212 : index
    %907 = memref.load %arg1[%c212] : memref<263xf32, #tpu.memory_space<smem>>
    %908 = vector.broadcast %907 : f32 to vector<8x128xf32>
    %909 = arith.mulf %605, %908 : vector<8x128xf32>
    %910 = arith.addf %906, %909 : vector<8x128xf32>
    %c256 = arith.constant 256 : index
    %911 = memref.load %arg1[%c256] : memref<263xf32, #tpu.memory_space<smem>>
    %912 = vector.broadcast %911 : f32 to vector<8x128xf32>
    %913 = arith.addf %910, %912 : vector<8x128xf32>
    %c213 = arith.constant 213 : index
    %914 = memref.load %arg1[%c213] : memref<263xf32, #tpu.memory_space<smem>>
    %915 = vector.broadcast %914 : f32 to vector<8x128xf32>
    %916 = arith.mulf %541, %915 : vector<8x128xf32>
    %c214 = arith.constant 214 : index
    %917 = memref.load %arg1[%c214] : memref<263xf32, #tpu.memory_space<smem>>
    %918 = vector.broadcast %917 : f32 to vector<8x128xf32>
    %919 = arith.mulf %557, %918 : vector<8x128xf32>
    %920 = arith.addf %916, %919 : vector<8x128xf32>
    %c215 = arith.constant 215 : index
    %921 = memref.load %arg1[%c215] : memref<263xf32, #tpu.memory_space<smem>>
    %922 = vector.broadcast %921 : f32 to vector<8x128xf32>
    %923 = arith.mulf %573, %922 : vector<8x128xf32>
    %924 = arith.addf %920, %923 : vector<8x128xf32>
    %c216 = arith.constant 216 : index
    %925 = memref.load %arg1[%c216] : memref<263xf32, #tpu.memory_space<smem>>
    %926 = vector.broadcast %925 : f32 to vector<8x128xf32>
    %927 = arith.mulf %589, %926 : vector<8x128xf32>
    %928 = arith.addf %924, %927 : vector<8x128xf32>
    %c217 = arith.constant 217 : index
    %929 = memref.load %arg1[%c217] : memref<263xf32, #tpu.memory_space<smem>>
    %930 = vector.broadcast %929 : f32 to vector<8x128xf32>
    %931 = arith.mulf %605, %930 : vector<8x128xf32>
    %932 = arith.addf %928, %931 : vector<8x128xf32>
    %c257 = arith.constant 257 : index
    %933 = memref.load %arg1[%c257] : memref<263xf32, #tpu.memory_space<smem>>
    %934 = vector.broadcast %933 : f32 to vector<8x128xf32>
    %935 = arith.addf %932, %934 : vector<8x128xf32>
    %c218 = arith.constant 218 : index
    %936 = memref.load %arg1[%c218] : memref<263xf32, #tpu.memory_space<smem>>
    %937 = vector.broadcast %936 : f32 to vector<8x128xf32>
    %938 = arith.mulf %541, %937 : vector<8x128xf32>
    %c219 = arith.constant 219 : index
    %939 = memref.load %arg1[%c219] : memref<263xf32, #tpu.memory_space<smem>>
    %940 = vector.broadcast %939 : f32 to vector<8x128xf32>
    %941 = arith.mulf %557, %940 : vector<8x128xf32>
    %942 = arith.addf %938, %941 : vector<8x128xf32>
    %c220 = arith.constant 220 : index
    %943 = memref.load %arg1[%c220] : memref<263xf32, #tpu.memory_space<smem>>
    %944 = vector.broadcast %943 : f32 to vector<8x128xf32>
    %945 = arith.mulf %573, %944 : vector<8x128xf32>
    %946 = arith.addf %942, %945 : vector<8x128xf32>
    %c221 = arith.constant 221 : index
    %947 = memref.load %arg1[%c221] : memref<263xf32, #tpu.memory_space<smem>>
    %948 = vector.broadcast %947 : f32 to vector<8x128xf32>
    %949 = arith.mulf %589, %948 : vector<8x128xf32>
    %950 = arith.addf %946, %949 : vector<8x128xf32>
    %c222 = arith.constant 222 : index
    %951 = memref.load %arg1[%c222] : memref<263xf32, #tpu.memory_space<smem>>
    %952 = vector.broadcast %951 : f32 to vector<8x128xf32>
    %953 = arith.mulf %605, %952 : vector<8x128xf32>
    %954 = arith.addf %950, %953 : vector<8x128xf32>
    %c258 = arith.constant 258 : index
    %955 = memref.load %arg1[%c258] : memref<263xf32, #tpu.memory_space<smem>>
    %956 = vector.broadcast %955 : f32 to vector<8x128xf32>
    %957 = arith.addf %954, %956 : vector<8x128xf32>
    %c223 = arith.constant 223 : index
    %958 = memref.load %arg1[%c223] : memref<263xf32, #tpu.memory_space<smem>>
    %959 = vector.broadcast %958 : f32 to vector<8x128xf32>
    %960 = arith.mulf %541, %959 : vector<8x128xf32>
    %c224 = arith.constant 224 : index
    %961 = memref.load %arg1[%c224] : memref<263xf32, #tpu.memory_space<smem>>
    %962 = vector.broadcast %961 : f32 to vector<8x128xf32>
    %963 = arith.mulf %557, %962 : vector<8x128xf32>
    %964 = arith.addf %960, %963 : vector<8x128xf32>
    %c225 = arith.constant 225 : index
    %965 = memref.load %arg1[%c225] : memref<263xf32, #tpu.memory_space<smem>>
    %966 = vector.broadcast %965 : f32 to vector<8x128xf32>
    %967 = arith.mulf %573, %966 : vector<8x128xf32>
    %968 = arith.addf %964, %967 : vector<8x128xf32>
    %c226 = arith.constant 226 : index
    %969 = memref.load %arg1[%c226] : memref<263xf32, #tpu.memory_space<smem>>
    %970 = vector.broadcast %969 : f32 to vector<8x128xf32>
    %971 = arith.mulf %589, %970 : vector<8x128xf32>
    %972 = arith.addf %968, %971 : vector<8x128xf32>
    %c227 = arith.constant 227 : index
    %973 = memref.load %arg1[%c227] : memref<263xf32, #tpu.memory_space<smem>>
    %974 = vector.broadcast %973 : f32 to vector<8x128xf32>
    %975 = arith.mulf %605, %974 : vector<8x128xf32>
    %976 = arith.addf %972, %975 : vector<8x128xf32>
    %c259 = arith.constant 259 : index
    %977 = memref.load %arg1[%c259] : memref<263xf32, #tpu.memory_space<smem>>
    %978 = vector.broadcast %977 : f32 to vector<8x128xf32>
    %979 = arith.addf %976, %978 : vector<8x128xf32>
    %c228 = arith.constant 228 : index
    %980 = memref.load %arg1[%c228] : memref<263xf32, #tpu.memory_space<smem>>
    %981 = vector.broadcast %980 : f32 to vector<8x128xf32>
    %982 = arith.mulf %541, %981 : vector<8x128xf32>
    %c229 = arith.constant 229 : index
    %983 = memref.load %arg1[%c229] : memref<263xf32, #tpu.memory_space<smem>>
    %984 = vector.broadcast %983 : f32 to vector<8x128xf32>
    %985 = arith.mulf %557, %984 : vector<8x128xf32>
    %986 = arith.addf %982, %985 : vector<8x128xf32>
    %c230 = arith.constant 230 : index
    %987 = memref.load %arg1[%c230] : memref<263xf32, #tpu.memory_space<smem>>
    %988 = vector.broadcast %987 : f32 to vector<8x128xf32>
    %989 = arith.mulf %573, %988 : vector<8x128xf32>
    %990 = arith.addf %986, %989 : vector<8x128xf32>
    %c231 = arith.constant 231 : index
    %991 = memref.load %arg1[%c231] : memref<263xf32, #tpu.memory_space<smem>>
    %992 = vector.broadcast %991 : f32 to vector<8x128xf32>
    %993 = arith.mulf %589, %992 : vector<8x128xf32>
    %994 = arith.addf %990, %993 : vector<8x128xf32>
    %c232 = arith.constant 232 : index
    %995 = memref.load %arg1[%c232] : memref<263xf32, #tpu.memory_space<smem>>
    %996 = vector.broadcast %995 : f32 to vector<8x128xf32>
    %997 = arith.mulf %605, %996 : vector<8x128xf32>
    %998 = arith.addf %994, %997 : vector<8x128xf32>
    %c260 = arith.constant 260 : index
    %999 = memref.load %arg1[%c260] : memref<263xf32, #tpu.memory_space<smem>>
    %1000 = vector.broadcast %999 : f32 to vector<8x128xf32>
    %1001 = arith.addf %998, %1000 : vector<8x128xf32>
    %c233 = arith.constant 233 : index
    %1002 = memref.load %arg1[%c233] : memref<263xf32, #tpu.memory_space<smem>>
    %1003 = vector.broadcast %1002 : f32 to vector<8x128xf32>
    %1004 = arith.mulf %541, %1003 : vector<8x128xf32>
    %c234 = arith.constant 234 : index
    %1005 = memref.load %arg1[%c234] : memref<263xf32, #tpu.memory_space<smem>>
    %1006 = vector.broadcast %1005 : f32 to vector<8x128xf32>
    %1007 = arith.mulf %557, %1006 : vector<8x128xf32>
    %1008 = arith.addf %1004, %1007 : vector<8x128xf32>
    %c235 = arith.constant 235 : index
    %1009 = memref.load %arg1[%c235] : memref<263xf32, #tpu.memory_space<smem>>
    %1010 = vector.broadcast %1009 : f32 to vector<8x128xf32>
    %1011 = arith.mulf %573, %1010 : vector<8x128xf32>
    %1012 = arith.addf %1008, %1011 : vector<8x128xf32>
    %c236 = arith.constant 236 : index
    %1013 = memref.load %arg1[%c236] : memref<263xf32, #tpu.memory_space<smem>>
    %1014 = vector.broadcast %1013 : f32 to vector<8x128xf32>
    %1015 = arith.mulf %589, %1014 : vector<8x128xf32>
    %1016 = arith.addf %1012, %1015 : vector<8x128xf32>
    %c237 = arith.constant 237 : index
    %1017 = memref.load %arg1[%c237] : memref<263xf32, #tpu.memory_space<smem>>
    %1018 = vector.broadcast %1017 : f32 to vector<8x128xf32>
    %1019 = arith.mulf %605, %1018 : vector<8x128xf32>
    %1020 = arith.addf %1016, %1019 : vector<8x128xf32>
    %c261 = arith.constant 261 : index
    %1021 = memref.load %arg1[%c261] : memref<263xf32, #tpu.memory_space<smem>>
    %1022 = vector.broadcast %1021 : f32 to vector<8x128xf32>
    %1023 = arith.addf %1020, %1022 : vector<8x128xf32>
    %c238 = arith.constant 238 : index
    %1024 = memref.load %arg1[%c238] : memref<263xf32, #tpu.memory_space<smem>>
    %1025 = vector.broadcast %1024 : f32 to vector<8x128xf32>
    %1026 = arith.mulf %541, %1025 : vector<8x128xf32>
    %c239 = arith.constant 239 : index
    %1027 = memref.load %arg1[%c239] : memref<263xf32, #tpu.memory_space<smem>>
    %1028 = vector.broadcast %1027 : f32 to vector<8x128xf32>
    %1029 = arith.mulf %557, %1028 : vector<8x128xf32>
    %1030 = arith.addf %1026, %1029 : vector<8x128xf32>
    %c240 = arith.constant 240 : index
    %1031 = memref.load %arg1[%c240] : memref<263xf32, #tpu.memory_space<smem>>
    %1032 = vector.broadcast %1031 : f32 to vector<8x128xf32>
    %1033 = arith.mulf %573, %1032 : vector<8x128xf32>
    %1034 = arith.addf %1030, %1033 : vector<8x128xf32>
    %c241 = arith.constant 241 : index
    %1035 = memref.load %arg1[%c241] : memref<263xf32, #tpu.memory_space<smem>>
    %1036 = vector.broadcast %1035 : f32 to vector<8x128xf32>
    %1037 = arith.mulf %589, %1036 : vector<8x128xf32>
    %1038 = arith.addf %1034, %1037 : vector<8x128xf32>
    %c242 = arith.constant 242 : index
    %1039 = memref.load %arg1[%c242] : memref<263xf32, #tpu.memory_space<smem>>
    %1040 = vector.broadcast %1039 : f32 to vector<8x128xf32>
    %1041 = arith.mulf %605, %1040 : vector<8x128xf32>
    %1042 = arith.addf %1038, %1041 : vector<8x128xf32>
    %c262 = arith.constant 262 : index
    %1043 = memref.load %arg1[%c262] : memref<263xf32, #tpu.memory_space<smem>>
    %1044 = vector.broadcast %1043 : f32 to vector<8x128xf32>
    %1045 = arith.addf %1042, %1044 : vector<8x128xf32>
    %c0_69 = arith.constant 0 : index
    %c0_70 = arith.constant 0 : index
    %c0_71 = arith.constant 0 : index
    %1046 = vector.load %arg3[%c0_69, %c0_70, %c0_71] : memref<20x8x128xf32, #tpu.memory_space<vmem>>, vector<1x8x128xf32>
    %1047 = vector.shape_cast %1046 : vector<1x8x128xf32> to vector<8x128xf32>
    %1048 = vector.shape_cast %627 : vector<8x128xf32> to vector<1x8x128xf32>
    tpu.vector_store %arg3[%c0_69, %c0_70, %c0_71], %1048 {strides = array<i32>} : memref<20x8x128xf32, #tpu.memory_space<vmem>>, vector<1x8x128xf32>,
    %c1_72 = arith.constant 1 : index
    %c0_73 = arith.constant 0 : index
    %c0_74 = arith.constant 0 : index
    %1049 = vector.load %arg3[%c1_72, %c0_73, %c0_74] : memref<20x8x128xf32, #tpu.memory_space<vmem>>, vector<1x8x128xf32>
    %1050 = vector.shape_cast %1049 : vector<1x8x128xf32> to vector<8x128xf32>
    %1051 = vector.shape_cast %649 : vector<8x128xf32> to vector<1x8x128xf32>
    tpu.vector_store %arg3[%c1_72, %c0_73, %c0_74], %1051 {strides = array<i32>} : memref<20x8x128xf32, #tpu.memory_space<vmem>>, vector<1x8x128xf32>,
    %c2_75 = arith.constant 2 : index
    %c0_76 = arith.constant 0 : index
    %c0_77 = arith.constant 0 : index
    %1052 = vector.load %arg3[%c2_75, %c0_76, %c0_77] : memref<20x8x128xf32, #tpu.memory_space<vmem>>, vector<1x8x128xf32>
    %1053 = vector.shape_cast %1052 : vector<1x8x128xf32> to vector<8x128xf32>
    %1054 = vector.shape_cast %671 : vector<8x128xf32> to vector<1x8x128xf32>
    tpu.vector_store %arg3[%c2_75, %c0_76, %c0_77], %1054 {strides = array<i32>} : memref<20x8x128xf32, #tpu.memory_space<vmem>>, vector<1x8x128xf32>,
    %c3_78 = arith.constant 3 : index
    %c0_79 = arith.constant 0 : index
    %c0_80 = arith.constant 0 : index
    %1055 = vector.load %arg3[%c3_78, %c0_79, %c0_80] : memref<20x8x128xf32, #tpu.memory_space<vmem>>, vector<1x8x128xf32>
    %1056 = vector.shape_cast %1055 : vector<1x8x128xf32> to vector<8x128xf32>
    %1057 = vector.shape_cast %693 : vector<8x128xf32> to vector<1x8x128xf32>
    tpu.vector_store %arg3[%c3_78, %c0_79, %c0_80], %1057 {strides = array<i32>} : memref<20x8x128xf32, #tpu.memory_space<vmem>>, vector<1x8x128xf32>,
    %c4_81 = arith.constant 4 : index
    %c0_82 = arith.constant 0 : index
    %c0_83 = arith.constant 0 : index
    %1058 = vector.load %arg3[%c4_81, %c0_82, %c0_83] : memref<20x8x128xf32, #tpu.memory_space<vmem>>, vector<1x8x128xf32>
    %1059 = vector.shape_cast %1058 : vector<1x8x128xf32> to vector<8x128xf32>
    %1060 = vector.shape_cast %715 : vector<8x128xf32> to vector<1x8x128xf32>
    tpu.vector_store %arg3[%c4_81, %c0_82, %c0_83], %1060 {strides = array<i32>} : memref<20x8x128xf32, #tpu.memory_space<vmem>>, vector<1x8x128xf32>,
    %c5_84 = arith.constant 5 : index
    %c0_85 = arith.constant 0 : index
    %c0_86 = arith.constant 0 : index
    %1061 = vector.load %arg3[%c5_84, %c0_85, %c0_86] : memref<20x8x128xf32, #tpu.memory_space<vmem>>, vector<1x8x128xf32>
    %1062 = vector.shape_cast %1061 : vector<1x8x128xf32> to vector<8x128xf32>
    %1063 = vector.shape_cast %737 : vector<8x128xf32> to vector<1x8x128xf32>
    tpu.vector_store %arg3[%c5_84, %c0_85, %c0_86], %1063 {strides = array<i32>} : memref<20x8x128xf32, #tpu.memory_space<vmem>>, vector<1x8x128xf32>,
    %c6_87 = arith.constant 6 : index
    %c0_88 = arith.constant 0 : index
    %c0_89 = arith.constant 0 : index
    %1064 = vector.load %arg3[%c6_87, %c0_88, %c0_89] : memref<20x8x128xf32, #tpu.memory_space<vmem>>, vector<1x8x128xf32>
    %1065 = vector.shape_cast %1064 : vector<1x8x128xf32> to vector<8x128xf32>
    %1066 = vector.shape_cast %759 : vector<8x128xf32> to vector<1x8x128xf32>
    tpu.vector_store %arg3[%c6_87, %c0_88, %c0_89], %1066 {strides = array<i32>} : memref<20x8x128xf32, #tpu.memory_space<vmem>>, vector<1x8x128xf32>,
    %c7_90 = arith.constant 7 : index
    %c0_91 = arith.constant 0 : index
    %c0_92 = arith.constant 0 : index
    %1067 = vector.load %arg3[%c7_90, %c0_91, %c0_92] : memref<20x8x128xf32, #tpu.memory_space<vmem>>, vector<1x8x128xf32>
    %1068 = vector.shape_cast %1067 : vector<1x8x128xf32> to vector<8x128xf32>
    %1069 = vector.shape_cast %781 : vector<8x128xf32> to vector<1x8x128xf32>
    tpu.vector_store %arg3[%c7_90, %c0_91, %c0_92], %1069 {strides = array<i32>} : memref<20x8x128xf32, #tpu.memory_space<vmem>>, vector<1x8x128xf32>,
    %c8_93 = arith.constant 8 : index
    %c0_94 = arith.constant 0 : index
    %c0_95 = arith.constant 0 : index
    %1070 = vector.load %arg3[%c8_93, %c0_94, %c0_95] : memref<20x8x128xf32, #tpu.memory_space<vmem>>, vector<1x8x128xf32>
    %1071 = vector.shape_cast %1070 : vector<1x8x128xf32> to vector<8x128xf32>
    %1072 = vector.shape_cast %803 : vector<8x128xf32> to vector<1x8x128xf32>
    tpu.vector_store %arg3[%c8_93, %c0_94, %c0_95], %1072 {strides = array<i32>} : memref<20x8x128xf32, #tpu.memory_space<vmem>>, vector<1x8x128xf32>,
    %c9_96 = arith.constant 9 : index
    %c0_97 = arith.constant 0 : index
    %c0_98 = arith.constant 0 : index
    %1073 = vector.load %arg3[%c9_96, %c0_97, %c0_98] : memref<20x8x128xf32, #tpu.memory_space<vmem>>, vector<1x8x128xf32>
    %1074 = vector.shape_cast %1073 : vector<1x8x128xf32> to vector<8x128xf32>
    %1075 = vector.shape_cast %825 : vector<8x128xf32> to vector<1x8x128xf32>
    tpu.vector_store %arg3[%c9_96, %c0_97, %c0_98], %1075 {strides = array<i32>} : memref<20x8x128xf32, #tpu.memory_space<vmem>>, vector<1x8x128xf32>,
    %c10_99 = arith.constant 10 : index
    %c0_100 = arith.constant 0 : index
    %c0_101 = arith.constant 0 : index
    %1076 = vector.load %arg3[%c10_99, %c0_100, %c0_101] : memref<20x8x128xf32, #tpu.memory_space<vmem>>, vector<1x8x128xf32>
    %1077 = vector.shape_cast %1076 : vector<1x8x128xf32> to vector<8x128xf32>
    %1078 = vector.shape_cast %847 : vector<8x128xf32> to vector<1x8x128xf32>
    tpu.vector_store %arg3[%c10_99, %c0_100, %c0_101], %1078 {strides = array<i32>} : memref<20x8x128xf32, #tpu.memory_space<vmem>>, vector<1x8x128xf32>,
    %c11_102 = arith.constant 11 : index
    %c0_103 = arith.constant 0 : index
    %c0_104 = arith.constant 0 : index
    %1079 = vector.load %arg3[%c11_102, %c0_103, %c0_104] : memref<20x8x128xf32, #tpu.memory_space<vmem>>, vector<1x8x128xf32>
    %1080 = vector.shape_cast %1079 : vector<1x8x128xf32> to vector<8x128xf32>
    %1081 = vector.shape_cast %869 : vector<8x128xf32> to vector<1x8x128xf32>
    tpu.vector_store %arg3[%c11_102, %c0_103, %c0_104], %1081 {strides = array<i32>} : memref<20x8x128xf32, #tpu.memory_space<vmem>>, vector<1x8x128xf32>,
    %c12_105 = arith.constant 12 : index
    %c0_106 = arith.constant 0 : index
    %c0_107 = arith.constant 0 : index
    %1082 = vector.load %arg3[%c12_105, %c0_106, %c0_107] : memref<20x8x128xf32, #tpu.memory_space<vmem>>, vector<1x8x128xf32>
    %1083 = vector.shape_cast %1082 : vector<1x8x128xf32> to vector<8x128xf32>
    %1084 = vector.shape_cast %891 : vector<8x128xf32> to vector<1x8x128xf32>
    tpu.vector_store %arg3[%c12_105, %c0_106, %c0_107], %1084 {strides = array<i32>} : memref<20x8x128xf32, #tpu.memory_space<vmem>>, vector<1x8x128xf32>,
    %c13_108 = arith.constant 13 : index
    %c0_109 = arith.constant 0 : index
    %c0_110 = arith.constant 0 : index
    %1085 = vector.load %arg3[%c13_108, %c0_109, %c0_110] : memref<20x8x128xf32, #tpu.memory_space<vmem>>, vector<1x8x128xf32>
    %1086 = vector.shape_cast %1085 : vector<1x8x128xf32> to vector<8x128xf32>
    %1087 = vector.shape_cast %913 : vector<8x128xf32> to vector<1x8x128xf32>
    tpu.vector_store %arg3[%c13_108, %c0_109, %c0_110], %1087 {strides = array<i32>} : memref<20x8x128xf32, #tpu.memory_space<vmem>>, vector<1x8x128xf32>,
    %c14_111 = arith.constant 14 : index
    %c0_112 = arith.constant 0 : index
    %c0_113 = arith.constant 0 : index
    %1088 = vector.load %arg3[%c14_111, %c0_112, %c0_113] : memref<20x8x128xf32, #tpu.memory_space<vmem>>, vector<1x8x128xf32>
    %1089 = vector.shape_cast %1088 : vector<1x8x128xf32> to vector<8x128xf32>
    %1090 = vector.shape_cast %935 : vector<8x128xf32> to vector<1x8x128xf32>
    tpu.vector_store %arg3[%c14_111, %c0_112, %c0_113], %1090 {strides = array<i32>} : memref<20x8x128xf32, #tpu.memory_space<vmem>>, vector<1x8x128xf32>,
    %c15_114 = arith.constant 15 : index
    %c0_115 = arith.constant 0 : index
    %c0_116 = arith.constant 0 : index
    %1091 = vector.load %arg3[%c15_114, %c0_115, %c0_116] : memref<20x8x128xf32, #tpu.memory_space<vmem>>, vector<1x8x128xf32>
    %1092 = vector.shape_cast %1091 : vector<1x8x128xf32> to vector<8x128xf32>
    %1093 = vector.shape_cast %957 : vector<8x128xf32> to vector<1x8x128xf32>
    tpu.vector_store %arg3[%c15_114, %c0_115, %c0_116], %1093 {strides = array<i32>} : memref<20x8x128xf32, #tpu.memory_space<vmem>>, vector<1x8x128xf32>,
    %c16_117 = arith.constant 16 : index
    %c0_118 = arith.constant 0 : index
    %c0_119 = arith.constant 0 : index
    %1094 = vector.load %arg3[%c16_117, %c0_118, %c0_119] : memref<20x8x128xf32, #tpu.memory_space<vmem>>, vector<1x8x128xf32>
    %1095 = vector.shape_cast %1094 : vector<1x8x128xf32> to vector<8x128xf32>
    %1096 = vector.shape_cast %979 : vector<8x128xf32> to vector<1x8x128xf32>
    tpu.vector_store %arg3[%c16_117, %c0_118, %c0_119], %1096 {strides = array<i32>} : memref<20x8x128xf32, #tpu.memory_space<vmem>>, vector<1x8x128xf32>,
    %c17_120 = arith.constant 17 : index
    %c0_121 = arith.constant 0 : index
    %c0_122 = arith.constant 0 : index
    %1097 = vector.load %arg3[%c17_120, %c0_121, %c0_122] : memref<20x8x128xf32, #tpu.memory_space<vmem>>, vector<1x8x128xf32>
    %1098 = vector.shape_cast %1097 : vector<1x8x128xf32> to vector<8x128xf32>
    %1099 = vector.shape_cast %1001 : vector<8x128xf32> to vector<1x8x128xf32>
    tpu.vector_store %arg3[%c17_120, %c0_121, %c0_122], %1099 {strides = array<i32>} : memref<20x8x128xf32, #tpu.memory_space<vmem>>, vector<1x8x128xf32>,
    %c18_123 = arith.constant 18 : index
    %c0_124 = arith.constant 0 : index
    %c0_125 = arith.constant 0 : index
    %1100 = vector.load %arg3[%c18_123, %c0_124, %c0_125] : memref<20x8x128xf32, #tpu.memory_space<vmem>>, vector<1x8x128xf32>
    %1101 = vector.shape_cast %1100 : vector<1x8x128xf32> to vector<8x128xf32>
    %1102 = vector.shape_cast %1023 : vector<8x128xf32> to vector<1x8x128xf32>
    tpu.vector_store %arg3[%c18_123, %c0_124, %c0_125], %1102 {strides = array<i32>} : memref<20x8x128xf32, #tpu.memory_space<vmem>>, vector<1x8x128xf32>,
    %c19_126 = arith.constant 19 : index
    %c0_127 = arith.constant 0 : index
    %c0_128 = arith.constant 0 : index
    %1103 = vector.load %arg3[%c19_126, %c0_127, %c0_128] : memref<20x8x128xf32, #tpu.memory_space<vmem>>, vector<1x8x128xf32>
    %1104 = vector.shape_cast %1103 : vector<1x8x128xf32> to vector<8x128xf32>
    %1105 = vector.shape_cast %1045 : vector<8x128xf32> to vector<1x8x128xf32>
    tpu.vector_store %arg3[%c19_126, %c0_127, %c0_128], %1105 {strides = array<i32>} : memref<20x8x128xf32, #tpu.memory_space<vmem>>, vector<1x8x128xf32>,
    return
  }
  func.func @transform_0(%arg0: i32) -> i32 {
    %c0_i32 = arith.constant 0 : i32
    %c0_i32_0 = arith.constant 0 : i32
    return %c0_i32 : i32
  }
  func.func @transform_1(%arg0: i32) -> (i32, i32, i32) {
    %c0_i32 = arith.constant 0 : i32
    %c0_i32_0 = arith.constant 0 : i32
    %c0_i32_1 = arith.constant 0 : i32
    return %c0_i32, %arg0, %c0_i32_0 : i32, i32, i32
  }
  func.func @transform_2(%arg0: i32) -> (i32, i32, i32) {
    %c0_i32 = arith.constant 0 : i32
    %c0_i32_0 = arith.constant 0 : i32
    %c0_i32_1 = arith.constant 0 : i32
    return %c0_i32, %arg0, %c0_i32_0 : i32, i32, i32
  }
}

</mosaic_0001>

<bundles_post_ra>
// kernel: tpu_custom_call.1
= control target key start
LH: loop header
LB: loop body
LE: loop exit
PB: predicated region body
PF: predicated region fallthrough
CT: control target
= control target key end

     0   :  { %s2215_s0 = inlined_call_operand.hbm [shape: f32[263], index: 0, kind: input, shape index: {}]   ;;  %s2216_s1 = inlined_call_operand.hbm [shape: f32[20,8,128], index: 1, kind: input, shape index: {}]   ;;  %s2217_s2 = inlined_call_operand.hbm [shape: f32[20,8,128], index: 2, kind: output, shape index: {}]  }
   0x1   :  { %2220 = sst [smem:[#allocation15_spill]] %s2217_s2 }
   0x2   :  { %7 = vsyncpa [#allocation5], 0 }
   0x3   :  { %8 = vsyncpa [#allocation3], 0 }
   0x4   :  { %9 = vsyncpa [#allocation4], 0  ;;  %s1450_s9 = smov [#allocation2]   ;;  %s1451_s12 = smov [#allocation6]  }
   0x5   :  { %17 = dma.hbm_to_smem %s2215_s0, 48, %s1450_s9, [#allocation5]  }
   0x6   :  { %s23_s13 = sshll.u32 %s1451_s12, 4  ;;  %s24_s13 = int_to_ptr.vmem [resolvable:$true] %s23_s13 }
   0x7   :  { %s1412_s14 = scalar_lea.vmem %s24_s13, 2560  ;;  %p1417_p1 = scmp.lt.s32.totalorder %s24_s13, %s24_s13 }
   0x8   :  { %p1413_p0 = scmp.ne.s32.totalorder %s24_s13, %s1412_s14  ;;  %p1418_p2 = scmp.lt.s32.totalorder %s1412_s14, %s1412_s14 }
   0xa   :  { %p1419_p3 = por %p1418_p2, %p1417_p1 }
   0xc   :  { %p1420_p4 = pnand %p1419_p3, %p1413_p0 }
   0xe   :  { %1423 = shalt.err (!%p1420_p4)
}
   0xf   :  { %s2218_s15 = smov 128   ;;  %s2219_s16 = smov 8  }
  0x10   :  { %29 = dma.hbm_to_vmem [thread:$0]  %s2216_s1, 2560, %s24_s13, [#allocation3], %s2218_s15, %s2218_s15, %s2219_s16  }
  0x11   :  { %1444 = dma.done.wait [#allocation5], 48  }
  0x12   :  { %1445 = vsyncadd [#allocation5], 4294967248 }
  0x13   :  { %1446 = dma.done.wait [#allocation3], 2560  }
  0x14   :  { %1447 = vsyncadd [#allocation3], 4294964736 }
  0x15   :  { %36 = sfence }
  0x16   :  { %s76_s0 = sld [smem:[#allocation2]]  ;;  %v1505_v0 = vld [vmem:[#allocation6] sm:$0xff]  ;;  %v1507_v1 = vld [vmem:[#allocation6 + $0x8] sm:$0xff]  ;;  %v1519_v6 = vld [vmem:[#allocation6 + $0x10] sm:$0xff] }
  0x17   :  { %s1129_s19 = sld [smem:[#allocation2 + $0x1]]  ;;  %v1524_v10 = vld [vmem:[#allocation6 + $0x18] sm:$0xff]  ;;  %v1536_v15 = vld [vmem:[#allocation6 + $0x20] sm:$0xff]  ;;  %v1550_v23 = vld [vmem:[#allocation6 + $0x28] sm:$0xff] }
  0x18   :  { %s1130_s20 = sld [smem:[#allocation2 + $0x2]]  ;;  %v1564_v30 = vld [vmem:[#allocation6 + $0x30] sm:$0xff]  ;;  %v1578_v37 = vld [vmem:[#allocation6 + $0x38] sm:$0xff]  ;;  %v1588_v44 = vld [vmem:[#allocation6 + $0x40] sm:$0xff] }
  0x19   :  { %s1479_s21 = sld [smem:[#allocation2 + $0x3]]  ;;  %v1598_v51 = vld [vmem:[#allocation6 + $0x48] sm:$0xff] }
  0x1a   :  { %s1481_s22 = sld [smem:[#allocation2 + $0x4]] }
  0x1b   :  { %s1483_s23 = sld [smem:[#allocation2 + $0x5]] }
  0x1c   :  { %s1485_s24 = sld [smem:[#allocation2 + $0x6]]  ;;  %v77_v2 = vstv %s76_s0 }
  0x1d   :  { %s1487_s25 = sld [smem:[#allocation2 + $0x7]]  ;;  %v80_v3 = vstv %s1129_s19  ;;  %v78_v4 = vmul.f32 %v77_v2, %v1505_v0 }
  0x1e   :  { %s1489_s26 = sld [smem:[#allocation2 + $0x8]]  ;;  %v81_v5 = vmul.f32 %v80_v3, %v1507_v1  ;;  %v84_v7 = vstv %s1130_s20  ;;  %v1615_v3 = vld [vmem:[#allocation6 + $0x50] sm:$0xff] }
  0x1f   :  { %s1491_s1 = sld [smem:[#allocation2 + $0x9]]  ;;  %v85_v9 = vmul.f32 %v84_v7, %v1519_v6  ;;  %v88_v11 = vstv %s1479_s21 }
  0x20   :  { %s1493_s27 = sld [smem:[#allocation2 + $0xa]]  ;;  %v82_v8 = vadd.f32 %v81_v5, %v78_v4  ;;  %v89_v13 = vmul.f32 %v88_v11, %v1524_v10  ;;  %v92_v16 = vstv %s1481_s22 }
  0x21   :  { %s1495_s28 = sld [smem:[#allocation2 + $0xb]]  ;;  %v93_v22 = vmul.f32 %v92_v16, %v1536_v15  ;;  %v96_v24 = vstv %s1483_s23 }
  0x22   :  { %s1497_s29 = sld [smem:[#allocation2 + $0xc]]  ;;  %v86_v12 = vadd.f32 %v85_v9, %v82_v8  ;;  %v97_v29 = vmul.f32 %v96_v24, %v1550_v23  ;;  %v100_v31 = vstv %s1485_s24 }
  0x23   :  { %s1499_s30 = sld [smem:[#allocation2 + $0xd]]  ;;  %v101_v36 = vmul.f32 %v100_v31, %v1564_v30  ;;  %v104_v38 = vstv %s1487_s25 }
  0x24   :  { %s1501_s3 = sld [smem:[#allocation2 + $0xe]]  ;;  %v90_v21 = vadd.f32 %v89_v13, %v86_v12  ;;  %v105_v43 = vmul.f32 %v104_v38, %v1578_v37  ;;  %v108_v45 = vstv %s1489_s26 }
  0x25   :  { %s1503_s4 = sld [smem:[#allocation2 + $0xf]]  ;;  %v109_v50 = vmul.f32 %v108_v45, %v1588_v44  ;;  %v112_v52 = vstv %s1491_s1 }
  0x26   :  { %s1509_s5 = sld [smem:[#allocation2 + $0x10]]  ;;  %v94_v28 = vadd.f32 %v93_v22, %v90_v21  ;;  %v113_v62 = vmul.f32 %v112_v52, %v1598_v51  ;;  %v116_v4 = vstv %s1493_s27 }
  0x27   :  { %s1511_s6 = sld [smem:[#allocation2 + $0x11]]  ;;  %v120_v21 = vstv %s1495_s28 }
  0x28   :  { %s1513_s7 = sld [smem:[#allocation2 + $0x12]]  ;;  %v98_v35 = vadd.f32 %v97_v29, %v94_v28 }
  0x29   :  { %s1517_s8 = sld [smem:[#allocation2 + $0x13]] }
  0x2a   :  { %s1521_s9 = sld [smem:[#allocation2 + $0x64]]  ;;  %v102_v42 = vadd.f32 %v101_v36, %v98_v35  ;;  %v1652_v35 = vld [vmem:[#allocation6 + $0x60] sm:$0xff]  ;;  %v124_v36 = vstv %s1497_s29 }
  0x2b   :  { %s1149_s10 = sld [smem:[#allocation2 + $0x14]] }
  0x2c   :  { %s1150_s11 = sld [smem:[#allocation2 + $0x15]]  ;;  %v106_v49 = vadd.f32 %v105_v43, %v102_v42 }
  0x2d   :  { %s1151_s12 = sld [smem:[#allocation2 + $0x16]] }
  0x2e   :  { %s1527_s13 = sld [smem:[#allocation2 + $0x17]]  ;;  %v110_v61 = vadd.f32 %v109_v50, %v106_v49  ;;  %v1667_v49 = vld [vmem:[#allocation6 + $0x68] sm:$0xff]  ;;  %v128_v50 = vstv %s1499_s30 }
  0x2f   :  { %s1529_s14 = sld [smem:[#allocation2 + $0x18]] }
  0x30   :  { %2221 = sst [smem:[#allocation11_spill]] %s1521_s9 }
  0x31   :  { %s1531_s17 = sld [smem:[#allocation2 + $0x19]]  ;;  %v160_v14 = vstv %s1149_s10 }
  0x32   :  { %s1534_s18 = sld [smem:[#allocation2 + $0x1a]]  ;;  %v163_v17 = vstv %s1150_s11  ;;  %v161_v18 = vmul.f32 %v160_v14, %v1505_v0 }
  0x33   :  { %s1539_s0 = sld [smem:[#allocation2 + $0x1b]]  ;;  %v164_v19 = vmul.f32 %v163_v17, %v1507_v1  ;;  %v167_v20 = vstv %s1151_s12  ;;  %v114_v17 = vadd.f32 %v113_v62, %v110_v61  ;;  %v129_v61 = vmul.f32 %v128_v50, %v1667_v49 }
  0x34   :  { %s1543_s19 = sld [smem:[#allocation2 + $0x1c]]  ;;  %v168_v26 = vmul.f32 %v167_v20, %v1519_v6  ;;  %v171_v27 = vstv %s1527_s13  ;;  %v1634_v20 = vld [vmem:[#allocation6 + $0x58] sm:$0xff] }
  0x35   :  { %s1545_s20 = sld [smem:[#allocation2 + $0x1d]]  ;;  %v165_v25 = vadd.f32 %v164_v19, %v161_v18  ;;  %v172_v33 = vmul.f32 %v171_v27, %v1524_v10  ;;  %v175_v34 = vstv %s1529_s14  ;;  %v117_v18 = vmul.f32 %v116_v4, %v1615_v3 }
  0x36   :  { %s1548_s21 = sld [smem:[#allocation2 + $0x1e]]  ;;  %v176_v40 = vmul.f32 %v175_v34, %v1536_v15 }
  0x37   :  { %s1553_s22 = sld [smem:[#allocation2 + $0x1f]]  ;;  %v169_v32 = vadd.f32 %v168_v26, %v165_v25  ;;  %v179_v41 = vstv %s1531_s17 }
  0x38   :  { %s1556_s10 = sld [smem:[#allocation2 + $0x20]]  ;;  %v180_v47 = vmul.f32 %v179_v41, %v1550_v23  ;;  %v183_v48 = vstv %s1534_s18 }
  0x39   :  { %s1559_s11 = sld [smem:[#allocation2 + $0x21]]  ;;  %v173_v39 = vadd.f32 %v172_v33, %v169_v32  ;;  %v184_v55 = vmul.f32 %v183_v48, %v1564_v30  ;;  %v187_v58 = vstv %s1539_s0  ;;  %v118_v32 = vadd.f32 %v117_v18, %v114_v17 }
  0x3a   :  { %s1562_s12 = sld [smem:[#allocation2 + $0x22]]  ;;  %v188_v11 = vmul.f32 %v187_v58, %v1578_v37  ;;  %v191_v13 = vstv %s1543_s19  ;;  %v121_v33 = vmul.f32 %v120_v21, %v1634_v20 }
  0x3b   :  { %s1567_s23 = sld [smem:[#allocation2 + $0x23]]  ;;  %v177_v46 = vadd.f32 %v176_v40, %v173_v39  ;;  %v192_v26 = vmul.f32 %v191_v13, %v1588_v44  ;;  %v195_v28 = vstv %s1545_s20 }
  0x3c   :  { %s1570_s15 = sld [smem:[#allocation2 + $0x24]]  ;;  %v196_v41 = vmul.f32 %v195_v28, %v1598_v51  ;;  %v199_v42 = vstv %s1548_s21 }
  0x3d   :  { %s1573_s13 = sld [smem:[#allocation2 + $0x25]]  ;;  %v181_v54 = vadd.f32 %v180_v47, %v177_v46  ;;  %v122_v46 = vadd.f32 %v121_v33, %v118_v32  ;;  %v125_v47 = vmul.f32 %v124_v36, %v1652_v35  ;;  %v1721_v36 = vld [vmem:[#allocation6 + $0x80] sm:$0xff] }
  0x3e   :  { %s1576_s16 = sld [smem:[#allocation2 + $0x26]] }
  0x3f   :  { %s1581_s24 = sld [smem:[#allocation2 + $0x27]]  ;;  %v185_v9 = vadd.f32 %v184_v55, %v181_v54  ;;  %v132_v54 = vstv %s1501_s3 }
  0x40   :  { %s1584_s2 = sld [smem:[#allocation2 + $0x65]]  ;;  %v215_v50 = vstv %s1562_s12 }
  0x41   :  { %s1170_s14 = sld [smem:[#allocation2 + $0x28]]  ;;  %v189_v25 = vadd.f32 %v188_v11, %v185_v9 }
  0x42   :  { %s1171_s9 = sld [smem:[#allocation2 + $0x29]] }
  0x43   :  { %s1173_s25 = sld [smem:[#allocation2 + $0x2b]]  ;;  %v193_v40 = vadd.f32 %v192_v26, %v189_v25 }
  0x44   :  { %2222 = sst [smem:[#allocation12_spill]] %s1576_s16 }
  0x45   :  { %2223 = sst [smem:[#allocation13_spill]] %s1581_s24  ;;  %v197_v55 = vadd.f32 %v196_v41, %v193_v40 }
  0x46   :  { %2224 = sst [smem:[#allocation14_spill]] %s1584_s2 }
  0x47   :  { %s1172_s16 = sld [smem:[#allocation2 + $0x2a]]  ;;  %v243_v53 = vstv %s1170_s14 }
  0x48   :  { %s1593_s24 = sld [smem:[#allocation2 + $0x2c]]  ;;  %v244_v56 = vmul.f32 %v243_v53, %v1505_v0  ;;  %v246_v57 = vstv %s1171_s9  ;;  %v1672_v53 = vld [vmem:[#allocation6 + $0x70] sm:$0xff] }
  0x49   :  { %s1596_s17 = sld [smem:[#allocation2 + $0x2d]]  ;;  %v247_v59 = vmul.f32 %v246_v57, %v1507_v1  ;;  %v254_v2 = vstv %s1173_s25  ;;  %v203_v57 = vstv %s1553_s22 }
  0x4a   :  { %s1601_s2 = sld [smem:[#allocation2 + $0x2e]]  ;;  %v255_v7 = vmul.f32 %v254_v2, %v1524_v10  ;;  %v136_v2 = vstv %s1503_s4 }
  0x4b   :  { %s1605_s26 = sld [smem:[#allocation2 + $0x2f]]  ;;  %v248_v5 = vadd.f32 %v247_v59, %v244_v56  ;;  %v200_v56 = vmul.f32 %v199_v42, %v1615_v3 }
  0x4c   :  { %s1609_s18 = sld [smem:[#allocation2 + $0x30]] }
  0x4d   :  { %v250_v60 = vstv %s1172_s16  ;;  %s1613_s1 = sld [smem:[#allocation2 + $0x31]]  ;;  %v201_v4 = vadd.f32 %v200_v56, %v197_v55 }
  0x4e   :  { %v251_v63 = vmul.f32 %v250_v60, %v1519_v6  ;;  %v258_v8 = vstv %s1593_s24  ;;  %s1620_s16 = sld [smem:[#allocation2 + $0x32]]  ;;  %v126_v60 = vadd.f32 %v125_v47, %v122_v46  ;;  %v1733_v47 = vld [vmem:[#allocation6 + $0x88] sm:$0xff] }
  0x4f   :  { %v262_v12 = vstv %s1596_s17  ;;  %s1624_s9 = sld [smem:[#allocation2 + $0x33]]  ;;  %v259_v16 = vmul.f32 %v258_v8, %v1536_v15 }
  0x50   :  { %v252_v14 = vadd.f32 %v251_v63, %v248_v5  ;;  %s1628_s27 = sld [smem:[#allocation2 + $0x34]]  ;;  %v266_v19 = vstv %s1601_s2  ;;  %v263_v24 = vmul.f32 %v262_v12, %v1550_v23  ;;  %v133_v63 = vmul.f32 %v132_v54, %v1672_v53 }
  0x51   :  { %s1632_s0 = sld [smem:[#allocation2 + $0x35]]  ;;  %v270_v27 = vstv %s1605_s26  ;;  %v267_v31 = vmul.f32 %v266_v19, %v1564_v30  ;;  %v204_v5 = vmul.f32 %v203_v57, %v1634_v20 }
  0x52   :  { %v256_v22 = vadd.f32 %v255_v7, %v252_v14  ;;  %s1638_s19 = sld [smem:[#allocation2 + $0x36]]  ;;  %v274_v34 = vstv %s1609_s18  ;;  %v271_v39 = vmul.f32 %v270_v27, %v1578_v37  ;;  %v207_v7 = vstv %s1556_s10  ;;  %v1699_v14 = vld [vmem:[#allocation6 + $0x78] sm:$0xff] }
  0x53   :  { %s1642_s24 = sld [smem:[#allocation2 + $0x37]]  ;;  %v275_v45 = vmul.f32 %v274_v34, %v1588_v44  ;;  %v278_v48 = vstv %s1613_s1  ;;  %v208_v21 = vmul.f32 %v207_v7, %v1652_v35  ;;  %v205_v26 = vadd.f32 %v204_v5, %v201_v4 }
  0x54   :  { %v260_v29 = vadd.f32 %v259_v16, %v256_v22  ;;  %s1646_s2 = sld [smem:[#allocation2 + $0x38]]  ;;  %v279_v59 = vmul.f32 %v278_v48, %v1598_v51  ;;  %v282_v62 = vstv %s1620_s16  ;;  %v130_v16 = vadd.f32 %v129_v61, %v126_v60 }
  0x55   :  { %s1650_s28 = sld [smem:[#allocation2 + $0x39]]  ;;  %v283_v11 = vmul.f32 %v282_v62, %v1615_v3  ;;  %v286_v17 = vstv %s1624_s9  ;;  %v211_v22 = vstv %s1559_s11  ;;  %v209_v48 = vadd.f32 %v208_v21, %v205_v26 }
  0x56   :  { %v264_v38 = vadd.f32 %v263_v24, %v260_v29  ;;  %s1656_s20 = sld [smem:[#allocation2 + $0x3a]]  ;;  %v287_v33 = vmul.f32 %v286_v17, %v1634_v20  ;;  %v134_v42 = vadd.f32 %v133_v63, %v130_v16  ;;  %v148_v60 = vstv %s1513_s7 }
  0x57   :  { %s1659_s14 = sld [smem:[#allocation2 + $0x3b]]  ;;  %v294_v61 = vstv %s1632_s0  ;;  %v216_v5 = vmul.f32 %v215_v50, %v1672_v53 }
  0x58   :  { %v268_v43 = vadd.f32 %v267_v31, %v264_v38  ;;  %s1663_s25 = sld [smem:[#allocation2 + $0x66]]  ;;  %v137_v31 = vmul.f32 %v136_v2, %v1699_v14  ;;  %v140_v38 = vstv %s1509_s5  ;;  %v295_v17 = vmul.f32 %v294_v61, %v1667_v49 }
  0x59   :  { %s1191_s29 = sld [smem:[#allocation2 + $0x3c]]  ;;  %v141_v55 = vmul.f32 %v140_v38, %v1721_v36  ;;  %v298_v21 = vstv %s1638_s19 }
  0x5a   :  { %v272_v52 = vadd.f32 %v271_v39, %v268_v43  ;;  %s1670_s17 = sld [smem:[#allocation2 + $0x3d]]  ;;  %v290_v39 = vstv %s1628_s27  ;;  %v144_v43 = vstv %s1511_s6  ;;  %v138_v2 = vadd.f32 %v137_v31, %v134_v42 }
  0x5b   :  { %s1676_s21 = sld [smem:[#allocation2 + $0x3e]]  ;;  %v291_v57 = vmul.f32 %v290_v39, %v1652_v35  ;;  %v145_v4 = vmul.f32 %v144_v43, %v1733_v47  ;;  %v299_v39 = vmul.f32 %v298_v21, %v1672_v53  ;;  %v306_v43 = vstv %s1646_s2 }
  0x5c   :  { %v276_v58 = vadd.f32 %v275_v45, %v272_v52  ;;  %s1680_s26 = sld [smem:[#allocation2 + $0x3f]]  ;;  %v212_v45 = vmul.f32 %v211_v22, %v1667_v49  ;;  %v142_v26 = vadd.f32 %v141_v55, %v138_v2  ;;  %v307_v61 = vmul.f32 %v306_v43, %v1721_v36 }
  0x5d   :  { %s1684_s30 = sld [smem:[#allocation2 + $0x40]] }
  0x5e   :  { %s1688_s3 = sld [smem:[#allocation2 + $0x41]]  ;;  %v280_v9 = vadd.f32 %v279_v59, %v276_v58  ;;  %v1744_v59 = vld [vmem:[#allocation6 + $0x90] sm:$0xff] }
  0x5f   :  { %v326_v8 = vstv %s1191_s29  ;;  %s1692_s22 = sld [smem:[#allocation2 + $0x42]] }
  0x60   :  { %v327_v12 = vmul.f32 %v326_v8, %v1505_v0  ;;  %v329_v13 = vstv %s1670_s17  ;;  %s1697_s4 = sld [smem:[#allocation2 + $0x43]]  ;;  %v284_v32 = vadd.f32 %v283_v11, %v280_v9  ;;  %v213_v8 = vadd.f32 %v212_v45, %v209_v48 }
  0x61   :  { %v330_v18 = vmul.f32 %v329_v13, %v1507_v1  ;;  %v333_v19 = vstv %s1676_s21  ;;  %s1704_s10 = sld [smem:[#allocation2 + $0x44]]  ;;  %v219_v9 = vstv %s1567_s23  ;;  %v1761_v13 = vmul.f32 %v148_v60, %v1744_v59 }
  0x62   :  { %v334_v24 = vmul.f32 %v333_v19, %v1519_v6  ;;  %v337_v25 = vstv %s1680_s26  ;;  %s1710_s18 = sld [smem:[#allocation2 + $0x45]]  ;;  %v288_v56 = vadd.f32 %v287_v33, %v284_v32  ;;  %v152_v19 = vstv %s1517_s8 }
  0x63   :  { %v331_v27 = vadd.f32 %v330_v18, %v327_v12  ;;  %v338_v28 = vmul.f32 %v337_v25, %v1524_v10  ;;  %v341_v29 = vstv %s1684_s30  ;;  %s1714_s1 = sld [smem:[#allocation2 + $0x46]]  ;;  %v1772_v25 = vld [vmem:[#allocation6 + $0x98] sm:$0xff]  ;;  %v217_v31 = vadd.f32 %v216_v5, %v213_v8 }
  0x64   :  { %v345_v34 = vstv %s1688_s3  ;;  %s1719_s11 = sld [smem:[#allocation2 + $0x47]]  ;;  %v342_v41 = vmul.f32 %v341_v29, %v1536_v15  ;;  %v292_v16 = vadd.f32 %v291_v57, %v288_v56  ;;  %v227_v32 = vstv %s1573_s13 }
  0x65   :  { %v335_v40 = vadd.f32 %v334_v24, %v331_v27  ;;  %s1726_s16 = sld [smem:[#allocation2 + $0x48]]  ;;  %v349_v46 = vstv %s1692_s22  ;;  %v346_v54 = vmul.f32 %v345_v34, %v1550_v23  ;;  %v220_v27 = vmul.f32 %v219_v9, %v1699_v14 }
  0x66   :  { %s1731_s9 = sld [smem:[#allocation2 + $0x49]]  ;;  %v353_v58 = vstv %s1697_s4  ;;  %v350_v63 = vmul.f32 %v349_v46, %v1564_v30  ;;  %v296_v38 = vadd.f32 %v295_v17, %v292_v16  ;;  %v1789_v42 = vmul.f32 %v152_v19, %v1772_v25 }
  0x67   :  { %v339_v52 = vadd.f32 %v338_v28, %v335_v40  ;;  %s1737_s5 = sld [smem:[#allocation2 + $0x4a]]  ;;  %v357_v7 = vstv %s1704_s10  ;;  %v354_v12 = vmul.f32 %v353_v58, %v1578_v37  ;;  %v223_v28 = vstv %s1570_s15 }
  0x68   :  { %s1742_s6 = sld [smem:[#allocation2 + $0x4b]]  ;;  %v361_v18 = vstv %s1710_s18  ;;  %v358_v24 = vmul.f32 %v357_v7, %v1588_v44  ;;  %v302_v40 = vstv %s1642_s24  ;;  %v1795_v48 = vadd.f32 %v145_v4, %v142_v26 }
  0x69   :  { %v343_v62 = vadd.f32 %v342_v41, %v339_v52  ;;  %s1749_s12 = sld [smem:[#allocation2 + $0x4c]]  ;;  %v365_v29 = vstv %s1714_s1  ;;  %v362_v34 = vmul.f32 %v361_v18, %v1598_v51  ;;  %v224_v50 = vmul.f32 %v223_v28, %v1721_v36 }
  0x6a   :  { %s1754_s27 = sld [smem:[#allocation2 + $0x4d]]  ;;  %v369_v41 = vstv %s1719_s11  ;;  %v366_v46 = vmul.f32 %v365_v29, %v1615_v3  ;;  %v1799_v52 = vmul.f32 %v227_v32, %v1733_v47  ;;  %v221_v55 = vadd.f32 %v220_v27, %v217_v31 }
  0x6b   :  { %v347_v11 = vadd.f32 %v346_v54, %v343_v62  ;;  %s1758_s7 = sld [smem:[#allocation2 + $0x4e]]  ;;  %v373_v54 = vstv %s1726_s16  ;;  %v303_v56 = vmul.f32 %v302_v40, %v1699_v14  ;;  %v370_v58 = vmul.f32 %v369_v41, %v1634_v20 }
  0x6c   :  { %s1765_s0 = sld [smem:[#allocation2 + $0x4f]]  ;;  %v300_v60 = vadd.f32 %v299_v39, %v296_v38  ;;  %v377_v62 = vstv %s1731_s9  ;;  %v374_v4 = vmul.f32 %v373_v54, %v1652_v35  ;;  %v310_v8 = vstv %s1650_s28 }
  0x6d   :  { %v351_v22 = vadd.f32 %v350_v63, %v347_v11  ;;  %s1770_s23 = sld [smem:[#allocation2 + $0x67]]  ;;  %v381_v9 = vstv %s1737_s5  ;;  %v378_v17 = vmul.f32 %v377_v62, %v1667_v49  ;;  %v311_v39 = vmul.f32 %v310_v8, %v1733_v47 }
  0x6e   :  { %s1777_s29 = sld [smem:[#allocation2 + $0x50]]  ;;  %v385_v19 = vstv %s1742_s6  ;;  %v382_v27 = vmul.f32 %v381_v9, %v1672_v53  ;;  %v314_v40 = vstv %s1656_s20  ;;  %v150_v8 = vadd.f32 %v1761_v13, %v1795_v48 }
  0x6f   :  { %v355_v33 = vadd.f32 %v354_v12, %v351_v22  ;;  %s1781_s8 = sld [smem:[#allocation2 + $0x51]]  ;;  %v389_v29 = vstv %s1749_s12  ;;  %v315_v62 = vmul.f32 %v314_v40, %v1744_v59 }
  0x70   :  { %s1786_s19 = sld [smem:[#allocation2 + $0x52]] }
  0x71   :  { %v359_v45 = vadd.f32 %v358_v24, %v355_v33  ;;  %s1793_s15 = sld [smem:[#allocation2 + $0x53]]  ;;  %v304_v24 = vadd.f32 %v303_v56, %v300_v60  ;;  %v397_v9 = vstv %s1758_s7 }
  0x72   :  { %s1802_s13 = sld [smem:[#allocation2 + $0x54]] }
  0x73   :  { %v363_v57 = vadd.f32 %v362_v34, %v359_v45  ;;  %s1806_s24 = sld [smem:[#allocation2 + $0x55]]  ;;  %v386_v34 = vmul.f32 %v385_v19, %v1699_v14  ;;  %v398_v19 = vmul.f32 %v397_v9, %v1744_v59 }
  0x74   :  { %v409_v63 = vstv %s1777_s29  ;;  %s1811_s2 = sld [smem:[#allocation2 + $0x56]] }
  0x75   :  { %v367_v2 = vadd.f32 %v366_v46, %v363_v57  ;;  %v410_v5 = vmul.f32 %v409_v63, %v1505_v0  ;;  %v412_v7 = vstv %s1781_s8  ;;  %s1816_s17 = sld [smem:[#allocation2 + $0x57]]  ;;  %v390_v46 = vmul.f32 %v389_v29, %v1721_v36 }
  0x76   :  { %v413_v11 = vmul.f32 %v412_v7, %v1507_v1  ;;  %v416_v12 = vstv %s1786_s19  ;;  %s1822_s21 = sld [smem:[#allocation2 + $0x58]]  ;;  %v318_v63 = vstv %s1659_s14 }
  0x77   :  { %s2225_s26 = sld [smem:[#allocation12_spill]]  ;;  %v371_v16 = vadd.f32 %v370_v58, %v367_v2  ;;  %v417_v18 = vmul.f32 %v416_v12, %v1519_v6  ;;  %v420_v0 = vstv %s1793_s15 }
  0x78   :  { %s1827_s30 = sld [smem:[#allocation2 + $0x59]]  ;;  %v414_v21 = vadd.f32 %v413_v11, %v410_v5  ;;  %v421_v22 = vmul.f32 %v420_v0, %v1524_v10  ;;  %v424_v1 = vstv %s1802_s13  ;;  %v225_v10 = vadd.f32 %v224_v50, %v221_v55 }
  0x79   :  { %s1832_s28 = sld [smem:[#allocation2 + $0x5a]]  ;;  %v375_v26 = vadd.f32 %v374_v4, %v371_v16  ;;  %v428_v28 = vstv %s1806_s24  ;;  %v425_v32 = vmul.f32 %v424_v1, %v1536_v15  ;;  %v308_v15 = vadd.f32 %v307_v61, %v304_v24 }
  0x7a   :  { %s1836_s3 = sld [smem:[#allocation2 + $0x5b]]  ;;  %v418_v31 = vadd.f32 %v417_v18, %v414_v21  ;;  %v432_v38 = vstv %s1811_s2  ;;  %v429_v43 = vmul.f32 %v428_v28, %v1550_v23  ;;  %v393_v55 = vstv %s1754_s27 }
  0x7b   :  { %s1841_s22 = sld [smem:[#allocation2 + $0x5c]]  ;;  %v379_v33 = vadd.f32 %v378_v17, %v375_v26  ;;  %v436_v50 = vstv %s1816_s17  ;;  %v433_v57 = vmul.f32 %v432_v38, %v1564_v30  ;;  %v229_v23 = vadd.f32 %v1799_v52, %v225_v10 }
  0x7c   :  { %s1845_s4 = sld [smem:[#allocation2 + $0x5d]]  ;;  %v422_v41 = vadd.f32 %v421_v22, %v418_v31  ;;  %v440_v61 = vstv %s1822_s21  ;;  %v437_v4 = vmul.f32 %v436_v50, %v1578_v37  ;;  %v312_v30 = vadd.f32 %v311_v39, %v308_v15 }
  0x7d   :  { %v231_v6 = vstv %s2225_s26  ;;  %s2226_s10 = sld [smem:[#allocation13_spill]]  ;;  %v383_v45 = vadd.f32 %v382_v27, %v379_v33  ;;  %v394_v7 = vmul.f32 %v393_v55, %v1733_v47  ;;  %v441_v12 = vmul.f32 %v440_v61, %v1588_v44 }
  0x7e   :  { %s1850_s18 = sld [smem:[#allocation2 + $0x5e]]  ;;  %v232_v54 = vmul.f32 %v231_v6, %v1744_v59  ;;  %v426_v56 = vadd.f32 %v425_v32, %v422_v41  ;;  %v444_v52 = vstv %s1827_s30  ;;  %v319_v18 = vmul.f32 %v318_v63, %v1772_v25 }
  0x7f   :  { %s1854_s1 = sld [smem:[#allocation2 + $0x5f]]  ;;  %v387_v60 = vadd.f32 %v386_v34, %v383_v45  ;;  %v448_v17 = vstv %s1832_s28  ;;  %v445_v13 = vmul.f32 %v444_v52, %v1598_v51  ;;  %v316_v44 = vadd.f32 %v315_v62, %v312_v30 }
  0x80   :  { %s1859_s20 = sld [smem:[#allocation2 + $0x60]]  ;;  %v430_v2 = vadd.f32 %v429_v43, %v426_v56  ;;  %v233_v37 = vadd.f32 %v232_v54, %v229_v23  ;;  %v452_v21 = vstv %s1836_s3  ;;  %v154_v22 = vadd.f32 %v1789_v42, %v150_v8 }
  0x81   :  { %s1864_s11 = sld [smem:[#allocation2 + $0x61]]  ;;  %v391_v5 = vadd.f32 %v390_v46, %v387_v60  ;;  %v401_v1 = vstv %s1765_s0  ;;  %v449_v26 = vmul.f32 %v448_v17, %v1615_v3  ;;  %v456_v28 = vstv %s1841_s22 }
  0x82   :  { %s1869_s16 = sld [smem:[#allocation2 + $0x62]]  ;;  %v434_v11 = vadd.f32 %v433_v57, %v430_v2  ;;  %v453_v31 = vmul.f32 %v452_v21, %v1634_v20  ;;  %v320_v42 = vadd.f32 %v319_v18, %v316_v44  ;;  %v402_v3 = vmul.f32 %v401_v1, %v1772_v25 }
  0x83   :  { %v235_v58 = vstv %s2226_s10  ;;  %s1873_s9 = sld [smem:[#allocation2 + $0x63]]  ;;  %v395_v48 = vadd.f32 %v394_v7, %v391_v5  ;;  %v460_v10 = vstv %s1845_s4  ;;  %v322_v34 = vstv %s1663_s25 }
  0x84   :  { %s1879_s14 = sld [smem:[#allocation2 + $0x68]]  ;;  %v236_v16 = vmul.f32 %v235_v58, %v1772_v25  ;;  %v438_v0 = vadd.f32 %v437_v4, %v434_v11  ;;  %v457_v39 = vmul.f32 %v456_v28, %v1652_v35  ;;  %v464_v20 = vstv %s1850_s18 }
  0x85   :  { %s2227_s5 = sld [smem:[#allocation11_spill]]  ;;  %v399_v32 = vadd.f32 %v398_v19, %v395_v48  ;;  %v461_v43 = vmul.f32 %v460_v10, %v1667_v49  ;;  %v468_v15 = vstv %s1854_s1  ;;  %v323_v45 = vadd.f32 %v322_v34, %v320_v42 }
  0x86   :  { %s1883_s6 = sld [smem:[#allocation2 + $0x69]]  ;;  %v442_v24 = vadd.f32 %v441_v12, %v438_v0  ;;  %v237_v27 = vadd.f32 %v236_v16, %v233_v37  ;;  %v405_v50 = vstv %s1770_s23  ;;  %v465_v55 = vmul.f32 %v464_v20, %v1672_v53 }
  0x87   :  { %s2228_s12 = sld [smem:[#allocation14_spill]]  ;;  %v403_v46 = vadd.f32 %v402_v3, %v399_v32  ;;  %v469_v56 = vmul.f32 %v468_v15, %v1699_v14  ;;  %v472_v57 = vstv %s1859_s20  ;;  %v476_v23 = vstv %s1864_s11 }
  0x88   :  { %s1887_s27 = sld [smem:[#allocation2 + $0x6a]]  ;;  %v446_v29 = vadd.f32 %v445_v13, %v442_v24  ;;  %v480_v60 = vstv %s1869_s16  ;;  %v324_v63 = vmax.f32 %v323_v45, 0.0  ;;  %v473_v30 = vmul.f32 %v472_v57, %v1721_v36 }
  0x89   :  { %s1891_s7 = sld [smem:[#allocation2 + $0x6b]]  ;;  %v406_v2 = vadd.f32 %v405_v50, %v403_v46  ;;  %v484_v5 = vstv %s1873_s9  ;;  %v477_v52 = vmul.f32 %v476_v23, %v1733_v47  ;;  %v481_v8 = vmul.f32 %v480_v60, %v1744_v59 }
  0x8a   :  { %s1896_s29 = sld [smem:[#allocation2 + $0x6c]]  ;;  %v450_v38 = vadd.f32 %v449_v26, %v446_v29  ;;  %v485_v18 = vmul.f32 %v484_v5, %v1772_v25  ;;  %v488_v29 = vstv %s1879_s14 }
  0x8b   :  { %v156_v51 = vstv %s2227_s5  ;;  %s1900_s8 = sld [smem:[#allocation2 + $0x6d]]  ;;  %v407_v17 = vmax.f32 %v406_v2, 0.0 }
  0x8c   :  { %s1904_s19 = sld [smem:[#allocation2 + $0x78]]  ;;  %v157_v33 = vadd.f32 %v156_v51, %v154_v22  ;;  %v454_v41 = vadd.f32 %v453_v31, %v450_v38  ;;  %v492_v61 = vstv %s1883_s6 }
  0x8d   :  { %v239_v6 = vstv %s2228_s12  ;;  %s1908_s0 = sld [smem:[#allocation2 + $0x6e]] }
  0x8e   :  { %s1912_s15 = sld [smem:[#allocation2 + $0x6f]]  ;;  %v240_v40 = vadd.f32 %v239_v6, %v237_v27  ;;  %v158_v35 = vmax.f32 %v157_v33, 0.0  ;;  %v458_v54 = vadd.f32 %v457_v39, %v454_v41  ;;  %v495_v62 = vstv %s1887_s27 }
  0x8f   :  { %s1915_s13 = sld [smem:[#allocation2 + $0x70]]  ;;  %v499_v7 = vstv %s1891_s7 }
  0x90   :  { %s1919_s24 = sld [smem:[#allocation2 + $0x71]]  ;;  %v241_v49 = vmax.f32 %v240_v40, 0.0  ;;  %v462_v58 = vadd.f32 %v461_v43, %v458_v54  ;;  %v493_v9 = vmul.f32 %v492_v61, %v158_v35  ;;  %v500_v47 = vmul.f32 %v499_v7, %v324_v63 }
  0x91   :  { %s1921_s25 = sld [smem:[#allocation2 + $0x72]]  ;;  %v503_v13 = vstv %s1896_s29  ;;  %v507_v39 = vstv %s1900_s8 }
  0x92   :  { %s1925_s2 = sld [smem:[#allocation2 + $0x79]]  ;;  %v466_v14 = vadd.f32 %v465_v55, %v462_v58  ;;  %v496_v11 = vmul.f32 %v495_v62, %v241_v49  ;;  %v504_v42 = vmul.f32 %v503_v13, %v407_v17 }
  0x93   :  { %s1930_s17 = sld [smem:[#allocation2 + $0x73]]  ;;  %v514_v53 = vstv %s1908_s0 }
  0x94   :  { %s1935_s23 = sld [smem:[#allocation2 + $0x74]]  ;;  %v517_v4 = vstv %s1912_s15  ;;  %v470_v12 = vadd.f32 %v469_v56, %v466_v14  ;;  %v515_v37 = vmul.f32 %v514_v53, %v158_v35  ;;  %v497_v19 = vadd.f32 %v496_v11, %v493_v9 }
  0x95   :  { %s1939_s21 = sld [smem:[#allocation2 + $0x75]]  ;;  %v518_v16 = vmul.f32 %v517_v4, %v241_v49  ;;  %v521_v36 = vstv %s1915_s13 }
  0x96   :  { %s1944_s26 = sld [smem:[#allocation2 + $0x76]]  ;;  %v474_v59 = vadd.f32 %v473_v30, %v470_v12  ;;  %v522_v21 = vmul.f32 %v521_v36, %v324_v63  ;;  %v525_v26 = vstv %s1919_s24  ;;  %v501_v31 = vadd.f32 %v500_v47, %v497_v19 }
  0x97   :  { %s1948_s30 = sld [smem:[#allocation2 + $0x77]]  ;;  %v519_v24 = vadd.f32 %v518_v16, %v515_v37  ;;  %v526_v32 = vmul.f32 %v525_v26, %v407_v17  ;;  %v529_v40 = vstv %s1921_s25 }
  0x98   :  { %s1951_s28 = sld [smem:[#allocation2 + $0x7a]]  ;;  %v478_v25 = vadd.f32 %v477_v52, %v474_v59  ;;  %v505_v43 = vadd.f32 %v504_v42, %v501_v31  ;;  %v533_v55 = vstv %s1925_s2 }
  0x99   :  { %v536_v0 = vstv %s1930_s17  ;;  %s1955_s3 = sld [smem:[#allocation2 + $0x7b]]  ;;  %v523_v10 = vadd.f32 %v522_v21, %v519_v24 }
  0x9a   :  { %v537_v44 = vmul.f32 %v536_v0, %v158_v35  ;;  %v539_v48 = vstv %s1935_s23  ;;  %s1959_s22 = sld [smem:[#allocation2 + $0x7c]]  ;;  %v482_v6 = vadd.f32 %v481_v8, %v478_v25  ;;  %v511_v35 = vstv %s1904_s19 }
  0x9b   :  { %v540_v22 = vmul.f32 %v539_v48, %v241_v49  ;;  %v543_v1 = vstv %s1939_s21  ;;  %s1962_s4 = sld [smem:[#allocation2 + $0x7d]]  ;;  %v527_v15 = vadd.f32 %v526_v32, %v523_v10 }
  0x9c   :  { %v544_v51 = vmul.f32 %v543_v1, %v324_v63  ;;  %s1965_s10 = sld [smem:[#allocation2 + $0x8a]]  ;;  %v547_v28 = vstv %s1944_s26  ;;  %v486_v3 = vadd.f32 %v485_v18, %v482_v6 }
  0x9d   :  { %v541_v27 = vadd.f32 %v540_v22, %v537_v44  ;;  %s1968_s18 = sld [smem:[#allocation2 + $0x7e]]  ;;  %v548_v34 = vmul.f32 %v547_v28, %v407_v17  ;;  %v551_v20 = vstv %s1948_s30 }
  0x9e   :  { %s1970_s1 = sld [smem:[#allocation2 + $0x7f]]  ;;  %v489_v38 = vadd.f32 %v488_v29, %v486_v3  ;;  %v555_v49 = vstv %s1951_s28 }
  0x9f   :  { %s1973_s20 = sld [smem:[#allocation2 + $0x80]]  ;;  %v545_v33 = vadd.f32 %v544_v51, %v541_v27  ;;  %v558_v56 = vstv %s1955_s3 }
  0xa0   :  { %s1975_s11 = sld [smem:[#allocation2 + $0x8b]]  ;;  %v490_v41 = vmax.f32 %v489_v38, 0.0  ;;  %v561_v57 = vstv %s1959_s22 }
  0xa1   :  { %s1977_s16 = sld [smem:[#allocation2 + $0x81]]  ;;  %v549_v45 = vadd.f32 %v548_v34, %v545_v33  ;;  %v565_v61 = vstv %s1962_s4 }
  0xa2   :  { %s1979_s9 = sld [smem:[#allocation2 + $0x82]]  ;;  %v508_v46 = vmul.f32 %v507_v39, %v490_v41  ;;  %v530_v50 = vmul.f32 %v529_v40, %v490_v41  ;;  %v552_v54 = vmul.f32 %v551_v20, %v490_v41  ;;  %v569_v7 = vstv %s1965_s10 }
  0xa3   :  { %s1984_s14 = sld [smem:[#allocation2 + $0x83]]  ;;  %v573_v62 = vstv %s1968_s18 }
  0xa4   :  { %s1986_s5 = sld [smem:[#allocation2 + $0x8c]]  ;;  %v509_v23 = vadd.f32 %v508_v46, %v505_v43  ;;  %v531_v58 = vadd.f32 %v530_v50, %v527_v15  ;;  %v553_v60 = vadd.f32 %v552_v54, %v549_v45  ;;  %v576_v63 = vstv %s1970_s1 }
  0xa5   :  { %s1988_s6 = sld [smem:[#allocation2 + $0x84]]  ;;  %v580_v2 = vstv %s1973_s20 }
  0xa6   :  { %s1991_s12 = sld [smem:[#allocation2 + $0x85]]  ;;  %v512_v4 = vadd.f32 %v511_v35, %v509_v23  ;;  %v534_v14 = vadd.f32 %v533_v55, %v531_v58  ;;  %v556_v30 = vadd.f32 %v555_v49, %v553_v60  ;;  %v584_v52 = vstv %s1975_s11 }
  0xa7   :  { %s1997_s27 = sld [smem:[#allocation2 + $0x86]]  ;;  %v588_v53 = vstv %s1977_s16 }
  0xa8   :  { %s2000_s7 = sld [smem:[#allocation2 + $0x8d]]  ;;  %v591_v5 = vstv %s1979_s9  ;;  %v559_v11 = vmul.f32 %v558_v56, %v512_v4  ;;  %v562_v12 = vmul.f32 %v561_v57, %v534_v14  ;;  %v566_v37 = vmul.f32 %v565_v61, %v556_v30 }
  0xa9   :  { %s2006_s29 = sld [smem:[#allocation2 + $0x87]]  ;;  %v595_v8 = vstv %s1984_s14  ;;  %v574_v16 = vmul.f32 %v573_v62, %v512_v4  ;;  %v577_v36 = vmul.f32 %v576_v63, %v534_v14  ;;  %v581_v17 = vmul.f32 %v580_v2, %v556_v30 }
  0xaa   :  { %s2009_s8 = sld [smem:[#allocation2 + $0x88]]  ;;  %v589_v18 = vmul.f32 %v588_v53, %v512_v4  ;;  %v592_v47 = vmul.f32 %v591_v5, %v534_v14  ;;  %v563_v0 = vadd.f32 %v562_v12, %v559_v11  ;;  %v596_v59 = vmul.f32 %v595_v8, %v556_v30 }
  0xab   :  { %v603_v9 = vstv %s1988_s6  ;;  %s2015_s19 = sld [smem:[#allocation2 + $0x89]]  ;;  %v578_v48 = vadd.f32 %v577_v36, %v574_v16  ;;  %v599_v25 = vstv %s1986_s5 }
  0xac   :  { %s2017_s0 = sld [smem:[#allocation2 + $0x8e]]  ;;  %v604_v13 = vmul.f32 %v603_v9, %v512_v4  ;;  %v606_v44 = vstv %s1991_s12  ;;  %v593_v19 = vadd.f32 %v592_v47, %v589_v18  ;;  %v567_v1 = vadd.f32 %v566_v37, %v563_v0 }
  0xad   :  { %s2019_s15 = sld [smem:[#allocation2 + $0x8f]]  ;;  %v607_v21 = vmul.f32 %v606_v44, %v534_v14  ;;  %v610_v22 = vstv %s1997_s27  ;;  %v582_v51 = vadd.f32 %v581_v17, %v578_v48 }
  0xae   :  { %s2022_s13 = sld [smem:[#allocation2 + $0x90]]  ;;  %v611_v24 = vmul.f32 %v610_v22, %v556_v30  ;;  %v597_v27 = vadd.f32 %v596_v59, %v593_v19  ;;  %v570_v29 = vadd.f32 %v569_v7, %v567_v1  ;;  %v614_v31 = vstv %s2000_s7 }
  0xaf   :  { %s2025_s24 = sld [smem:[#allocation2 + $0x91]]  ;;  %v618_v26 = vstv %s2006_s29  ;;  %v608_v28 = vadd.f32 %v607_v21, %v604_v13  ;;  %v585_v3 = vadd.f32 %v584_v52, %v582_v51 }
  0xb0   :  { %s2029_s25 = sld [smem:[#allocation2 + $0x92]]  ;;  %v619_v6 = vmul.f32 %v618_v26, %v512_v4  ;;  %v621_v42 = vstv %s2009_s8  ;;  %v600_v10 = vadd.f32 %v599_v25, %v597_v27  ;;  %v2038_v38 = vmax.f32 %v570_v29, 0.0 }
  0xb1   :  { %s2031_s2 = sld [smem:[#allocation2 + $0x93]]  ;;  %v625_v32 = vstv %s2015_s19  ;;  %v612_v33 = vadd.f32 %v611_v24, %v608_v28  ;;  %v622_v34 = vmul.f32 %v621_v42, %v534_v14  ;;  %v2042_v41 = vmax.f32 %v585_v3, 0.0 }
  0xb2   :  { %s2036_s17 = sld [smem:[#allocation2 + $0xf3]]  ;;  %v626_v39 = vmul.f32 %v625_v32, %v556_v30  ;;  %v2044_v43 = vmax.f32 %v600_v10, 0.0  ;;  %v629_v46 = vstv %s2017_s0 }
  0xb3   :  { %s1277_s23 = sld [smem:[#allocation2 + $0x94]]  ;;  %v633_v40 = vstv %s2019_s15  ;;  %v615_v15 = vadd.f32 %v614_v31, %v612_v33  ;;  %v623_v45 = vadd.f32 %v622_v34, %v619_v6 }
  0xb4   :  { %v636_v20 = vstv %s2022_s13  ;;  %s1278_s21 = sld [smem:[#allocation2 + $0x95]]  ;;  %v634_v35 = vmul.f32 %v633_v40, %v2038_v38 }
  0xb5   :  { %s1279_s26 = sld [smem:[#allocation2 + $0x96]]  ;;  %v640_v50 = vstv %s2025_s24  ;;  %v2050_v55 = vmax.f32 %v615_v15, 0.0  ;;  %v627_v49 = vadd.f32 %v626_v39, %v623_v45  ;;  %v637_v56 = vmul.f32 %v636_v20, %v2042_v41 }
  0xb6   :  { %v644_v54 = vstv %s2029_s25  ;;  %s1280_s30 = sld [smem:[#allocation2 + $0x97]]  ;;  %v641_v57 = vmul.f32 %v640_v50, %v2044_v43 }
  0xb7   :  { %s1281_s28 = sld [smem:[#allocation2 + $0x98]]  ;;  %v630_v23 = vadd.f32 %v629_v46, %v627_v49  ;;  %v638_v58 = vadd.f32 %v637_v56, %v634_v35  ;;  %v645_v60 = vmul.f32 %v644_v54, %v2050_v55  ;;  %v648_v62 = vstv %s2031_s2 }
  0xb8   :  { %s2054_s3 = sld [smem:[#allocation2 + $0xf4]]  ;;  %v652_v12 = vstv %s2036_s17 }
  0xb9   :  { %v655_v61 = vstv %s1277_s23  ;;  %s1283_s22 = sld [smem:[#allocation2 + $0x99]]  ;;  %v2059_v53 = vmax.f32 %v630_v23, 0.0  ;;  %v642_v4 = vadd.f32 %v641_v57, %v638_v58 }
  0xba   :  { %v656_v63 = vmul.f32 %v655_v61, %v2038_v38  ;;  %v658_v2 = vstv %s1278_s21  ;;  %s1284_s4 = sld [smem:[#allocation2 + $0x9a]] }
  0xbb   :  { %v659_v14 = vmul.f32 %v658_v2, %v2042_v41  ;;  %v662_v30 = vstv %s1279_s26  ;;  %s1285_s10 = sld [smem:[#allocation2 + $0x9b]]  ;;  %v646_v52 = vadd.f32 %v645_v60, %v642_v4  ;;  %v649_v8 = vmul.f32 %v648_v62, %v2059_v53 }
  0xbc   :  { %v663_v5 = vmul.f32 %v662_v30, %v2044_v43  ;;  %v666_v7 = vstv %s1280_s30  ;;  %s1286_s18 = sld [smem:[#allocation2 + $0x9c]] }
  0xbd   :  { %v660_v9 = vadd.f32 %v659_v14, %v656_v63  ;;  %v667_v11 = vmul.f32 %v666_v7, %v2050_v55  ;;  %s1287_s1 = sld [smem:[#allocation2 + $0x9d]]  ;;  %v670_v37 = vstv %s1281_s28  ;;  %v650_v16 = vadd.f32 %v649_v8, %v646_v52 }
  0xbe   :  { %s2066_s20 = sld [smem:[#allocation2 + $0xf5]]  ;;  %v671_v17 = vmul.f32 %v670_v37, %v2059_v53  ;;  %v674_v19 = vstv %s2054_s3 }
  0xbf   :  { %v664_v36 = vadd.f32 %v663_v5, %v660_v9  ;;  %v677_v18 = vstv %s1283_s22  ;;  %s1289_s11 = sld [smem:[#allocation2 + $0x9e]]  ;;  %v653_v59 = vadd.f32 %v652_v12, %v650_v16 }
  0xc0   :  { %v678_v47 = vmul.f32 %v677_v18, %v2038_v38  ;;  %v680_v0 = vstv %s1284_s4  ;;  %s1290_s16 = sld [smem:[#allocation2 + $0x9f]] }
  0xc1   :  { %v668_v13 = vadd.f32 %v667_v11, %v664_v36  ;;  %v681_v44 = vmul.f32 %v680_v0, %v2042_v41  ;;  %v684_v48 = vstv %s1285_s10  ;;  %s1291_s9 = sld [smem:[#allocation2 + $0xa0]]  ;;  %1072 = vst [vmem:[#allocation7] sm:$0xff] %v653_v59 }
  0xc2   :  { %v685_v21 = vmul.f32 %v684_v48, %v2044_v43  ;;  %v688_v22 = vstv %s1286_s18  ;;  %s1292_s14 = sld [smem:[#allocation2 + $0xa1]] }
  0xc3   :  { %v672_v1 = vadd.f32 %v671_v17, %v668_v13  ;;  %v682_v25 = vadd.f32 %v681_v44, %v678_v47  ;;  %v689_v24 = vmul.f32 %v688_v22, %v2050_v55  ;;  %v692_v26 = vstv %s1287_s1  ;;  %s1293_s5 = sld [smem:[#allocation2 + $0xa2]] }
  0xc4   :  { %s2074_s6 = sld [smem:[#allocation2 + $0xf6]]  ;;  %v693_v28 = vmul.f32 %v692_v26, %v2059_v53  ;;  %v696_v10 = vstv %s2066_s20 }
  0xc5   :  { %v675_v51 = vadd.f32 %v674_v19, %v672_v1  ;;  %v686_v27 = vadd.f32 %v685_v21, %v682_v25  ;;  %v699_v6 = vstv %s1289_s11  ;;  %s1295_s12 = sld [smem:[#allocation2 + $0xa3]] }
  0xc6   :  { %v700_v29 = vmul.f32 %v699_v6, %v2038_v38  ;;  %v702_v31 = vstv %s1290_s16  ;;  %s1296_s27 = sld [smem:[#allocation2 + $0xa4]] }
  0xc7   :  { %1074 = vst [vmem:[#allocation7 + $0x8] sm:$0xff] %v675_v51  ;;  %v690_v42 = vadd.f32 %v689_v24, %v686_v27  ;;  %v703_v32 = vmul.f32 %v702_v31, %v2042_v41  ;;  %v706_v3 = vstv %s1291_s9  ;;  %s1297_s7 = sld [smem:[#allocation2 + $0xa5]] }
  0xc8   :  { %v707_v33 = vmul.f32 %v706_v3, %v2044_v43  ;;  %v710_v34 = vstv %s1292_s14  ;;  %s1298_s29 = sld [smem:[#allocation2 + $0xa6]] }
  0xc9   :  { %v694_v39 = vadd.f32 %v693_v28, %v690_v42  ;;  %v704_v40 = vadd.f32 %v703_v32, %v700_v29  ;;  %v711_v20 = vmul.f32 %v710_v34, %v2050_v55  ;;  %v714_v15 = vstv %s1293_s5  ;;  %s1299_s8 = sld [smem:[#allocation2 + $0xa7]] }
  0xca   :  { %s2082_s19 = sld [smem:[#allocation2 + $0xf7]]  ;;  %v715_v35 = vmul.f32 %v714_v15, %v2059_v53  ;;  %v718_v58 = vstv %s2074_s6 }
  0xcb   :  { %v697_v45 = vadd.f32 %v696_v10, %v694_v39  ;;  %v708_v46 = vadd.f32 %v707_v33, %v704_v40  ;;  %v721_v50 = vstv %s1295_s12  ;;  %s1301_s0 = sld [smem:[#allocation2 + $0xa8]] }
  0xcc   :  { %v722_v54 = vmul.f32 %v721_v50, %v2038_v38  ;;  %v724_v49 = vstv %s1296_s27  ;;  %s1302_s15 = sld [smem:[#allocation2 + $0xa9]] }
  0xcd   :  { %1076 = vst [vmem:[#allocation7 + $0x10] sm:$0xff] %v697_v45  ;;  %v712_v56 = vadd.f32 %v711_v20, %v708_v46  ;;  %v725_v57 = vmul.f32 %v724_v49, %v2042_v41  ;;  %v728_v23 = vstv %s1297_s7  ;;  %s1303_s13 = sld [smem:[#allocation2 + $0xaa]] }
  0xce   :  { %v729_v60 = vmul.f32 %v728_v23, %v2044_v43  ;;  %v732_v61 = vstv %s1298_s29  ;;  %s1304_s24 = sld [smem:[#allocation2 + $0xab]] }
  0xcf   :  { %v716_v62 = vadd.f32 %v715_v35, %v712_v56  ;;  %v726_v63 = vadd.f32 %v725_v57, %v722_v54  ;;  %v733_v2 = vmul.f32 %v732_v61, %v2050_v55  ;;  %v736_v4 = vstv %s1299_s8  ;;  %s1305_s25 = sld [smem:[#allocation2 + $0xac]] }
  0xd0   :  { %s2090_s2 = sld [smem:[#allocation2 + $0xf8]]  ;;  %v737_v5 = vmul.f32 %v736_v4, %v2059_v53  ;;  %v740_v37 = vstv %s2082_s19 }
  0xd1   :  { %v719_v14 = vadd.f32 %v718_v58, %v716_v62  ;;  %v730_v30 = vadd.f32 %v729_v60, %v726_v63  ;;  %v743_v7 = vstv %s1301_s0  ;;  %s1307_s17 = sld [smem:[#allocation2 + $0xad]] }
  0xd2   :  { %v744_v52 = vmul.f32 %v743_v7, %v2038_v38  ;;  %v746_v8 = vstv %s1302_s15  ;;  %s1308_s23 = sld [smem:[#allocation2 + $0xae]] }
  0xd3   :  { %1078 = vst [vmem:[#allocation7 + $0x18] sm:$0xff] %v719_v14  ;;  %v734_v9 = vadd.f32 %v733_v2, %v730_v30  ;;  %v747_v11 = vmul.f32 %v746_v8, %v2042_v41  ;;  %v750_v12 = vstv %s1303_s13  ;;  %s1309_s21 = sld [smem:[#allocation2 + $0xaf]] }
  0xd4   :  { %v751_v16 = vmul.f32 %v750_v12, %v2044_v43  ;;  %v754_v36 = vstv %s1304_s24  ;;  %s1310_s26 = sld [smem:[#allocation2 + $0xb0]] }
  0xd5   :  { %v738_v17 = vadd.f32 %v737_v5, %v734_v9  ;;  %v748_v18 = vadd.f32 %v747_v11, %v744_v52  ;;  %v755_v47 = vmul.f32 %v754_v36, %v2050_v55  ;;  %v758_v0 = vstv %s1305_s25  ;;  %s1311_s30 = sld [smem:[#allocation2 + $0xb1]] }
  0xd6   :  { %s2098_s28 = sld [smem:[#allocation2 + $0xf9]]  ;;  %v759_v44 = vmul.f32 %v758_v0, %v2059_v53  ;;  %v762_v24 = vstv %s2090_s2 }
  0xd7   :  { %v741_v59 = vadd.f32 %v740_v37, %v738_v17  ;;  %v752_v13 = vadd.f32 %v751_v16, %v748_v18  ;;  %v765_v48 = vstv %s1307_s17  ;;  %s1313_s3 = sld [smem:[#allocation2 + $0xb2]] }
  0xd8   :  { %v766_v19 = vmul.f32 %v765_v48, %v2038_v38  ;;  %v768_v21 = vstv %s1308_s23  ;;  %s1314_s22 = sld [smem:[#allocation2 + $0xb3]] }
  0xd9   :  { %1080 = vst [vmem:[#allocation7 + $0x20] sm:$0xff] %v741_v59  ;;  %v756_v22 = vadd.f32 %v755_v47, %v752_v13  ;;  %v769_v1 = vmul.f32 %v768_v21, %v2042_v41  ;;  %v772_v25 = vstv %s1309_s21  ;;  %s1315_s4 = sld [smem:[#allocation2 + $0xb4]] }
  0xda   :  { %v773_v26 = vmul.f32 %v772_v25, %v2044_v43  ;;  %v776_v51 = vstv %s1310_s26  ;;  %s1316_s10 = sld [smem:[#allocation2 + $0xb5]] }
  0xdb   :  { %v760_v27 = vadd.f32 %v759_v44, %v756_v22  ;;  %v770_v28 = vadd.f32 %v769_v1, %v766_v19  ;;  %v777_v6 = vmul.f32 %v776_v51, %v2050_v55  ;;  %v780_v29 = vstv %s1311_s30  ;;  %s1317_s18 = sld [smem:[#allocation2 + $0xb6]] }
  0xdc   :  { %s2106_s1 = sld [smem:[#allocation2 + $0xfa]]  ;;  %v781_v32 = vmul.f32 %v780_v29, %v2059_v53  ;;  %v784_v20 = vstv %s2098_s28 }
  0xdd   :  { %v763_v31 = vadd.f32 %v762_v24, %v760_v27  ;;  %v774_v42 = vadd.f32 %v773_v26, %v770_v28  ;;  %v787_v3 = vstv %s1313_s3  ;;  %s1319_s20 = sld [smem:[#allocation2 + $0xb7]] }
  0xde   :  { %v788_v10 = vmul.f32 %v787_v3, %v2038_v38  ;;  %v790_v33 = vstv %s1314_s22  ;;  %s1320_s11 = sld [smem:[#allocation2 + $0xb8]] }
  0xdf   :  { %1082 = vst [vmem:[#allocation7 + $0x28] sm:$0xff] %v763_v31  ;;  %v778_v34 = vadd.f32 %v777_v6, %v774_v42  ;;  %v791_v39 = vmul.f32 %v790_v33, %v2042_v41  ;;  %v794_v40 = vstv %s1315_s4  ;;  %s1321_s16 = sld [smem:[#allocation2 + $0xb9]] }
  0xe0   :  { %v795_v15 = vmul.f32 %v794_v40, %v2044_v43  ;;  %v798_v45 = vstv %s1316_s10  ;;  %s1322_s9 = sld [smem:[#allocation2 + $0xba]] }
  0xe1   :  { %v782_v46 = vadd.f32 %v781_v32, %v778_v34  ;;  %v792_v35 = vadd.f32 %v791_v39, %v788_v10  ;;  %v799_v50 = vmul.f32 %v798_v45, %v2050_v55  ;;  %v802_v54 = vstv %s1317_s18  ;;  %s1323_s14 = sld [smem:[#allocation2 + $0xbb]] }
  0xe2   :  { %s2114_s5 = sld [smem:[#allocation2 + $0xfb]]  ;;  %v803_v57 = vmul.f32 %v802_v54, %v2059_v53  ;;  %v806_v2 = vstv %s2106_s1 }
  0xe3   :  { %v785_v49 = vadd.f32 %v784_v20, %v782_v46  ;;  %v796_v56 = vadd.f32 %v795_v15, %v792_v35  ;;  %v809_v23 = vstv %s1319_s20  ;;  %s1325_s6 = sld [smem:[#allocation2 + $0xbc]] }
  0xe4   :  { %v810_v58 = vmul.f32 %v809_v23, %v2038_v38  ;;  %v812_v60 = vstv %s1320_s11  ;;  %s1326_s12 = sld [smem:[#allocation2 + $0xbd]] }
  0xe5   :  { %1084 = vst [vmem:[#allocation7 + $0x30] sm:$0xff] %v785_v49  ;;  %v800_v61 = vadd.f32 %v799_v50, %v796_v56  ;;  %v813_v62 = vmul.f32 %v812_v60, %v2042_v41  ;;  %v816_v63 = vstv %s1321_s16  ;;  %s1327_s27 = sld [smem:[#allocation2 + $0xbe]] }
  0xe6   :  { %v817_v4 = vmul.f32 %v816_v63, %v2044_v43  ;;  %v820_v14 = vstv %s1322_s9  ;;  %s1328_s7 = sld [smem:[#allocation2 + $0xbf]] }
  0xe7   :  { %v804_v30 = vadd.f32 %v803_v57, %v800_v61  ;;  %v814_v5 = vadd.f32 %v813_v62, %v810_v58  ;;  %v821_v7 = vmul.f32 %v820_v14, %v2050_v55  ;;  %v824_v52 = vstv %s1323_s14  ;;  %s1329_s29 = sld [smem:[#allocation2 + $0xc0]] }
  0xe8   :  { %s2122_s8 = sld [smem:[#allocation2 + $0xfc]]  ;;  %v825_v11 = vmul.f32 %v824_v52, %v2059_v53  ;;  %v828_v47 = vstv %s2114_s5 }
  0xe9   :  { %v807_v8 = vadd.f32 %v806_v2, %v804_v30  ;;  %v818_v9 = vadd.f32 %v817_v4, %v814_v5  ;;  %v831_v12 = vstv %s1325_s6  ;;  %s1331_s19 = sld [smem:[#allocation2 + $0xc1]] }
  0xea   :  { %v832_v37 = vmul.f32 %v831_v12, %v2038_v38  ;;  %v834_v16 = vstv %s1326_s12  ;;  %s1332_s0 = sld [smem:[#allocation2 + $0xc2]] }
  0xeb   :  { %1086 = vst [vmem:[#allocation7 + $0x38] sm:$0xff] %v807_v8  ;;  %v822_v36 = vadd.f32 %v821_v7, %v818_v9  ;;  %v835_v17 = vmul.f32 %v834_v16, %v2042_v41  ;;  %v838_v18 = vstv %s1327_s27  ;;  %s1333_s15 = sld [smem:[#allocation2 + $0xc3]] }
  0xec   :  { %v839_v0 = vmul.f32 %v838_v18, %v2044_v43  ;;  %v842_v59 = vstv %s1328_s7  ;;  %s1334_s13 = sld [smem:[#allocation2 + $0xc4]] }
  0xed   :  { %v826_v13 = vadd.f32 %v825_v11, %v822_v36  ;;  %v836_v44 = vadd.f32 %v835_v17, %v832_v37  ;;  %v843_v48 = vmul.f32 %v842_v59, %v2050_v55  ;;  %v846_v19 = vstv %s1329_s29  ;;  %s1335_s24 = sld [smem:[#allocation2 + $0xc5]] }
  0xee   :  { %s2130_s25 = sld [smem:[#allocation2 + $0xfd]]  ;;  %v847_v1 = vmul.f32 %v846_v19, %v2059_v53  ;;  %v850_v6 = vstv %s2122_s8 }
  0xef   :  { %v829_v21 = vadd.f32 %v828_v47, %v826_v13  ;;  %v840_v22 = vadd.f32 %v839_v0, %v836_v44  ;;  %v853_v25 = vstv %s1331_s19  ;;  %s1337_s2 = sld [smem:[#allocation2 + $0xc6]] }
  0xf0   :  { %v854_v24 = vmul.f32 %v853_v25, %v2038_v38  ;;  %v856_v26 = vstv %s1332_s0  ;;  %s1338_s17 = sld [smem:[#allocation2 + $0xc7]] }
  0xf1   :  { %1088 = vst [vmem:[#allocation7 + $0x40] sm:$0xff] %v829_v21  ;;  %v844_v51 = vadd.f32 %v843_v48, %v840_v22  ;;  %v857_v27 = vmul.f32 %v856_v26, %v2042_v41  ;;  %v860_v28 = vstv %s1333_s15  ;;  %s1339_s23 = sld [smem:[#allocation2 + $0xc8]] }
  0xf2   :  { %v861_v29 = vmul.f32 %v860_v28, %v2044_v43  ;;  %v864_v31 = vstv %s1334_s13  ;;  %s1340_s21 = sld [smem:[#allocation2 + $0xc9]] }
  0xf3   :  { %v848_v42 = vadd.f32 %v847_v1, %v844_v51  ;;  %v858_v32 = vadd.f32 %v857_v27, %v854_v24  ;;  %v865_v3 = vmul.f32 %v864_v31, %v2050_v55  ;;  %v868_v10 = vstv %s1335_s24  ;;  %s1341_s26 = sld [smem:[#allocation2 + $0xca]] }
  0xf4   :  { %s2138_s30 = sld [smem:[#allocation2 + $0xfe]]  ;;  %v869_v39 = vmul.f32 %v868_v10, %v2059_v53  ;;  %v872_v50 = vstv %s2130_s25 }
  0xf5   :  { %v851_v33 = vadd.f32 %v850_v6, %v848_v42  ;;  %v862_v34 = vadd.f32 %v861_v29, %v858_v32  ;;  %v875_v40 = vstv %s1337_s2  ;;  %s1343_s28 = sld [smem:[#allocation2 + $0xcb]] }
  0xf6   :  { %v876_v20 = vmul.f32 %v875_v40, %v2038_v38  ;;  %v878_v15 = vstv %s1338_s17  ;;  %s1344_s3 = sld [smem:[#allocation2 + $0xcc]] }
  0xf7   :  { %1090 = vst [vmem:[#allocation7 + $0x48] sm:$0xff] %v851_v33  ;;  %v866_v45 = vadd.f32 %v865_v3, %v862_v34  ;;  %v879_v46 = vmul.f32 %v878_v15, %v2042_v41  ;;  %v882_v35 = vstv %s1339_s23  ;;  %s1345_s22 = sld [smem:[#allocation2 + $0xcd]] }
  0xf8   :  { %v883_v54 = vmul.f32 %v882_v35, %v2044_v43  ;;  %v886_v49 = vstv %s1340_s21  ;;  %s1346_s4 = sld [smem:[#allocation2 + $0xce]] }
  0xf9   :  { %v870_v56 = vadd.f32 %v869_v39, %v866_v45  ;;  %v880_v57 = vadd.f32 %v879_v46, %v876_v20  ;;  %v887_v23 = vmul.f32 %v886_v49, %v2050_v55  ;;  %v890_v58 = vstv %s1341_s26  ;;  %s1347_s10 = sld [smem:[#allocation2 + $0xcf]] }
  0xfa   :  { %s2146_s18 = sld [smem:[#allocation2 + $0xff]]  ;;  %v891_v62 = vmul.f32 %v890_v58, %v2059_v53  ;;  %v894_v7 = vstv %s2138_s30 }
  0xfb   :  { %v873_v60 = vadd.f32 %v872_v50, %v870_v56  ;;  %v884_v61 = vadd.f32 %v883_v54, %v880_v57  ;;  %v897_v63 = vstv %s1343_s28  ;;  %s1349_s1 = sld [smem:[#allocation2 + $0xd0]] }
  0xfc   :  { %v898_v2 = vmul.f32 %v897_v63, %v2038_v38  ;;  %v900_v4 = vstv %s1344_s3  ;;  %s1350_s20 = sld [smem:[#allocation2 + $0xd1]] }
  0xfd   :  { %1092 = vst [vmem:[#allocation7 + $0x50] sm:$0xff] %v873_v60  ;;  %v888_v14 = vadd.f32 %v887_v23, %v884_v61  ;;  %v901_v30 = vmul.f32 %v900_v4, %v2042_v41  ;;  %v904_v5 = vstv %s1345_s22  ;;  %s1351_s11 = sld [smem:[#allocation2 + $0xd2]] }
  0xfe   :  { %v905_v52 = vmul.f32 %v904_v5, %v2044_v43  ;;  %v908_v8 = vstv %s1346_s4  ;;  %s1352_s16 = sld [smem:[#allocation2 + $0xd3]] }
  0xff   :  { %v892_v9 = vadd.f32 %v891_v62, %v888_v14  ;;  %v902_v11 = vadd.f32 %v901_v30, %v898_v2  ;;  %v909_v12 = vmul.f32 %v908_v8, %v2050_v55  ;;  %v912_v37 = vstv %s1347_s10  ;;  %s1353_s9 = sld [smem:[#allocation2 + $0xd4]] }
 0x100   :  { %s2154_s14 = sld [smem:[#allocation2 + $0x100]]  ;;  %v913_v17 = vmul.f32 %v912_v37, %v2059_v53  ;;  %v916_v48 = vstv %s2146_s18 }
 0x101   :  { %v895_v16 = vadd.f32 %v894_v7, %v892_v9  ;;  %v906_v36 = vadd.f32 %v905_v52, %v902_v11  ;;  %v919_v18 = vstv %s1349_s1  ;;  %s1355_s5 = sld [smem:[#allocation2 + $0xd5]] }
 0x102   :  { %v920_v47 = vmul.f32 %v919_v18, %v2038_v38  ;;  %v922_v0 = vstv %s1350_s20  ;;  %s1356_s6 = sld [smem:[#allocation2 + $0xd6]] }
 0x103   :  { %1094 = vst [vmem:[#allocation7 + $0x58] sm:$0xff] %v895_v16  ;;  %v910_v59 = vadd.f32 %v909_v12, %v906_v36  ;;  %v923_v13 = vmul.f32 %v922_v0, %v2042_v41  ;;  %v926_v44 = vstv %s1351_s11  ;;  %s1357_s12 = sld [smem:[#allocation2 + $0xd7]] }
 0x104   :  { %v927_v19 = vmul.f32 %v926_v44, %v2044_v43  ;;  %v930_v21 = vstv %s1352_s16  ;;  %s1358_s27 = sld [smem:[#allocation2 + $0xd8]] }
 0x105   :  { %v914_v22 = vadd.f32 %v913_v17, %v910_v59  ;;  %v924_v1 = vadd.f32 %v923_v13, %v920_v47  ;;  %v931_v25 = vmul.f32 %v930_v21, %v2050_v55  ;;  %v934_v24 = vstv %s1353_s9  ;;  %s1359_s7 = sld [smem:[#allocation2 + $0xd9]] }
 0x106   :  { %s2162_s29 = sld [smem:[#allocation2 + $0x101]]  ;;  %v935_v27 = vmul.f32 %v934_v24, %v2059_v53  ;;  %v938_v3 = vstv %s2154_s14 }
 0x107   :  { %v917_v26 = vadd.f32 %v916_v48, %v914_v22  ;;  %v928_v51 = vadd.f32 %v927_v19, %v924_v1  ;;  %v941_v28 = vstv %s1355_s5  ;;  %s1361_s8 = sld [smem:[#allocation2 + $0xda]] }
 0x108   :  { %v942_v6 = vmul.f32 %v941_v28, %v2038_v38  ;;  %v944_v29 = vstv %s1356_s6  ;;  %s1362_s19 = sld [smem:[#allocation2 + $0xdb]] }
 0x109   :  { %1096 = vst [vmem:[#allocation7 + $0x60] sm:$0xff] %v917_v26  ;;  %v932_v31 = vadd.f32 %v931_v25, %v928_v51  ;;  %v945_v42 = vmul.f32 %v944_v29, %v2042_v41  ;;  %v948_v32 = vstv %s1357_s12  ;;  %s1363_s0 = sld [smem:[#allocation2 + $0xdc]] }
 0x10a   :  { %v949_v10 = vmul.f32 %v948_v32, %v2044_v43  ;;  %v952_v33 = vstv %s1358_s27  ;;  %s1364_s15 = sld [smem:[#allocation2 + $0xdd]] }
 0x10b   :  { %v936_v34 = vadd.f32 %v935_v27, %v932_v31  ;;  %v946_v39 = vadd.f32 %v945_v42, %v942_v6  ;;  %v953_v40 = vmul.f32 %v952_v33, %v2050_v55  ;;  %v956_v20 = vstv %s1359_s7  ;;  %s1365_s13 = sld [smem:[#allocation2 + $0xde]] }
 0x10c   :  { %s2170_s24 = sld [smem:[#allocation2 + $0x102]]  ;;  %v957_v46 = vmul.f32 %v956_v20, %v2059_v53  ;;  %v960_v23 = vstv %s2162_s29  ;;  %s1454_s29 = smov [#allocation7]  }
 0x10d   :  { %v939_v15 = vadd.f32 %v938_v3, %v936_v34  ;;  %v950_v45 = vadd.f32 %v949_v10, %v946_v39  ;;  %v963_v35 = vstv %s1361_s8  ;;  %s1367_s25 = sld [smem:[#allocation2 + $0xdf]]  ;;  %s1116_s8 = sshll.u32 %s1454_s29, 4  ;;  %s1117_s8 = int_to_ptr.vmem [resolvable:$true] %s1116_s8 }
 0x10e   :  { %v964_v50 = vmul.f32 %v963_v35, %v2038_v38  ;;  %v966_v54 = vstv %s1362_s19  ;;  %s1368_s2 = sld [smem:[#allocation2 + $0xe0]]  ;;  %s1424_s19 = scalar_lea.vmem %s1117_s8, 2560 }
 0x10f   :  { %1098 = vst [vmem:[#allocation7 + $0x68] sm:$0xff] %v939_v15  ;;  %v954_v49 = vadd.f32 %v953_v40, %v950_v45  ;;  %v967_v56 = vmul.f32 %v966_v54, %v2042_v41  ;;  %v970_v57 = vstv %s1363_s0  ;;  %s1369_s17 = sld [smem:[#allocation2 + $0xe1]]  ;;  %p1425_p5 = scmp.ne.s32.totalorder %s1117_s8, %s1424_s19 }
 0x110   :  { %v971_v58 = vmul.f32 %v970_v57, %v2044_v43  ;;  %v974_v60 = vstv %s1364_s15  ;;  %s1370_s23 = sld [smem:[#allocation2 + $0xe2]]  ;;  %p1429_p6 = scmp.lt.s32.totalorder %s1117_s8, %s1117_s8 }
 0x111   :  { %v958_v61 = vadd.f32 %v957_v46, %v954_v49  ;;  %v968_v62 = vadd.f32 %v967_v56, %v964_v50  ;;  %v975_v63 = vmul.f32 %v974_v60, %v2050_v55  ;;  %v978_v2 = vstv %s1365_s13  ;;  %s1371_s21 = sld [smem:[#allocation2 + $0xe3]]  ;;  %p1430_p7 = scmp.lt.s32.totalorder %s1424_s19, %s1424_s19 }
 0x112   :  { %s2178_s26 = sld [smem:[#allocation2 + $0x103]]  ;;  %v979_v30 = vmul.f32 %v978_v2, %v2059_v53  ;;  %v982_v12 = vstv %s2170_s24 }
 0x113   :  { %v961_v4 = vadd.f32 %v960_v23, %v958_v61  ;;  %v972_v14 = vadd.f32 %v971_v58, %v968_v62  ;;  %v985_v5 = vstv %s1367_s25  ;;  %s1373_s30 = sld [smem:[#allocation2 + $0xe4]]  ;;  %p1431_p8 = por %p1430_p7, %p1429_p6 }
 0x114   :  { %v986_v7 = vmul.f32 %v985_v5, %v2038_v38  ;;  %v988_v52 = vstv %s1368_s2  ;;  %s1374_s28 = sld [smem:[#allocation2 + $0xe5]] }
 0x115   :  { %1100 = vst [vmem:[#allocation7 + $0x70] sm:$0xff] %v961_v4  ;;  %v976_v8 = vadd.f32 %v975_v63, %v972_v14  ;;  %v989_v9 = vmul.f32 %v988_v52, %v2042_v41  ;;  %v992_v11 = vstv %s1369_s17  ;;  %s1375_s3 = sld [smem:[#allocation2 + $0xe6]]  ;;  %p1432_p9 = pnand %p1431_p8, %p1425_p5 }
 0x116   :  { %v993_v37 = vmul.f32 %v992_v11, %v2044_v43  ;;  %v996_v16 = vstv %s1370_s23  ;;  %s1376_s22 = sld [smem:[#allocation2 + $0xe7]] }
 0x117   :  { %v980_v36 = vadd.f32 %v979_v30, %v976_v8  ;;  %v990_v17 = vadd.f32 %v989_v9, %v986_v7  ;;  %v997_v18 = vmul.f32 %v996_v16, %v2050_v55  ;;  %v1000_v47 = vstv %s1371_s21  ;;  %s1377_s4 = sld [smem:[#allocation2 + $0xe8]] }
 0x118   :  { %s2186_s10 = sld [smem:[#allocation2 + $0x104]]  ;;  %v1001_v13 = vmul.f32 %v1000_v47, %v2059_v53  ;;  %v1004_v25 = vstv %s2178_s26 }
 0x119   :  { %v983_v0 = vadd.f32 %v982_v12, %v980_v36  ;;  %v994_v59 = vadd.f32 %v993_v37, %v990_v17  ;;  %v1007_v44 = vstv %s1373_s30  ;;  %s1379_s18 = sld [smem:[#allocation2 + $0xe9]] }
 0x11a   :  { %v1008_v48 = vmul.f32 %v1007_v44, %v2038_v38  ;;  %v1010_v19 = vstv %s1374_s28  ;;  %s1380_s1 = sld [smem:[#allocation2 + $0xea]] }
 0x11b   :  { %1102 = vst [vmem:[#allocation7 + $0x78] sm:$0xff] %v983_v0  ;;  %v998_v21 = vadd.f32 %v997_v18, %v994_v59  ;;  %v1011_v22 = vmul.f32 %v1010_v19, %v2042_v41  ;;  %v1014_v1 = vstv %s1375_s3  ;;  %s1381_s20 = sld [smem:[#allocation2 + $0xeb]] }
 0x11c   :  { %v1015_v24 = vmul.f32 %v1014_v1, %v2044_v43  ;;  %v1018_v26 = vstv %s1376_s22  ;;  %s1382_s11 = sld [smem:[#allocation2 + $0xec]] }
 0x11d   :  { %v1002_v51 = vadd.f32 %v1001_v13, %v998_v21  ;;  %v1012_v27 = vadd.f32 %v1011_v22, %v1008_v48  ;;  %v1019_v28 = vmul.f32 %v1018_v26, %v2050_v55  ;;  %v1022_v6 = vstv %s1377_s4  ;;  %s1383_s16 = sld [smem:[#allocation2 + $0xed]] }
 0x11e   :  { %s2194_s9 = sld [smem:[#allocation2 + $0x105]]  ;;  %v1023_v42 = vmul.f32 %v1022_v6, %v2059_v53  ;;  %v1026_v40 = vstv %s2186_s10 }
 0x11f   :  { %v1005_v29 = vadd.f32 %v1004_v25, %v1002_v51  ;;  %v1016_v31 = vadd.f32 %v1015_v24, %v1012_v27  ;;  %v1029_v32 = vstv %s1379_s18  ;;  %s1385_s14 = sld [smem:[#allocation2 + $0xee]] }
 0x120   :  { %v1030_v3 = vmul.f32 %v1029_v32, %v2038_v38  ;;  %v1032_v10 = vstv %s1380_s1  ;;  %s1386_s5 = sld [smem:[#allocation2 + $0xef]] }
 0x121   :  { %1104 = vst [vmem:[#allocation7 + $0x80] sm:$0xff] %v1005_v29  ;;  %v1020_v33 = vadd.f32 %v1019_v28, %v1016_v31  ;;  %v1033_v34 = vmul.f32 %v1032_v10, %v2042_v41  ;;  %v1036_v39 = vstv %s1381_s20  ;;  %s1387_s6 = sld [smem:[#allocation2 + $0xf0]] }
 0x122   :  { %v1037_v20 = vmul.f32 %v1036_v39, %v2044_v43  ;;  %v1040_v15 = vstv %s1382_s11  ;;  %s1388_s12 = sld [smem:[#allocation2 + $0xf1]] }
 0x123   :  { %v1024_v45 = vadd.f32 %v1023_v42, %v1020_v33  ;;  %v1034_v46 = vadd.f32 %v1033_v34, %v1030_v3  ;;  %v1041_v35 = vmul.f32 %v1040_v15, %v2050_v55  ;;  %v1044_v50 = vstv %s1383_s16  ;;  %s1389_s27 = sld [smem:[#allocation2 + $0xf2]] }
 0x124   :  { %v1045_v56 = vmul.f32 %v1044_v50, %v2059_v53  ;;  %s1390_s7 = sld [smem:[#allocation2 + $0x106]]  ;;  %v1048_v63 = vstv %s2194_s9 }
 0x125   :  { %v1027_v54 = vadd.f32 %v1026_v40, %v1024_v45  ;;  %v1038_v49 = vadd.f32 %v1037_v20, %v1034_v46  ;;  %v1051_v57 = vstv %s1385_s14 }
 0x126   :  { %v1052_v23 = vmul.f32 %v1051_v57, %v2038_v38  ;;  %v1054_v58 = vstv %s1386_s5 }
 0x127   :  { %1106 = vst [vmem:[#allocation7 + $0x88] sm:$0xff] %v1027_v54  ;;  %v1042_v60 = vadd.f32 %v1041_v35, %v1038_v49  ;;  %v1055_v61 = vmul.f32 %v1054_v58, %v2042_v41  ;;  %v1058_v62 = vstv %s1387_s6 }
 0x128   :  { %v1059_v2 = vmul.f32 %v1058_v62, %v2044_v43  ;;  %v1062_v4 = vstv %s1388_s12 }
 0x129   :  { %v1046_v14 = vadd.f32 %v1045_v56, %v1042_v60  ;;  %v1056_v30 = vadd.f32 %v1055_v61, %v1052_v23  ;;  %v1063_v5 = vmul.f32 %v1062_v4, %v2050_v55  ;;  %v1066_v7 = vstv %s1389_s27 }
 0x12a   :  { %v1067_v38 = vmul.f32 %v1066_v7, %v2059_v53  ;;  %v1070_v11 = vstv %s1390_s7 }
 0x12b   :  { %v1049_v52 = vadd.f32 %v1048_v63, %v1046_v14  ;;  %v1060_v8 = vadd.f32 %v1059_v2, %v1056_v30 }
 0x12d   :  { %1108 = vst [vmem:[#allocation7 + $0x90] sm:$0xff] %v1049_v52  ;;  %v1064_v9 = vadd.f32 %v1063_v5, %v1060_v8 }
 0x12f   :  { %v1068_v41 = vadd.f32 %v1067_v38, %v1064_v9 }
 0x131   :  { %v1071_v12 = vadd.f32 %v1070_v11, %v1068_v41 }
 0x133   :  { %1110 = vst [vmem:[#allocation7 + $0x98] sm:$0xff] %v1071_v12 }
 0x134   :  { %1435 = shalt.err (!%p1432_p9)
}
 0x135   :  { %s2229_s0 = smov 8   ;;  %s2230_s15 = smov 128  }
 0x136   :  { %s2231_s25 = sld [smem:[#allocation15_spill]] }
 0x13c   :  { %1122 = dma.vmem_to_hbm [thread:$0]  %s1117_s8, 2560, %s2231_s25, [#allocation4], %s2230_s15, %s2230_s15, %s2229_s0  }
 0x13d   :  { %1448 = dma.done.wait [#allocation4], 2560  }
 0x13e   :  { %1449 = vsyncadd [#allocation4], 4294964736 }
 0x13f   :  { %1126 = vsyncpa [#allocation3], 1 }
 0x140   :  { %1127 = vsyncpa [#allocation4], 1 }
 0x141   :  { %1128 = vsyncpa [#allocation5], 1 }

</bundles_post_ra>
